<compile_context>
chip_gen: v7x
topology: tpu7x:2x2x1
jax: 0.10.0
libtpu: 0.0.40
codegen_flags: <defaults>
</compile_context>

<pallas_src>
import functools

import jax
import jax.numpy as jnp
from jax import lax
from jax.experimental import pallas as pl
from jax.experimental.pallas import tpu as pltpu


# ----------------------------------------------------------------------------
# Kernel 1: bidirectional LSTM over a block of T_BLK timesteps per grid step.
# Gate order is PyTorch's (i, f, g, o).  All activation slabs are 2-D with rows
# ordered (t, b) -> row t*B + b.
# ----------------------------------------------------------------------------
def _bilstm_kernel(xf_ref, xb_ref, wif_ref, wib_ref, bf_ref, bb_ref, whh_ref,
                   of_ref, ob_ref, stats_ref,
                   h_ref, c_ref, xpf_ref, xpb_ref,
                   *, H, T_BLK, T):
    tb = pl.program_id(0)
    nTb = pl.num_programs(0)
    B = h_ref.shape[0]

    @pl.when(tb == 0)
    def _init():
        h_ref[...] = jnp.zeros_like(h_ref)
        c_ref[...] = jnp.zeros_like(c_ref)
        stats_ref[...] = jnp.zeros_like(stats_ref)

    # Hoisted input projection for the whole time block: one large MXU matmul per
    # direction instead of a tiny (B, D) matmul per timestep.  Biases folded in.
    xpf_ref[...] = (jnp.dot(xf_ref[...], wif_ref[...],
                            preferred_element_type=jnp.float32) + bf_ref[...])
    xpb_ref[...] = (jnp.dot(xb_ref[...], wib_ref[...],
                            preferred_element_type=jnp.float32) + bb_ref[...])

    whh = whh_ref[...]      # block-diagonal (2H, 8H): one matmul for both directions

    def cell(gates, c):
        i = jax.nn.sigmoid(gates[:, 0:H])
        f = jax.nn.sigmoid(gates[:, H:2 * H])
        g = jnp.tanh(gates[:, 2 * H:3 * H])
        o = jax.nn.sigmoid(gates[:, 3 * H:4 * H])
        c_new = f * c + i * g
        h_new = o * jnp.tanh(c_new)
        return h_new, c_new

    def step(s, carry):
        h, c, ssum, ssq = carry
        t_f = tb * T_BLK + s                              # forward global time
        t_b = (nTb - 1 - tb) * T_BLK + (T_BLK - 1 - s)    # backward global time

        # If T was padded up to a multiple of T_BLK, the backward direction walks
        # through the zero padding first; reset its state at its first real step.
        reset_b = t_b == (T - 1)
        h_in = jnp.concatenate([h[:, :H], jnp.where(reset_b, 0.0, h[:, H:])], axis=1)
        c_in = jnp.concatenate([c[:, :H], jnp.where(reset_b, 0.0, c[:, H:])], axis=1)

        hh = jnp.dot(h_in, whh, preferred_element_type=jnp.float32)   # (B, 8H)
        gates_f = xpf_ref[pl.ds(s * B, B), :] + hh[:, :4 * H]
        gates_b = xpb_ref[pl.ds((T_BLK - 1 - s) * B, B), :] + hh[:, 4 * H:]

        h_f, c_f = cell(gates_f, c_in[:, :H])
        h_b, c_b = cell(gates_b, c_in[:, H:])

        of_ref[pl.ds(s * B, B), :] = h_f.astype(of_ref.dtype)
        ob_ref[pl.ds((T_BLK - 1 - s) * B, B), :] = h_b.astype(ob_ref.dtype)

        # BatchNorm statistics accumulated on the fly (padded steps masked out).
        wf = (t_f < T).astype(jnp.float32)
        wb = (t_b < T).astype(jnp.float32)
        dsum = jnp.concatenate(
            [wf * jnp.sum(h_f, axis=0, keepdims=True),
             wb * jnp.sum(h_b, axis=0, keepdims=True)], axis=1)
        dsq = jnp.concatenate(
            [wf * jnp.sum(h_f * h_f, axis=0, keepdims=True),
             wb * jnp.sum(h_b * h_b, axis=0, keepdims=True)], axis=1)

        h_new = jnp.concatenate([h_f, h_b], axis=1)
        c_new = jnp.concatenate([c_f, c_b], axis=1)
        return h_new, c_new, ssum + dsum, ssq + dsq

    zero_row = jnp.zeros((1, 2 * H), jnp.float32)
    h_fin, c_fin, ssum, ssq = lax.fori_loop(
        0, T_BLK, step, (h_ref[...], c_ref[...], zero_row, zero_row), unroll=True)

    h_ref[...] = h_fin
    c_ref[...] = c_fin
    stats_ref[0:1, :] = stats_ref[0:1, :] + ssum
    stats_ref[1:2, :] = stats_ref[1:2, :] + ssq


# ----------------------------------------------------------------------------
# Kernel 2: fused BatchNorm (precomputed per-channel scale/shift) + implicit
# channel concat of the two directions.  Pure elementwise, tiled over time blocks.
# ----------------------------------------------------------------------------
def _bn_affine_kernel(hf_ref, hb_ref, scale_ref, shift_ref, o_ref):
    h = jnp.concatenate([hf_ref[...], hb_ref[...]], axis=-1)      # (rows, 2H)
    o_ref[...] = (h * scale_ref[...] + shift_ref[...]).astype(o_ref.dtype)


# ----------------------------------------------------------------------------
# One-time parameter preparation (PyTorch layout -> kernel layout).
# ----------------------------------------------------------------------------
def prepare_params(params):
    H = params["wh_f"].shape[1]           # weight_hh is (4H, H)
    whh_bd = jnp.zeros((2 * H, 8 * H), jnp.float32)
    whh_bd = whh_bd.at[:H, :4 * H].set(params["wh_f"].T.astype(jnp.float32))
    whh_bd = whh_bd.at[H:, 4 * H:].set(params["wh_b"].T.astype(jnp.float32))
    return {
        "wif_t": params["wi_f"].T.astype(jnp.float32),      # (D, 4H)
        "wib_t": params["wi_b"].T.astype(jnp.float32),      # (D, 4H)
        "whh_bd": whh_bd,                                   # (2H, 8H) block-diagonal
        "b_f": params["b_f"][None, :].astype(jnp.float32),  # (1, 4H) = b_ih + b_hh
        "b_b": params["b_b"][None, :].astype(jnp.float32),
        "gamma": params["gamma"].astype(jnp.float32),       # (2H,)
        "beta": params["beta"].astype(jnp.float32),         # (2H,)
    }


# ----------------------------------------------------------------------------
# Wrapper: (B, T, D) -> (B, T, 2H), matching lstm_block.forward semantics.
# ----------------------------------------------------------------------------
def lstm_block_forward(x_btd, prep, *, t_blk=32):
    B, T, D = x_btd.shape
    H = prep["whh_bd"].shape[0] // 2
    T_BLK = min(t_blk, T)
    nTb = pl.cdiv(T, T_BLK)
    T_pad = nTb * T_BLK

    x_tbd = jnp.transpose(x_btd, (1, 0, 2)).astype(jnp.float32)   # (T, B, D)
    if T_pad != T:
        x_tbd = jnp.pad(x_tbd, ((0, T_pad - T), (0, 0), (0, 0)))
    x2d = x_tbd.reshape(T_pad * B, D)                             # rows = (t, b)

    kernel = functools.partial(_bilstm_kernel, H=H, T_BLK=T_BLK, T=T)
    out_f, out_b, stats = pl.pallas_call(
        kernel,
        out_shape=(
            jax.ShapeDtypeStruct((T_pad * B, H), jnp.float32),    # forward hidden
            jax.ShapeDtypeStruct((T_pad * B, H), jnp.float32),    # backward hidden
            jax.ShapeDtypeStruct((2, 2 * H), jnp.float32),        # [sum; sumsq]
        ),
        grid_spec=pltpu.PrefetchScalarGridSpec(
            num_scalar_prefetch=0,
            grid=(nTb,),
            in_specs=[
                pl.BlockSpec((T_BLK * B, D), lambda tb: (tb, 0)),            # x fwd
                pl.BlockSpec((T_BLK * B, D), lambda tb: (nTb - 1 - tb, 0)),  # x bwd
                pl.BlockSpec((D, 4 * H), lambda tb: (0, 0)),                 # W_ih fwd^T
                pl.BlockSpec((D, 4 * H), lambda tb: (0, 0)),                 # W_ih bwd^T
                pl.BlockSpec((1, 4 * H), lambda tb: (0, 0)),                 # b fwd
                pl.BlockSpec((1, 4 * H), lambda tb: (0, 0)),                 # b bwd
                pl.BlockSpec((2 * H, 8 * H), lambda tb: (0, 0)),             # W_hh blkdiag
            ],
            out_specs=[
                pl.BlockSpec((T_BLK * B, H), lambda tb: (tb, 0)),
                pl.BlockSpec((T_BLK * B, H), lambda tb: (nTb - 1 - tb, 0)),
                pl.BlockSpec((2, 2 * H), lambda tb: (0, 0)),                 # resident acc
            ],
            scratch_shapes=[
                pltpu.VMEM((B, 2 * H), jnp.float32),                # h (fwd | bwd)
                pltpu.VMEM((B, 2 * H), jnp.float32),                # c (fwd | bwd)
                pltpu.VMEM((T_BLK * B, 4 * H), jnp.float32),        # xproj fwd
                pltpu.VMEM((T_BLK * B, 4 * H), jnp.float32),        # xproj bwd
            ],
        ),
        compiler_params=pltpu.CompilerParams(
            dimension_semantics=("arbitrary",)),
    )(x2d, x2d,
      prep["wif_t"], prep["wib_t"], prep["b_f"], prep["b_b"], prep["whh_bd"])

    # BatchNorm1d (training-mode batch stats) folded into per-channel scale/shift.
    n = jnp.float32(B * T)
    mean = stats[0] / n
    var = stats[1] / n - mean * mean                     # biased variance
    inv = lax.rsqrt(var + 1e-5)
    scale = (prep["gamma"] * inv)[None, :]                          # (1, 2H)
    shift = (prep["beta"] - mean * prep["gamma"] * inv)[None, :]    # (1, 2H)

    y2d = pl.pallas_call(
        _bn_affine_kernel,
        out_shape=jax.ShapeDtypeStruct((T_pad * B, 2 * H), jnp.float32),
        grid_spec=pltpu.PrefetchScalarGridSpec(
            num_scalar_prefetch=0,
            grid=(nTb,),
            in_specs=[
                pl.BlockSpec((T_BLK * B, H), lambda tb: (tb, 0)),
                pl.BlockSpec((T_BLK * B, H), lambda tb: (tb, 0)),
                pl.BlockSpec((1, 2 * H), lambda tb: (0, 0)),
                pl.BlockSpec((1, 2 * H), lambda tb: (0, 0)),
            ],
            out_specs=pl.BlockSpec((T_BLK * B, 2 * H), lambda tb: (tb, 0)),
        ),
        compiler_params=pltpu.CompilerParams(
            dimension_semantics=("parallel",)),
    )(out_f, out_b, scale, shift)

    y = y2d.reshape(T_pad, B, 2 * H)[:T]
    # TODO(synk): final time-major -> batch-first transpose done by XLA (fusing it
    # would need an in-kernel major-dim relayout or batch-major recurrent stores).
    return jnp.transpose(y, (1, 0, 2))                              # (B, T, 2H)


# ----------------------------------------------------------------------------
# Pure-JAX reference (for a sanity check).
# ----------------------------------------------------------------------------
def lstm_block_ref(x_btd, params):
    H = params["wh_f"].shape[1]

    def run_dir(x_tbd, wi, wh, b):
        B = x_tbd.shape[1]

        def step(carry, xt):
            h, c = carry
            gates = xt @ wi.T + h @ wh.T + b
            i = jax.nn.sigmoid(gates[:, :H])
            f = jax.nn.sigmoid(gates[:, H:2 * H])
            g = jnp.tanh(gates[:, 2 * H:3 * H])
            o = jax.nn.sigmoid(gates[:, 3 * H:])
            c = f * c + i * g
            h = o * jnp.tanh(c)
            return (h, c), h

        init = (jnp.zeros((B, H), jnp.float32), jnp.zeros((B, H), jnp.float32))
        _, hs = jax.lax.scan(step, init, x_tbd)
        return hs

    x_tbd = jnp.transpose(x_btd, (1, 0, 2))
    hf = run_dir(x_tbd, params["wi_f"], params["wh_f"], params["b_f"])
    hb = run_dir(x_tbd[::-1], params["wi_b"], params["wh_b"], params["b_b"])[::-1]
    out = jnp.concatenate([hf, hb], axis=-1)                  # (T, B, 2H)
    mean = jnp.mean(out, axis=(0, 1), keepdims=True)
    var = jnp.mean((out - mean) ** 2, axis=(0, 1), keepdims=True)
    y = (out - mean) * lax.rsqrt(var + 1e-5) * params["gamma"] + params["beta"]
    return jnp.transpose(y, (1, 0, 2))


def init_params(key, in_shape, hidden_size):
    k = 1.0 / jnp.sqrt(jnp.float32(hidden_size))
    keys = jax.random.split(key, 8)
    H, D = hidden_size, in_shape
    u = lambda kk, shape: jax.random.uniform(kk, shape, jnp.float32, -k, k)
    return {
        # PyTorch layout: weight_ih (4H, D), weight_hh (4H, H); bias = b_ih + b_hh
        "wi_f": u(keys[0], (4 * H, D)),
        "wh_f": u(keys[1], (4 * H, H)),
        "b_f": u(keys[2], (4 * H,)) + u(keys[3], (4 * H,)),
        "wi_b": u(keys[4], (4 * H, D)),
        "wh_b": u(keys[5], (4 * H, H)),
        "b_b": u(keys[6], (4 * H,)) + u(keys[7], (4 * H,)),
        # BatchNorm1d defaults: gamma=1, beta=0
        "gamma": jnp.ones((2 * H,), jnp.float32),
        "beta": jnp.zeros((2 * H,), jnp.float32),
    }


if __name__ == "__main__":
    B, T, D, H = 2, 8, 16, 32
    key = jax.random.PRNGKey(0)
    kx, kp = jax.random.split(key)
    x = jax.random.normal(kx, (B, T, D), jnp.float32)
    params = init_params(kp, D, H)
    prep = prepare_params(params)

    y = jax.block_until_ready(lstm_block_forward(x, prep))
    y_ref = jax.block_until_ready(lstm_block_ref(x, params))

    assert y.shape == (B, T, 2 * H), y.shape
    err = float(jnp.max(jnp.abs(y - y_ref)))
    assert jnp.allclose(y, y_ref, atol=1e-2, rtol=1e-2), err
    print("KERNEL_OK")
</pallas_src>

<mosaic_0001>
module attributes {stable_mosaic.version = 11 : i64} {
  func.func @_bilstm_kernel(%arg0: i32, %arg1: memref<16x16xf32, #tpu.memory_space<vmem>>, %arg2: memref<16x16xf32, #tpu.memory_space<vmem>>, %arg3: memref<16x128xf32, #tpu.memory_space<vmem>>, %arg4: memref<16x128xf32, #tpu.memory_space<vmem>>, %arg5: memref<1x128xf32, #tpu.memory_space<vmem>>, %arg6: memref<1x128xf32, #tpu.memory_space<vmem>>, %arg7: memref<64x256xf32, #tpu.memory_space<vmem>>, %arg8: memref<16x32xf32, #tpu.memory_space<vmem>>, %arg9: memref<16x32xf32, #tpu.memory_space<vmem>>, %arg10: memref<2x64xf32, #tpu.memory_space<vmem>>, %arg11: memref<2x64xf32, #tpu.memory_space<vmem>>, %arg12: memref<2x64xf32, #tpu.memory_space<vmem>>, %arg13: memref<16x128xf32, #tpu.memory_space<vmem>>, %arg14: memref<16x128xf32, #tpu.memory_space<vmem>>) attributes {dimension_semantics = [#tpu.dimension_semantics<arbitrary>], iteration_bounds = array<i64: 1>, scalar_prefetch = 0 : i64, scratch_operands = 4 : i64, tpu.core_type = #tpu.core_type<tc>, window_params = [{transform_indices = @transform_0, window_bounds = array<i64: 16, 16>}, {transform_indices = @transform_1, window_bounds = array<i64: 16, 16>}, {pipeline_mode = #tpu.pipeline_mode<synchronous>, transform_indices = @transform_2, window_bounds = array<i64: 16, 128>}, {pipeline_mode = #tpu.pipeline_mode<synchronous>, transform_indices = @transform_3, window_bounds = array<i64: 16, 128>}, {pipeline_mode = #tpu.pipeline_mode<synchronous>, transform_indices = @transform_4, window_bounds = array<i64: 1, 128>}, {pipeline_mode = #tpu.pipeline_mode<synchronous>, transform_indices = @transform_5, window_bounds = array<i64: 1, 128>}, {pipeline_mode = #tpu.pipeline_mode<synchronous>, transform_indices = @transform_6, window_bounds = array<i64: 64, 256>}, {transform_indices = @transform_7, window_bounds = array<i64: 16, 32>}, {transform_indices = @transform_8, window_bounds = array<i64: 16, 32>}, {pipeline_mode = #tpu.pipeline_mode<synchronous>, transform_indices = @transform_9, window_bounds = array<i64: 2, 64>}]} {
    %c0_i32 = arith.constant 0 : i32
    %0 = arith.cmpi eq, %arg0, %c0_i32 : i32
    %1 = arith.extui %0 : i1 to i32
    %c0_i32_0 = arith.constant 0 : i32
    %2 = arith.cmpi ne, %1, %c0_i32_0 : i32
    scf.if %2 {
      %cst_276 = arith.constant 0.000000e+00 : f32
      %973 = vector.broadcast %cst_276 : f32 to vector<2x64xf32>
      %c0_277 = arith.constant 0 : index
      %c0_278 = arith.constant 0 : index
      %974 = vector.load %arg11[%c0_277, %c0_278] : memref<2x64xf32, #tpu.memory_space<vmem>>, vector<2x64xf32>
      tpu.vector_store %arg11[%c0_277, %c0_278], %973 {strides = array<i32>} : memref<2x64xf32, #tpu.memory_space<vmem>>, vector<2x64xf32>,
      %cst_279 = arith.constant 0.000000e+00 : f32
      %975 = vector.broadcast %cst_279 : f32 to vector<2x64xf32>
      %c0_280 = arith.constant 0 : index
      %c0_281 = arith.constant 0 : index
      %976 = vector.load %arg12[%c0_280, %c0_281] : memref<2x64xf32, #tpu.memory_space<vmem>>, vector<2x64xf32>
      tpu.vector_store %arg12[%c0_280, %c0_281], %975 {strides = array<i32>} : memref<2x64xf32, #tpu.memory_space<vmem>>, vector<2x64xf32>,
      %cst_282 = arith.constant 0.000000e+00 : f32
      %977 = vector.broadcast %cst_282 : f32 to vector<2x64xf32>
      %c0_283 = arith.constant 0 : index
      %c0_284 = arith.constant 0 : index
      %978 = vector.load %arg10[%c0_283, %c0_284] : memref<2x64xf32, #tpu.memory_space<vmem>>, vector<2x64xf32>
      tpu.vector_store %arg10[%c0_283, %c0_284], %977 {strides = array<i32>} : memref<2x64xf32, #tpu.memory_space<vmem>>, vector<2x64xf32>,
    } else {
    }
    %c0 = arith.constant 0 : index
    %c0_1 = arith.constant 0 : index
    %3 = vector.load %arg1[%c0, %c0_1] : memref<16x16xf32, #tpu.memory_space<vmem>>, vector<16x16xf32>
    %c0_2 = arith.constant 0 : index
    %c0_3 = arith.constant 0 : index
    %4 = vector.load %arg3[%c0_2, %c0_3] : memref<16x128xf32, #tpu.memory_space<vmem>>, vector<16x128xf32>
    %cst = arith.constant dense<0.000000e+00> : vector<16x128xf32>
    %5 = tpu.matmul %3, %4, %cst {dimension_numbers = #tpu.dot_dimension_numbers<[1], [0], [0], [1], [0, 0, 1, 1], [], []>} : vector<16x16xf32>, vector<16x128xf32>, vector<16x128xf32> -> vector<16x128xf32>
    %c0_4 = arith.constant 0 : index
    %c0_5 = arith.constant 0 : index
    %6 = vector.load %arg5[%c0_4, %c0_5] : memref<1x128xf32, #tpu.memory_space<vmem>>, vector<1x128xf32>
    %7 = vector.broadcast %6 : vector<1x128xf32> to vector<16x128xf32>
    %8 = arith.addf %5, %7 : vector<16x128xf32>
    %c0_6 = arith.constant 0 : index
    %c0_7 = arith.constant 0 : index
    %9 = vector.load %arg13[%c0_6, %c0_7] : memref<16x128xf32, #tpu.memory_space<vmem>>, vector<16x128xf32>
    tpu.vector_store %arg13[%c0_6, %c0_7], %8 {strides = array<i32>} : memref<16x128xf32, #tpu.memory_space<vmem>>, vector<16x128xf32>,
    %c0_8 = arith.constant 0 : index
    %c0_9 = arith.constant 0 : index
    %10 = vector.load %arg2[%c0_8, %c0_9] : memref<16x16xf32, #tpu.memory_space<vmem>>, vector<16x16xf32>
    %c0_10 = arith.constant 0 : index
    %c0_11 = arith.constant 0 : index
    %11 = vector.load %arg4[%c0_10, %c0_11] : memref<16x128xf32, #tpu.memory_space<vmem>>, vector<16x128xf32>
    %cst_12 = arith.constant dense<0.000000e+00> : vector<16x128xf32>
    %12 = tpu.matmul %10, %11, %cst_12 {dimension_numbers = #tpu.dot_dimension_numbers<[1], [0], [0], [1], [0, 0, 1, 1], [], []>} : vector<16x16xf32>, vector<16x128xf32>, vector<16x128xf32> -> vector<16x128xf32>
    %c0_13 = arith.constant 0 : index
    %c0_14 = arith.constant 0 : index
    %13 = vector.load %arg6[%c0_13, %c0_14] : memref<1x128xf32, #tpu.memory_space<vmem>>, vector<1x128xf32>
    %14 = vector.broadcast %13 : vector<1x128xf32> to vector<16x128xf32>
    %15 = arith.addf %12, %14 : vector<16x128xf32>
    %c0_15 = arith.constant 0 : index
    %c0_16 = arith.constant 0 : index
    %16 = vector.load %arg14[%c0_15, %c0_16] : memref<16x128xf32, #tpu.memory_space<vmem>>, vector<16x128xf32>
    tpu.vector_store %arg14[%c0_15, %c0_16], %15 {strides = array<i32>} : memref<16x128xf32, #tpu.memory_space<vmem>>, vector<16x128xf32>,
    %c0_17 = arith.constant 0 : index
    %c0_18 = arith.constant 0 : index
    %17 = vector.load %arg7[%c0_17, %c0_18] : memref<64x256xf32, #tpu.memory_space<vmem>>, vector<64x256xf32>
    %cst_19 = arith.constant 0.000000e+00 : f32
    %18 = vector.broadcast %cst_19 : f32 to vector<1x64xf32>
    %c0_20 = arith.constant 0 : index
    %c0_21 = arith.constant 0 : index
    %19 = vector.load %arg11[%c0_20, %c0_21] : memref<2x64xf32, #tpu.memory_space<vmem>>, vector<2x64xf32>
    %c0_22 = arith.constant 0 : index
    %c0_23 = arith.constant 0 : index
    %20 = vector.load %arg12[%c0_22, %c0_23] : memref<2x64xf32, #tpu.memory_space<vmem>>, vector<2x64xf32>
    %c0_i32_24 = arith.constant 0 : i32
    %c8_i32 = arith.constant 8 : i32
    %21 = arith.muli %arg0, %c8_i32 : i32
    %22 = arith.addi %21, %c0_i32_24 : i32
    %c0_i32_25 = arith.constant 0 : i32
    %23 = arith.subi %c0_i32_25, %arg0 : i32
    %c8_i32_26 = arith.constant 8 : i32
    %24 = arith.muli %23, %c8_i32_26 : i32
    %c7_i32 = arith.constant 7 : i32
    %25 = arith.subi %c7_i32, %c0_i32_24 : i32
    %26 = arith.addi %24, %25 : i32
    %c7_i32_27 = arith.constant 7 : i32
    %27 = arith.cmpi eq, %26, %c7_i32_27 : i32
    %28 = vector.extract_strided_slice %19 {offsets = [0, 0], sizes = [2, 32], strides = [1, 1]} : vector<2x64xf32> to vector<2x32xf32>
    %29 = vector.extract_strided_slice %19 {offsets = [0, 32], sizes = [2, 32], strides = [1, 1]} : vector<2x64xf32> to vector<2x32xf32>
    %cst_28 = arith.constant 0.000000e+00 : f32
    %30 = vector.broadcast %cst_28 : f32 to vector<2x32xf32>
    %31 = arith.select %27, %30, %29 : vector<2x32xf32>
    %32 = tpu.concatenate %28, %31 in 1 : vector<2x32xf32>, vector<2x32xf32> -> vector<2x64xf32>
    %33 = vector.extract_strided_slice %20 {offsets = [0, 0], sizes = [2, 32], strides = [1, 1]} : vector<2x64xf32> to vector<2x32xf32>
    %34 = vector.extract_strided_slice %20 {offsets = [0, 32], sizes = [2, 32], strides = [1, 1]} : vector<2x64xf32> to vector<2x32xf32>
    %cst_29 = arith.constant 0.000000e+00 : f32
    %35 = vector.broadcast %cst_29 : f32 to vector<2x32xf32>
    %36 = arith.select %27, %35, %34 : vector<2x32xf32>
    %37 = tpu.concatenate %33, %36 in 1 : vector<2x32xf32>, vector<2x32xf32> -> vector<2x64xf32>
    %cst_30 = arith.constant dense<0.000000e+00> : vector<2x256xf32>
    %38 = tpu.matmul %32, %17, %cst_30 {dimension_numbers = #tpu.dot_dimension_numbers<[1], [0], [0], [1], [0, 0, 1, 1], [], []>} : vector<2x64xf32>, vector<64x256xf32>, vector<2x256xf32> -> vector<2x256xf32>
    %c2_i32 = arith.constant 2 : i32
    %39 = arith.muli %c0_i32_24, %c2_i32 : i32
    %40 = arith.index_cast %39 : i32 to index
    %c0_31 = arith.constant 0 : index
    %41 = vector.load %arg13[%40, %c0_31] : memref<16x128xf32, #tpu.memory_space<vmem>>, vector<2x128xf32>
    %42 = vector.extract_strided_slice %38 {offsets = [0, 0], sizes = [2, 128], strides = [1, 1]} : vector<2x256xf32> to vector<2x128xf32>
    %43 = arith.addf %41, %42 : vector<2x128xf32>
    %c7_i32_32 = arith.constant 7 : i32
    %44 = arith.subi %c7_i32_32, %c0_i32_24 : i32
    %c2_i32_33 = arith.constant 2 : i32
    %45 = arith.muli %44, %c2_i32_33 : i32
    %46 = arith.index_cast %45 : i32 to index
    %c0_34 = arith.constant 0 : index
    %47 = vector.load %arg14[%46, %c0_34] : memref<16x128xf32, #tpu.memory_space<vmem>>, vector<2x128xf32>
    %48 = vector.extract_strided_slice %38 {offsets = [0, 128], sizes = [2, 128], strides = [1, 1]} : vector<2x256xf32> to vector<2x128xf32>
    %49 = arith.addf %47, %48 : vector<2x128xf32>
    %50 = vector.extract_strided_slice %37 {offsets = [0, 0], sizes = [2, 32], strides = [1, 1]} : vector<2x64xf32> to vector<2x32xf32>
    %51 = vector.extract_strided_slice %43 {offsets = [0, 0], sizes = [2, 32], strides = [1, 1]} : vector<2x128xf32> to vector<2x32xf32>
    %52 = arith.negf %51 : vector<2x32xf32>
    %53 = math.exp %52 : vector<2x32xf32>
    %cst_35 = arith.constant 1.000000e+00 : f32
    %54 = vector.broadcast %cst_35 : f32 to vector<2x32xf32>
    %55 = arith.addf %54, %53 : vector<2x32xf32>
    %56 = arith.divf %54, %55 : vector<2x32xf32>
    %57 = vector.extract_strided_slice %43 {offsets = [0, 32], sizes = [2, 32], strides = [1, 1]} : vector<2x128xf32> to vector<2x32xf32>
    %58 = arith.negf %57 : vector<2x32xf32>
    %59 = math.exp %58 : vector<2x32xf32>
    %cst_36 = arith.constant 1.000000e+00 : f32
    %60 = vector.broadcast %cst_36 : f32 to vector<2x32xf32>
    %61 = arith.addf %60, %59 : vector<2x32xf32>
    %62 = arith.divf %60, %61 : vector<2x32xf32>
    %63 = vector.extract_strided_slice %43 {offsets = [0, 64], sizes = [2, 32], strides = [1, 1]} : vector<2x128xf32> to vector<2x32xf32>
    %64 = math.tanh %63 : vector<2x32xf32>
    %65 = vector.extract_strided_slice %43 {offsets = [0, 96], sizes = [2, 32], strides = [1, 1]} : vector<2x128xf32> to vector<2x32xf32>
    %66 = arith.negf %65 : vector<2x32xf32>
    %67 = math.exp %66 : vector<2x32xf32>
    %cst_37 = arith.constant 1.000000e+00 : f32
    %68 = vector.broadcast %cst_37 : f32 to vector<2x32xf32>
    %69 = arith.addf %68, %67 : vector<2x32xf32>
    %70 = arith.divf %68, %69 : vector<2x32xf32>
    %71 = arith.mulf %62, %50 : vector<2x32xf32>
    %72 = arith.mulf %56, %64 : vector<2x32xf32>
    %73 = arith.addf %71, %72 : vector<2x32xf32>
    %74 = math.tanh %73 : vector<2x32xf32>
    %75 = arith.mulf %70, %74 : vector<2x32xf32>
    %76 = vector.extract_strided_slice %37 {offsets = [0, 32], sizes = [2, 32], strides = [1, 1]} : vector<2x64xf32> to vector<2x32xf32>
    %77 = vector.extract_strided_slice %49 {offsets = [0, 0], sizes = [2, 32], strides = [1, 1]} : vector<2x128xf32> to vector<2x32xf32>
    %78 = arith.negf %77 : vector<2x32xf32>
    %79 = math.exp %78 : vector<2x32xf32>
    %cst_38 = arith.constant 1.000000e+00 : f32
    %80 = vector.broadcast %cst_38 : f32 to vector<2x32xf32>
    %81 = arith.addf %80, %79 : vector<2x32xf32>
    %82 = arith.divf %80, %81 : vector<2x32xf32>
    %83 = vector.extract_strided_slice %49 {offsets = [0, 32], sizes = [2, 32], strides = [1, 1]} : vector<2x128xf32> to vector<2x32xf32>
    %84 = arith.negf %83 : vector<2x32xf32>
    %85 = math.exp %84 : vector<2x32xf32>
    %cst_39 = arith.constant 1.000000e+00 : f32
    %86 = vector.broadcast %cst_39 : f32 to vector<2x32xf32>
    %87 = arith.addf %86, %85 : vector<2x32xf32>
    %88 = arith.divf %86, %87 : vector<2x32xf32>
    %89 = vector.extract_strided_slice %49 {offsets = [0, 64], sizes = [2, 32], strides = [1, 1]} : vector<2x128xf32> to vector<2x32xf32>
    %90 = math.tanh %89 : vector<2x32xf32>
    %91 = vector.extract_strided_slice %49 {offsets = [0, 96], sizes = [2, 32], strides = [1, 1]} : vector<2x128xf32> to vector<2x32xf32>
    %92 = arith.negf %91 : vector<2x32xf32>
    %93 = math.exp %92 : vector<2x32xf32>
    %cst_40 = arith.constant 1.000000e+00 : f32
    %94 = vector.broadcast %cst_40 : f32 to vector<2x32xf32>
    %95 = arith.addf %94, %93 : vector<2x32xf32>
    %96 = arith.divf %94, %95 : vector<2x32xf32>
    %97 = arith.mulf %88, %76 : vector<2x32xf32>
    %98 = arith.mulf %82, %90 : vector<2x32xf32>
    %99 = arith.addf %97, %98 : vector<2x32xf32>
    %100 = math.tanh %99 : vector<2x32xf32>
    %101 = arith.mulf %96, %100 : vector<2x32xf32>
    %c2_i32_41 = arith.constant 2 : i32
    %102 = arith.muli %c0_i32_24, %c2_i32_41 : i32
    %103 = arith.index_cast %102 : i32 to index
    %c0_42 = arith.constant 0 : index
    %104 = vector.load %arg8[%103, %c0_42] : memref<16x32xf32, #tpu.memory_space<vmem>>, vector<2x32xf32>
    tpu.vector_store %arg8[%103, %c0_42], %75 {strides = array<i32>} : memref<16x32xf32, #tpu.memory_space<vmem>>, vector<2x32xf32>,
    %c7_i32_43 = arith.constant 7 : i32
    %105 = arith.subi %c7_i32_43, %c0_i32_24 : i32
    %c2_i32_44 = arith.constant 2 : i32
    %106 = arith.muli %105, %c2_i32_44 : i32
    %107 = arith.index_cast %106 : i32 to index
    %c0_45 = arith.constant 0 : index
    %108 = vector.load %arg9[%107, %c0_45] : memref<16x32xf32, #tpu.memory_space<vmem>>, vector<2x32xf32>
    tpu.vector_store %arg9[%107, %c0_45], %101 {strides = array<i32>} : memref<16x32xf32, #tpu.memory_space<vmem>>, vector<2x32xf32>,
    %c8_i32_46 = arith.constant 8 : i32
    %109 = arith.cmpi slt, %22, %c8_i32_46 : i32
    %110 = arith.extui %109 : i1 to i32
    %111 = arith.sitofp %110 : i32 to f32
    %c8_i32_47 = arith.constant 8 : i32
    %112 = arith.cmpi slt, %26, %c8_i32_47 : i32
    %113 = arith.extui %112 : i1 to i32
    %114 = arith.sitofp %113 : i32 to f32
    %cst_48 = arith.constant dense<0.000000e+00> : vector<32xf32>
    %115 = vector.multi_reduction <add>, %75, %cst_48 [0] : vector<2x32xf32> to vector<32xf32>
    %116 = vector.shape_cast %115 : vector<32xf32> to vector<1x32xf32>
    %117 = vector.broadcast %111 : f32 to vector<1x32xf32>
    %118 = arith.mulf %117, %116 : vector<1x32xf32>
    %cst_49 = arith.constant dense<0.000000e+00> : vector<32xf32>
    %119 = vector.multi_reduction <add>, %101, %cst_49 [0] : vector<2x32xf32> to vector<32xf32>
    %120 = vector.shape_cast %119 : vector<32xf32> to vector<1x32xf32>
    %121 = vector.broadcast %114 : f32 to vector<1x32xf32>
    %122 = arith.mulf %121, %120 : vector<1x32xf32>
    %123 = tpu.concatenate %118, %122 in 1 : vector<1x32xf32>, vector<1x32xf32> -> vector<1x64xf32>
    %124 = arith.mulf %75, %75 : vector<2x32xf32>
    %cst_50 = arith.constant dense<0.000000e+00> : vector<32xf32>
    %125 = vector.multi_reduction <add>, %124, %cst_50 [0] : vector<2x32xf32> to vector<32xf32>
    %126 = vector.shape_cast %125 : vector<32xf32> to vector<1x32xf32>
    %127 = vector.broadcast %111 : f32 to vector<1x32xf32>
    %128 = arith.mulf %127, %126 : vector<1x32xf32>
    %129 = arith.mulf %101, %101 : vector<2x32xf32>
    %cst_51 = arith.constant dense<0.000000e+00> : vector<32xf32>
    %130 = vector.multi_reduction <add>, %129, %cst_51 [0] : vector<2x32xf32> to vector<32xf32>
    %131 = vector.shape_cast %130 : vector<32xf32> to vector<1x32xf32>
    %132 = vector.broadcast %114 : f32 to vector<1x32xf32>
    %133 = arith.mulf %132, %131 : vector<1x32xf32>
    %134 = tpu.concatenate %128, %133 in 1 : vector<1x32xf32>, vector<1x32xf32> -> vector<1x64xf32>
    %135 = tpu.concatenate %75, %101 in 1 : vector<2x32xf32>, vector<2x32xf32> -> vector<2x64xf32>
    %136 = tpu.concatenate %73, %99 in 1 : vector<2x32xf32>, vector<2x32xf32> -> vector<2x64xf32>
    %137 = arith.addf %18, %123 : vector<1x64xf32>
    %138 = arith.addf %18, %134 : vector<1x64xf32>
    %c1_i32 = arith.constant 1 : i32
    %c8_i32_52 = arith.constant 8 : i32
    %139 = arith.muli %arg0, %c8_i32_52 : i32
    %140 = arith.addi %139, %c1_i32 : i32
    %c0_i32_53 = arith.constant 0 : i32
    %141 = arith.subi %c0_i32_53, %arg0 : i32
    %c8_i32_54 = arith.constant 8 : i32
    %142 = arith.muli %141, %c8_i32_54 : i32
    %c7_i32_55 = arith.constant 7 : i32
    %143 = arith.subi %c7_i32_55, %c1_i32 : i32
    %144 = arith.addi %142, %143 : i32
    %c7_i32_56 = arith.constant 7 : i32
    %145 = arith.cmpi eq, %144, %c7_i32_56 : i32
    %146 = vector.extract_strided_slice %135 {offsets = [0, 0], sizes = [2, 32], strides = [1, 1]} : vector<2x64xf32> to vector<2x32xf32>
    %147 = vector.extract_strided_slice %135 {offsets = [0, 32], sizes = [2, 32], strides = [1, 1]} : vector<2x64xf32> to vector<2x32xf32>
    %cst_57 = arith.constant 0.000000e+00 : f32
    %148 = vector.broadcast %cst_57 : f32 to vector<2x32xf32>
    %149 = arith.select %145, %148, %147 : vector<2x32xf32>
    %150 = tpu.concatenate %146, %149 in 1 : vector<2x32xf32>, vector<2x32xf32> -> vector<2x64xf32>
    %151 = vector.extract_strided_slice %136 {offsets = [0, 0], sizes = [2, 32], strides = [1, 1]} : vector<2x64xf32> to vector<2x32xf32>
    %152 = vector.extract_strided_slice %136 {offsets = [0, 32], sizes = [2, 32], strides = [1, 1]} : vector<2x64xf32> to vector<2x32xf32>
    %cst_58 = arith.constant 0.000000e+00 : f32
    %153 = vector.broadcast %cst_58 : f32 to vector<2x32xf32>
    %154 = arith.select %145, %153, %152 : vector<2x32xf32>
    %155 = tpu.concatenate %151, %154 in 1 : vector<2x32xf32>, vector<2x32xf32> -> vector<2x64xf32>
    %cst_59 = arith.constant dense<0.000000e+00> : vector<2x256xf32>
    %156 = tpu.matmul %150, %17, %cst_59 {dimension_numbers = #tpu.dot_dimension_numbers<[1], [0], [0], [1], [0, 0, 1, 1], [], []>} : vector<2x64xf32>, vector<64x256xf32>, vector<2x256xf32> -> vector<2x256xf32>
    %c2_i32_60 = arith.constant 2 : i32
    %157 = arith.muli %c1_i32, %c2_i32_60 : i32
    %158 = arith.index_cast %157 : i32 to index
    %c0_61 = arith.constant 0 : index
    %159 = vector.load %arg13[%158, %c0_61] : memref<16x128xf32, #tpu.memory_space<vmem>>, vector<2x128xf32>
    %160 = vector.extract_strided_slice %156 {offsets = [0, 0], sizes = [2, 128], strides = [1, 1]} : vector<2x256xf32> to vector<2x128xf32>
    %161 = arith.addf %159, %160 : vector<2x128xf32>
    %c7_i32_62 = arith.constant 7 : i32
    %162 = arith.subi %c7_i32_62, %c1_i32 : i32
    %c2_i32_63 = arith.constant 2 : i32
    %163 = arith.muli %162, %c2_i32_63 : i32
    %164 = arith.index_cast %163 : i32 to index
    %c0_64 = arith.constant 0 : index
    %165 = vector.load %arg14[%164, %c0_64] : memref<16x128xf32, #tpu.memory_space<vmem>>, vector<2x128xf32>
    %166 = vector.extract_strided_slice %156 {offsets = [0, 128], sizes = [2, 128], strides = [1, 1]} : vector<2x256xf32> to vector<2x128xf32>
    %167 = arith.addf %165, %166 : vector<2x128xf32>
    %168 = vector.extract_strided_slice %155 {offsets = [0, 0], sizes = [2, 32], strides = [1, 1]} : vector<2x64xf32> to vector<2x32xf32>
    %169 = vector.extract_strided_slice %161 {offsets = [0, 0], sizes = [2, 32], strides = [1, 1]} : vector<2x128xf32> to vector<2x32xf32>
    %170 = arith.negf %169 : vector<2x32xf32>
    %171 = math.exp %170 : vector<2x32xf32>
    %cst_65 = arith.constant 1.000000e+00 : f32
    %172 = vector.broadcast %cst_65 : f32 to vector<2x32xf32>
    %173 = arith.addf %172, %171 : vector<2x32xf32>
    %174 = arith.divf %172, %173 : vector<2x32xf32>
    %175 = vector.extract_strided_slice %161 {offsets = [0, 32], sizes = [2, 32], strides = [1, 1]} : vector<2x128xf32> to vector<2x32xf32>
    %176 = arith.negf %175 : vector<2x32xf32>
    %177 = math.exp %176 : vector<2x32xf32>
    %cst_66 = arith.constant 1.000000e+00 : f32
    %178 = vector.broadcast %cst_66 : f32 to vector<2x32xf32>
    %179 = arith.addf %178, %177 : vector<2x32xf32>
    %180 = arith.divf %178, %179 : vector<2x32xf32>
    %181 = vector.extract_strided_slice %161 {offsets = [0, 64], sizes = [2, 32], strides = [1, 1]} : vector<2x128xf32> to vector<2x32xf32>
    %182 = math.tanh %181 : vector<2x32xf32>
    %183 = vector.extract_strided_slice %161 {offsets = [0, 96], sizes = [2, 32], strides = [1, 1]} : vector<2x128xf32> to vector<2x32xf32>
    %184 = arith.negf %183 : vector<2x32xf32>
    %185 = math.exp %184 : vector<2x32xf32>
    %cst_67 = arith.constant 1.000000e+00 : f32
    %186 = vector.broadcast %cst_67 : f32 to vector<2x32xf32>
    %187 = arith.addf %186, %185 : vector<2x32xf32>
    %188 = arith.divf %186, %187 : vector<2x32xf32>
    %189 = arith.mulf %180, %168 : vector<2x32xf32>
    %190 = arith.mulf %174, %182 : vector<2x32xf32>
    %191 = arith.addf %189, %190 : vector<2x32xf32>
    %192 = math.tanh %191 : vector<2x32xf32>
    %193 = arith.mulf %188, %192 : vector<2x32xf32>
    %194 = vector.extract_strided_slice %155 {offsets = [0, 32], sizes = [2, 32], strides = [1, 1]} : vector<2x64xf32> to vector<2x32xf32>
    %195 = vector.extract_strided_slice %167 {offsets = [0, 0], sizes = [2, 32], strides = [1, 1]} : vector<2x128xf32> to vector<2x32xf32>
    %196 = arith.negf %195 : vector<2x32xf32>
    %197 = math.exp %196 : vector<2x32xf32>
    %cst_68 = arith.constant 1.000000e+00 : f32
    %198 = vector.broadcast %cst_68 : f32 to vector<2x32xf32>
    %199 = arith.addf %198, %197 : vector<2x32xf32>
    %200 = arith.divf %198, %199 : vector<2x32xf32>
    %201 = vector.extract_strided_slice %167 {offsets = [0, 32], sizes = [2, 32], strides = [1, 1]} : vector<2x128xf32> to vector<2x32xf32>
    %202 = arith.negf %201 : vector<2x32xf32>
    %203 = math.exp %202 : vector<2x32xf32>
    %cst_69 = arith.constant 1.000000e+00 : f32
    %204 = vector.broadcast %cst_69 : f32 to vector<2x32xf32>
    %205 = arith.addf %204, %203 : vector<2x32xf32>
    %206 = arith.divf %204, %205 : vector<2x32xf32>
    %207 = vector.extract_strided_slice %167 {offsets = [0, 64], sizes = [2, 32], strides = [1, 1]} : vector<2x128xf32> to vector<2x32xf32>
    %208 = math.tanh %207 : vector<2x32xf32>
    %209 = vector.extract_strided_slice %167 {offsets = [0, 96], sizes = [2, 32], strides = [1, 1]} : vector<2x128xf32> to vector<2x32xf32>
    %210 = arith.negf %209 : vector<2x32xf32>
    %211 = math.exp %210 : vector<2x32xf32>
    %cst_70 = arith.constant 1.000000e+00 : f32
    %212 = vector.broadcast %cst_70 : f32 to vector<2x32xf32>
    %213 = arith.addf %212, %211 : vector<2x32xf32>
    %214 = arith.divf %212, %213 : vector<2x32xf32>
    %215 = arith.mulf %206, %194 : vector<2x32xf32>
    %216 = arith.mulf %200, %208 : vector<2x32xf32>
    %217 = arith.addf %215, %216 : vector<2x32xf32>
    %218 = math.tanh %217 : vector<2x32xf32>
    %219 = arith.mulf %214, %218 : vector<2x32xf32>
    %c2_i32_71 = arith.constant 2 : i32
    %220 = arith.muli %c1_i32, %c2_i32_71 : i32
    %221 = arith.index_cast %220 : i32 to index
    %c0_72 = arith.constant 0 : index
    %222 = vector.load %arg8[%221, %c0_72] : memref<16x32xf32, #tpu.memory_space<vmem>>, vector<2x32xf32>
    tpu.vector_store %arg8[%221, %c0_72], %193 {strides = array<i32>} : memref<16x32xf32, #tpu.memory_space<vmem>>, vector<2x32xf32>,
    %c7_i32_73 = arith.constant 7 : i32
    %223 = arith.subi %c7_i32_73, %c1_i32 : i32
    %c2_i32_74 = arith.constant 2 : i32
    %224 = arith.muli %223, %c2_i32_74 : i32
    %225 = arith.index_cast %224 : i32 to index
    %c0_75 = arith.constant 0 : index
    %226 = vector.load %arg9[%225, %c0_75] : memref<16x32xf32, #tpu.memory_space<vmem>>, vector<2x32xf32>
    tpu.vector_store %arg9[%225, %c0_75], %219 {strides = array<i32>} : memref<16x32xf32, #tpu.memory_space<vmem>>, vector<2x32xf32>,
    %c8_i32_76 = arith.constant 8 : i32
    %227 = arith.cmpi slt, %140, %c8_i32_76 : i32
    %228 = arith.extui %227 : i1 to i32
    %229 = arith.sitofp %228 : i32 to f32
    %c8_i32_77 = arith.constant 8 : i32
    %230 = arith.cmpi slt, %144, %c8_i32_77 : i32
    %231 = arith.extui %230 : i1 to i32
    %232 = arith.sitofp %231 : i32 to f32
    %cst_78 = arith.constant dense<0.000000e+00> : vector<32xf32>
    %233 = vector.multi_reduction <add>, %193, %cst_78 [0] : vector<2x32xf32> to vector<32xf32>
    %234 = vector.shape_cast %233 : vector<32xf32> to vector<1x32xf32>
    %235 = vector.broadcast %229 : f32 to vector<1x32xf32>
    %236 = arith.mulf %235, %234 : vector<1x32xf32>
    %cst_79 = arith.constant dense<0.000000e+00> : vector<32xf32>
    %237 = vector.multi_reduction <add>, %219, %cst_79 [0] : vector<2x32xf32> to vector<32xf32>
    %238 = vector.shape_cast %237 : vector<32xf32> to vector<1x32xf32>
    %239 = vector.broadcast %232 : f32 to vector<1x32xf32>
    %240 = arith.mulf %239, %238 : vector<1x32xf32>
    %241 = tpu.concatenate %236, %240 in 1 : vector<1x32xf32>, vector<1x32xf32> -> vector<1x64xf32>
    %242 = arith.mulf %193, %193 : vector<2x32xf32>
    %cst_80 = arith.constant dense<0.000000e+00> : vector<32xf32>
    %243 = vector.multi_reduction <add>, %242, %cst_80 [0] : vector<2x32xf32> to vector<32xf32>
    %244 = vector.shape_cast %243 : vector<32xf32> to vector<1x32xf32>
    %245 = vector.broadcast %229 : f32 to vector<1x32xf32>
    %246 = arith.mulf %245, %244 : vector<1x32xf32>
    %247 = arith.mulf %219, %219 : vector<2x32xf32>
    %cst_81 = arith.constant dense<0.000000e+00> : vector<32xf32>
    %248 = vector.multi_reduction <add>, %247, %cst_81 [0] : vector<2x32xf32> to vector<32xf32>
    %249 = vector.shape_cast %248 : vector<32xf32> to vector<1x32xf32>
    %250 = vector.broadcast %232 : f32 to vector<1x32xf32>
    %251 = arith.mulf %250, %249 : vector<1x32xf32>
    %252 = tpu.concatenate %246, %251 in 1 : vector<1x32xf32>, vector<1x32xf32> -> vector<1x64xf32>
    %253 = tpu.concatenate %193, %219 in 1 : vector<2x32xf32>, vector<2x32xf32> -> vector<2x64xf32>
    %254 = tpu.concatenate %191, %217 in 1 : vector<2x32xf32>, vector<2x32xf32> -> vector<2x64xf32>
    %255 = arith.addf %137, %241 : vector<1x64xf32>
    %256 = arith.addf %138, %252 : vector<1x64xf32>
    %c2_i32_82 = arith.constant 2 : i32
    %c8_i32_83 = arith.constant 8 : i32
    %257 = arith.muli %arg0, %c8_i32_83 : i32
    %258 = arith.addi %257, %c2_i32_82 : i32
    %c0_i32_84 = arith.constant 0 : i32
    %259 = arith.subi %c0_i32_84, %arg0 : i32
    %c8_i32_85 = arith.constant 8 : i32
    %260 = arith.muli %259, %c8_i32_85 : i32
    %c7_i32_86 = arith.constant 7 : i32
    %261 = arith.subi %c7_i32_86, %c2_i32_82 : i32
    %262 = arith.addi %260, %261 : i32
    %c7_i32_87 = arith.constant 7 : i32
    %263 = arith.cmpi eq, %262, %c7_i32_87 : i32
    %264 = vector.extract_strided_slice %253 {offsets = [0, 0], sizes = [2, 32], strides = [1, 1]} : vector<2x64xf32> to vector<2x32xf32>
    %265 = vector.extract_strided_slice %253 {offsets = [0, 32], sizes = [2, 32], strides = [1, 1]} : vector<2x64xf32> to vector<2x32xf32>
    %cst_88 = arith.constant 0.000000e+00 : f32
    %266 = vector.broadcast %cst_88 : f32 to vector<2x32xf32>
    %267 = arith.select %263, %266, %265 : vector<2x32xf32>
    %268 = tpu.concatenate %264, %267 in 1 : vector<2x32xf32>, vector<2x32xf32> -> vector<2x64xf32>
    %269 = vector.extract_strided_slice %254 {offsets = [0, 0], sizes = [2, 32], strides = [1, 1]} : vector<2x64xf32> to vector<2x32xf32>
    %270 = vector.extract_strided_slice %254 {offsets = [0, 32], sizes = [2, 32], strides = [1, 1]} : vector<2x64xf32> to vector<2x32xf32>
    %cst_89 = arith.constant 0.000000e+00 : f32
    %271 = vector.broadcast %cst_89 : f32 to vector<2x32xf32>
    %272 = arith.select %263, %271, %270 : vector<2x32xf32>
    %273 = tpu.concatenate %269, %272 in 1 : vector<2x32xf32>, vector<2x32xf32> -> vector<2x64xf32>
    %cst_90 = arith.constant dense<0.000000e+00> : vector<2x256xf32>
    %274 = tpu.matmul %268, %17, %cst_90 {dimension_numbers = #tpu.dot_dimension_numbers<[1], [0], [0], [1], [0, 0, 1, 1], [], []>} : vector<2x64xf32>, vector<64x256xf32>, vector<2x256xf32> -> vector<2x256xf32>
    %c2_i32_91 = arith.constant 2 : i32
    %275 = arith.muli %c2_i32_82, %c2_i32_91 : i32
    %276 = arith.index_cast %275 : i32 to index
    %c0_92 = arith.constant 0 : index
    %277 = vector.load %arg13[%276, %c0_92] : memref<16x128xf32, #tpu.memory_space<vmem>>, vector<2x128xf32>
    %278 = vector.extract_strided_slice %274 {offsets = [0, 0], sizes = [2, 128], strides = [1, 1]} : vector<2x256xf32> to vector<2x128xf32>
    %279 = arith.addf %277, %278 : vector<2x128xf32>
    %c7_i32_93 = arith.constant 7 : i32
    %280 = arith.subi %c7_i32_93, %c2_i32_82 : i32
    %c2_i32_94 = arith.constant 2 : i32
    %281 = arith.muli %280, %c2_i32_94 : i32
    %282 = arith.index_cast %281 : i32 to index
    %c0_95 = arith.constant 0 : index
    %283 = vector.load %arg14[%282, %c0_95] : memref<16x128xf32, #tpu.memory_space<vmem>>, vector<2x128xf32>
    %284 = vector.extract_strided_slice %274 {offsets = [0, 128], sizes = [2, 128], strides = [1, 1]} : vector<2x256xf32> to vector<2x128xf32>
    %285 = arith.addf %283, %284 : vector<2x128xf32>
    %286 = vector.extract_strided_slice %273 {offsets = [0, 0], sizes = [2, 32], strides = [1, 1]} : vector<2x64xf32> to vector<2x32xf32>
    %287 = vector.extract_strided_slice %279 {offsets = [0, 0], sizes = [2, 32], strides = [1, 1]} : vector<2x128xf32> to vector<2x32xf32>
    %288 = arith.negf %287 : vector<2x32xf32>
    %289 = math.exp %288 : vector<2x32xf32>
    %cst_96 = arith.constant 1.000000e+00 : f32
    %290 = vector.broadcast %cst_96 : f32 to vector<2x32xf32>
    %291 = arith.addf %290, %289 : vector<2x32xf32>
    %292 = arith.divf %290, %291 : vector<2x32xf32>
    %293 = vector.extract_strided_slice %279 {offsets = [0, 32], sizes = [2, 32], strides = [1, 1]} : vector<2x128xf32> to vector<2x32xf32>
    %294 = arith.negf %293 : vector<2x32xf32>
    %295 = math.exp %294 : vector<2x32xf32>
    %cst_97 = arith.constant 1.000000e+00 : f32
    %296 = vector.broadcast %cst_97 : f32 to vector<2x32xf32>
    %297 = arith.addf %296, %295 : vector<2x32xf32>
    %298 = arith.divf %296, %297 : vector<2x32xf32>
    %299 = vector.extract_strided_slice %279 {offsets = [0, 64], sizes = [2, 32], strides = [1, 1]} : vector<2x128xf32> to vector<2x32xf32>
    %300 = math.tanh %299 : vector<2x32xf32>
    %301 = vector.extract_strided_slice %279 {offsets = [0, 96], sizes = [2, 32], strides = [1, 1]} : vector<2x128xf32> to vector<2x32xf32>
    %302 = arith.negf %301 : vector<2x32xf32>
    %303 = math.exp %302 : vector<2x32xf32>
    %cst_98 = arith.constant 1.000000e+00 : f32
    %304 = vector.broadcast %cst_98 : f32 to vector<2x32xf32>
    %305 = arith.addf %304, %303 : vector<2x32xf32>
    %306 = arith.divf %304, %305 : vector<2x32xf32>
    %307 = arith.mulf %298, %286 : vector<2x32xf32>
    %308 = arith.mulf %292, %300 : vector<2x32xf32>
    %309 = arith.addf %307, %308 : vector<2x32xf32>
    %310 = math.tanh %309 : vector<2x32xf32>
    %311 = arith.mulf %306, %310 : vector<2x32xf32>
    %312 = vector.extract_strided_slice %273 {offsets = [0, 32], sizes = [2, 32], strides = [1, 1]} : vector<2x64xf32> to vector<2x32xf32>
    %313 = vector.extract_strided_slice %285 {offsets = [0, 0], sizes = [2, 32], strides = [1, 1]} : vector<2x128xf32> to vector<2x32xf32>
    %314 = arith.negf %313 : vector<2x32xf32>
    %315 = math.exp %314 : vector<2x32xf32>
    %cst_99 = arith.constant 1.000000e+00 : f32
    %316 = vector.broadcast %cst_99 : f32 to vector<2x32xf32>
    %317 = arith.addf %316, %315 : vector<2x32xf32>
    %318 = arith.divf %316, %317 : vector<2x32xf32>
    %319 = vector.extract_strided_slice %285 {offsets = [0, 32], sizes = [2, 32], strides = [1, 1]} : vector<2x128xf32> to vector<2x32xf32>
    %320 = arith.negf %319 : vector<2x32xf32>
    %321 = math.exp %320 : vector<2x32xf32>
    %cst_100 = arith.constant 1.000000e+00 : f32
    %322 = vector.broadcast %cst_100 : f32 to vector<2x32xf32>
    %323 = arith.addf %322, %321 : vector<2x32xf32>
    %324 = arith.divf %322, %323 : vector<2x32xf32>
    %325 = vector.extract_strided_slice %285 {offsets = [0, 64], sizes = [2, 32], strides = [1, 1]} : vector<2x128xf32> to vector<2x32xf32>
    %326 = math.tanh %325 : vector<2x32xf32>
    %327 = vector.extract_strided_slice %285 {offsets = [0, 96], sizes = [2, 32], strides = [1, 1]} : vector<2x128xf32> to vector<2x32xf32>
    %328 = arith.negf %327 : vector<2x32xf32>
    %329 = math.exp %328 : vector<2x32xf32>
    %cst_101 = arith.constant 1.000000e+00 : f32
    %330 = vector.broadcast %cst_101 : f32 to vector<2x32xf32>
    %331 = arith.addf %330, %329 : vector<2x32xf32>
    %332 = arith.divf %330, %331 : vector<2x32xf32>
    %333 = arith.mulf %324, %312 : vector<2x32xf32>
    %334 = arith.mulf %318, %326 : vector<2x32xf32>
    %335 = arith.addf %333, %334 : vector<2x32xf32>
    %336 = math.tanh %335 : vector<2x32xf32>
    %337 = arith.mulf %332, %336 : vector<2x32xf32>
    %c2_i32_102 = arith.constant 2 : i32
    %338 = arith.muli %c2_i32_82, %c2_i32_102 : i32
    %339 = arith.index_cast %338 : i32 to index
    %c0_103 = arith.constant 0 : index
    %340 = vector.load %arg8[%339, %c0_103] : memref<16x32xf32, #tpu.memory_space<vmem>>, vector<2x32xf32>
    tpu.vector_store %arg8[%339, %c0_103], %311 {strides = array<i32>} : memref<16x32xf32, #tpu.memory_space<vmem>>, vector<2x32xf32>,
    %c7_i32_104 = arith.constant 7 : i32
    %341 = arith.subi %c7_i32_104, %c2_i32_82 : i32
    %c2_i32_105 = arith.constant 2 : i32
    %342 = arith.muli %341, %c2_i32_105 : i32
    %343 = arith.index_cast %342 : i32 to index
    %c0_106 = arith.constant 0 : index
    %344 = vector.load %arg9[%343, %c0_106] : memref<16x32xf32, #tpu.memory_space<vmem>>, vector<2x32xf32>
    tpu.vector_store %arg9[%343, %c0_106], %337 {strides = array<i32>} : memref<16x32xf32, #tpu.memory_space<vmem>>, vector<2x32xf32>,
    %c8_i32_107 = arith.constant 8 : i32
    %345 = arith.cmpi slt, %258, %c8_i32_107 : i32
    %346 = arith.extui %345 : i1 to i32
    %347 = arith.sitofp %346 : i32 to f32
    %c8_i32_108 = arith.constant 8 : i32
    %348 = arith.cmpi slt, %262, %c8_i32_108 : i32
    %349 = arith.extui %348 : i1 to i32
    %350 = arith.sitofp %349 : i32 to f32
    %cst_109 = arith.constant dense<0.000000e+00> : vector<32xf32>
    %351 = vector.multi_reduction <add>, %311, %cst_109 [0] : vector<2x32xf32> to vector<32xf32>
    %352 = vector.shape_cast %351 : vector<32xf32> to vector<1x32xf32>
    %353 = vector.broadcast %347 : f32 to vector<1x32xf32>
    %354 = arith.mulf %353, %352 : vector<1x32xf32>
    %cst_110 = arith.constant dense<0.000000e+00> : vector<32xf32>
    %355 = vector.multi_reduction <add>, %337, %cst_110 [0] : vector<2x32xf32> to vector<32xf32>
    %356 = vector.shape_cast %355 : vector<32xf32> to vector<1x32xf32>
    %357 = vector.broadcast %350 : f32 to vector<1x32xf32>
    %358 = arith.mulf %357, %356 : vector<1x32xf32>
    %359 = tpu.concatenate %354, %358 in 1 : vector<1x32xf32>, vector<1x32xf32> -> vector<1x64xf32>
    %360 = arith.mulf %311, %311 : vector<2x32xf32>
    %cst_111 = arith.constant dense<0.000000e+00> : vector<32xf32>
    %361 = vector.multi_reduction <add>, %360, %cst_111 [0] : vector<2x32xf32> to vector<32xf32>
    %362 = vector.shape_cast %361 : vector<32xf32> to vector<1x32xf32>
    %363 = vector.broadcast %347 : f32 to vector<1x32xf32>
    %364 = arith.mulf %363, %362 : vector<1x32xf32>
    %365 = arith.mulf %337, %337 : vector<2x32xf32>
    %cst_112 = arith.constant dense<0.000000e+00> : vector<32xf32>
    %366 = vector.multi_reduction <add>, %365, %cst_112 [0] : vector<2x32xf32> to vector<32xf32>
    %367 = vector.shape_cast %366 : vector<32xf32> to vector<1x32xf32>
    %368 = vector.broadcast %350 : f32 to vector<1x32xf32>
    %369 = arith.mulf %368, %367 : vector<1x32xf32>
    %370 = tpu.concatenate %364, %369 in 1 : vector<1x32xf32>, vector<1x32xf32> -> vector<1x64xf32>
    %371 = tpu.concatenate %311, %337 in 1 : vector<2x32xf32>, vector<2x32xf32> -> vector<2x64xf32>
    %372 = tpu.concatenate %309, %335 in 1 : vector<2x32xf32>, vector<2x32xf32> -> vector<2x64xf32>
    %373 = arith.addf %255, %359 : vector<1x64xf32>
    %374 = arith.addf %256, %370 : vector<1x64xf32>
    %c3_i32 = arith.constant 3 : i32
    %c8_i32_113 = arith.constant 8 : i32
    %375 = arith.muli %arg0, %c8_i32_113 : i32
    %376 = arith.addi %375, %c3_i32 : i32
    %c0_i32_114 = arith.constant 0 : i32
    %377 = arith.subi %c0_i32_114, %arg0 : i32
    %c8_i32_115 = arith.constant 8 : i32
    %378 = arith.muli %377, %c8_i32_115 : i32
    %c7_i32_116 = arith.constant 7 : i32
    %379 = arith.subi %c7_i32_116, %c3_i32 : i32
    %380 = arith.addi %378, %379 : i32
    %c7_i32_117 = arith.constant 7 : i32
    %381 = arith.cmpi eq, %380, %c7_i32_117 : i32
    %382 = vector.extract_strided_slice %371 {offsets = [0, 0], sizes = [2, 32], strides = [1, 1]} : vector<2x64xf32> to vector<2x32xf32>
    %383 = vector.extract_strided_slice %371 {offsets = [0, 32], sizes = [2, 32], strides = [1, 1]} : vector<2x64xf32> to vector<2x32xf32>
    %cst_118 = arith.constant 0.000000e+00 : f32
    %384 = vector.broadcast %cst_118 : f32 to vector<2x32xf32>
    %385 = arith.select %381, %384, %383 : vector<2x32xf32>
    %386 = tpu.concatenate %382, %385 in 1 : vector<2x32xf32>, vector<2x32xf32> -> vector<2x64xf32>
    %387 = vector.extract_strided_slice %372 {offsets = [0, 0], sizes = [2, 32], strides = [1, 1]} : vector<2x64xf32> to vector<2x32xf32>
    %388 = vector.extract_strided_slice %372 {offsets = [0, 32], sizes = [2, 32], strides = [1, 1]} : vector<2x64xf32> to vector<2x32xf32>
    %cst_119 = arith.constant 0.000000e+00 : f32
    %389 = vector.broadcast %cst_119 : f32 to vector<2x32xf32>
    %390 = arith.select %381, %389, %388 : vector<2x32xf32>
    %391 = tpu.concatenate %387, %390 in 1 : vector<2x32xf32>, vector<2x32xf32> -> vector<2x64xf32>
    %cst_120 = arith.constant dense<0.000000e+00> : vector<2x256xf32>
    %392 = tpu.matmul %386, %17, %cst_120 {dimension_numbers = #tpu.dot_dimension_numbers<[1], [0], [0], [1], [0, 0, 1, 1], [], []>} : vector<2x64xf32>, vector<64x256xf32>, vector<2x256xf32> -> vector<2x256xf32>
    %c2_i32_121 = arith.constant 2 : i32
    %393 = arith.muli %c3_i32, %c2_i32_121 : i32
    %394 = arith.index_cast %393 : i32 to index
    %c0_122 = arith.constant 0 : index
    %395 = vector.load %arg13[%394, %c0_122] : memref<16x128xf32, #tpu.memory_space<vmem>>, vector<2x128xf32>
    %396 = vector.extract_strided_slice %392 {offsets = [0, 0], sizes = [2, 128], strides = [1, 1]} : vector<2x256xf32> to vector<2x128xf32>
    %397 = arith.addf %395, %396 : vector<2x128xf32>
    %c7_i32_123 = arith.constant 7 : i32
    %398 = arith.subi %c7_i32_123, %c3_i32 : i32
    %c2_i32_124 = arith.constant 2 : i32
    %399 = arith.muli %398, %c2_i32_124 : i32
    %400 = arith.index_cast %399 : i32 to index
    %c0_125 = arith.constant 0 : index
    %401 = vector.load %arg14[%400, %c0_125] : memref<16x128xf32, #tpu.memory_space<vmem>>, vector<2x128xf32>
    %402 = vector.extract_strided_slice %392 {offsets = [0, 128], sizes = [2, 128], strides = [1, 1]} : vector<2x256xf32> to vector<2x128xf32>
    %403 = arith.addf %401, %402 : vector<2x128xf32>
    %404 = vector.extract_strided_slice %391 {offsets = [0, 0], sizes = [2, 32], strides = [1, 1]} : vector<2x64xf32> to vector<2x32xf32>
    %405 = vector.extract_strided_slice %397 {offsets = [0, 0], sizes = [2, 32], strides = [1, 1]} : vector<2x128xf32> to vector<2x32xf32>
    %406 = arith.negf %405 : vector<2x32xf32>
    %407 = math.exp %406 : vector<2x32xf32>
    %cst_126 = arith.constant 1.000000e+00 : f32
    %408 = vector.broadcast %cst_126 : f32 to vector<2x32xf32>
    %409 = arith.addf %408, %407 : vector<2x32xf32>
    %410 = arith.divf %408, %409 : vector<2x32xf32>
    %411 = vector.extract_strided_slice %397 {offsets = [0, 32], sizes = [2, 32], strides = [1, 1]} : vector<2x128xf32> to vector<2x32xf32>
    %412 = arith.negf %411 : vector<2x32xf32>
    %413 = math.exp %412 : vector<2x32xf32>
    %cst_127 = arith.constant 1.000000e+00 : f32
    %414 = vector.broadcast %cst_127 : f32 to vector<2x32xf32>
    %415 = arith.addf %414, %413 : vector<2x32xf32>
    %416 = arith.divf %414, %415 : vector<2x32xf32>
    %417 = vector.extract_strided_slice %397 {offsets = [0, 64], sizes = [2, 32], strides = [1, 1]} : vector<2x128xf32> to vector<2x32xf32>
    %418 = math.tanh %417 : vector<2x32xf32>
    %419 = vector.extract_strided_slice %397 {offsets = [0, 96], sizes = [2, 32], strides = [1, 1]} : vector<2x128xf32> to vector<2x32xf32>
    %420 = arith.negf %419 : vector<2x32xf32>
    %421 = math.exp %420 : vector<2x32xf32>
    %cst_128 = arith.constant 1.000000e+00 : f32
    %422 = vector.broadcast %cst_128 : f32 to vector<2x32xf32>
    %423 = arith.addf %422, %421 : vector<2x32xf32>
    %424 = arith.divf %422, %423 : vector<2x32xf32>
    %425 = arith.mulf %416, %404 : vector<2x32xf32>
    %426 = arith.mulf %410, %418 : vector<2x32xf32>
    %427 = arith.addf %425, %426 : vector<2x32xf32>
    %428 = math.tanh %427 : vector<2x32xf32>
    %429 = arith.mulf %424, %428 : vector<2x32xf32>
    %430 = vector.extract_strided_slice %391 {offsets = [0, 32], sizes = [2, 32], strides = [1, 1]} : vector<2x64xf32> to vector<2x32xf32>
    %431 = vector.extract_strided_slice %403 {offsets = [0, 0], sizes = [2, 32], strides = [1, 1]} : vector<2x128xf32> to vector<2x32xf32>
    %432 = arith.negf %431 : vector<2x32xf32>
    %433 = math.exp %432 : vector<2x32xf32>
    %cst_129 = arith.constant 1.000000e+00 : f32
    %434 = vector.broadcast %cst_129 : f32 to vector<2x32xf32>
    %435 = arith.addf %434, %433 : vector<2x32xf32>
    %436 = arith.divf %434, %435 : vector<2x32xf32>
    %437 = vector.extract_strided_slice %403 {offsets = [0, 32], sizes = [2, 32], strides = [1, 1]} : vector<2x128xf32> to vector<2x32xf32>
    %438 = arith.negf %437 : vector<2x32xf32>
    %439 = math.exp %438 : vector<2x32xf32>
    %cst_130 = arith.constant 1.000000e+00 : f32
    %440 = vector.broadcast %cst_130 : f32 to vector<2x32xf32>
    %441 = arith.addf %440, %439 : vector<2x32xf32>
    %442 = arith.divf %440, %441 : vector<2x32xf32>
    %443 = vector.extract_strided_slice %403 {offsets = [0, 64], sizes = [2, 32], strides = [1, 1]} : vector<2x128xf32> to vector<2x32xf32>
    %444 = math.tanh %443 : vector<2x32xf32>
    %445 = vector.extract_strided_slice %403 {offsets = [0, 96], sizes = [2, 32], strides = [1, 1]} : vector<2x128xf32> to vector<2x32xf32>
    %446 = arith.negf %445 : vector<2x32xf32>
    %447 = math.exp %446 : vector<2x32xf32>
    %cst_131 = arith.constant 1.000000e+00 : f32
    %448 = vector.broadcast %cst_131 : f32 to vector<2x32xf32>
    %449 = arith.addf %448, %447 : vector<2x32xf32>
    %450 = arith.divf %448, %449 : vector<2x32xf32>
    %451 = arith.mulf %442, %430 : vector<2x32xf32>
    %452 = arith.mulf %436, %444 : vector<2x32xf32>
    %453 = arith.addf %451, %452 : vector<2x32xf32>
    %454 = math.tanh %453 : vector<2x32xf32>
    %455 = arith.mulf %450, %454 : vector<2x32xf32>
    %c2_i32_132 = arith.constant 2 : i32
    %456 = arith.muli %c3_i32, %c2_i32_132 : i32
    %457 = arith.index_cast %456 : i32 to index
    %c0_133 = arith.constant 0 : index
    %458 = vector.load %arg8[%457, %c0_133] : memref<16x32xf32, #tpu.memory_space<vmem>>, vector<2x32xf32>
    tpu.vector_store %arg8[%457, %c0_133], %429 {strides = array<i32>} : memref<16x32xf32, #tpu.memory_space<vmem>>, vector<2x32xf32>,
    %c7_i32_134 = arith.constant 7 : i32
    %459 = arith.subi %c7_i32_134, %c3_i32 : i32
    %c2_i32_135 = arith.constant 2 : i32
    %460 = arith.muli %459, %c2_i32_135 : i32
    %461 = arith.index_cast %460 : i32 to index
    %c0_136 = arith.constant 0 : index
    %462 = vector.load %arg9[%461, %c0_136] : memref<16x32xf32, #tpu.memory_space<vmem>>, vector<2x32xf32>
    tpu.vector_store %arg9[%461, %c0_136], %455 {strides = array<i32>} : memref<16x32xf32, #tpu.memory_space<vmem>>, vector<2x32xf32>,
    %c8_i32_137 = arith.constant 8 : i32
    %463 = arith.cmpi slt, %376, %c8_i32_137 : i32
    %464 = arith.extui %463 : i1 to i32
    %465 = arith.sitofp %464 : i32 to f32
    %c8_i32_138 = arith.constant 8 : i32
    %466 = arith.cmpi slt, %380, %c8_i32_138 : i32
    %467 = arith.extui %466 : i1 to i32
    %468 = arith.sitofp %467 : i32 to f32
    %cst_139 = arith.constant dense<0.000000e+00> : vector<32xf32>
    %469 = vector.multi_reduction <add>, %429, %cst_139 [0] : vector<2x32xf32> to vector<32xf32>
    %470 = vector.shape_cast %469 : vector<32xf32> to vector<1x32xf32>
    %471 = vector.broadcast %465 : f32 to vector<1x32xf32>
    %472 = arith.mulf %471, %470 : vector<1x32xf32>
    %cst_140 = arith.constant dense<0.000000e+00> : vector<32xf32>
    %473 = vector.multi_reduction <add>, %455, %cst_140 [0] : vector<2x32xf32> to vector<32xf32>
    %474 = vector.shape_cast %473 : vector<32xf32> to vector<1x32xf32>
    %475 = vector.broadcast %468 : f32 to vector<1x32xf32>
    %476 = arith.mulf %475, %474 : vector<1x32xf32>
    %477 = tpu.concatenate %472, %476 in 1 : vector<1x32xf32>, vector<1x32xf32> -> vector<1x64xf32>
    %478 = arith.mulf %429, %429 : vector<2x32xf32>
    %cst_141 = arith.constant dense<0.000000e+00> : vector<32xf32>
    %479 = vector.multi_reduction <add>, %478, %cst_141 [0] : vector<2x32xf32> to vector<32xf32>
    %480 = vector.shape_cast %479 : vector<32xf32> to vector<1x32xf32>
    %481 = vector.broadcast %465 : f32 to vector<1x32xf32>
    %482 = arith.mulf %481, %480 : vector<1x32xf32>
    %483 = arith.mulf %455, %455 : vector<2x32xf32>
    %cst_142 = arith.constant dense<0.000000e+00> : vector<32xf32>
    %484 = vector.multi_reduction <add>, %483, %cst_142 [0] : vector<2x32xf32> to vector<32xf32>
    %485 = vector.shape_cast %484 : vector<32xf32> to vector<1x32xf32>
    %486 = vector.broadcast %468 : f32 to vector<1x32xf32>
    %487 = arith.mulf %486, %485 : vector<1x32xf32>
    %488 = tpu.concatenate %482, %487 in 1 : vector<1x32xf32>, vector<1x32xf32> -> vector<1x64xf32>
    %489 = tpu.concatenate %429, %455 in 1 : vector<2x32xf32>, vector<2x32xf32> -> vector<2x64xf32>
    %490 = tpu.concatenate %427, %453 in 1 : vector<2x32xf32>, vector<2x32xf32> -> vector<2x64xf32>
    %491 = arith.addf %373, %477 : vector<1x64xf32>
    %492 = arith.addf %374, %488 : vector<1x64xf32>
    %c4_i32 = arith.constant 4 : i32
    %c8_i32_143 = arith.constant 8 : i32
    %493 = arith.muli %arg0, %c8_i32_143 : i32
    %494 = arith.addi %493, %c4_i32 : i32
    %c0_i32_144 = arith.constant 0 : i32
    %495 = arith.subi %c0_i32_144, %arg0 : i32
    %c8_i32_145 = arith.constant 8 : i32
    %496 = arith.muli %495, %c8_i32_145 : i32
    %c7_i32_146 = arith.constant 7 : i32
    %497 = arith.subi %c7_i32_146, %c4_i32 : i32
    %498 = arith.addi %496, %497 : i32
    %c7_i32_147 = arith.constant 7 : i32
    %499 = arith.cmpi eq, %498, %c7_i32_147 : i32
    %500 = vector.extract_strided_slice %489 {offsets = [0, 0], sizes = [2, 32], strides = [1, 1]} : vector<2x64xf32> to vector<2x32xf32>
    %501 = vector.extract_strided_slice %489 {offsets = [0, 32], sizes = [2, 32], strides = [1, 1]} : vector<2x64xf32> to vector<2x32xf32>
    %cst_148 = arith.constant 0.000000e+00 : f32
    %502 = vector.broadcast %cst_148 : f32 to vector<2x32xf32>
    %503 = arith.select %499, %502, %501 : vector<2x32xf32>
    %504 = tpu.concatenate %500, %503 in 1 : vector<2x32xf32>, vector<2x32xf32> -> vector<2x64xf32>
    %505 = vector.extract_strided_slice %490 {offsets = [0, 0], sizes = [2, 32], strides = [1, 1]} : vector<2x64xf32> to vector<2x32xf32>
    %506 = vector.extract_strided_slice %490 {offsets = [0, 32], sizes = [2, 32], strides = [1, 1]} : vector<2x64xf32> to vector<2x32xf32>
    %cst_149 = arith.constant 0.000000e+00 : f32
    %507 = vector.broadcast %cst_149 : f32 to vector<2x32xf32>
    %508 = arith.select %499, %507, %506 : vector<2x32xf32>
    %509 = tpu.concatenate %505, %508 in 1 : vector<2x32xf32>, vector<2x32xf32> -> vector<2x64xf32>
    %cst_150 = arith.constant dense<0.000000e+00> : vector<2x256xf32>
    %510 = tpu.matmul %504, %17, %cst_150 {dimension_numbers = #tpu.dot_dimension_numbers<[1], [0], [0], [1], [0, 0, 1, 1], [], []>} : vector<2x64xf32>, vector<64x256xf32>, vector<2x256xf32> -> vector<2x256xf32>
    %c2_i32_151 = arith.constant 2 : i32
    %511 = arith.muli %c4_i32, %c2_i32_151 : i32
    %512 = arith.index_cast %511 : i32 to index
    %c0_152 = arith.constant 0 : index
    %513 = vector.load %arg13[%512, %c0_152] : memref<16x128xf32, #tpu.memory_space<vmem>>, vector<2x128xf32>
    %514 = vector.extract_strided_slice %510 {offsets = [0, 0], sizes = [2, 128], strides = [1, 1]} : vector<2x256xf32> to vector<2x128xf32>
    %515 = arith.addf %513, %514 : vector<2x128xf32>
    %c7_i32_153 = arith.constant 7 : i32
    %516 = arith.subi %c7_i32_153, %c4_i32 : i32
    %c2_i32_154 = arith.constant 2 : i32
    %517 = arith.muli %516, %c2_i32_154 : i32
    %518 = arith.index_cast %517 : i32 to index
    %c0_155 = arith.constant 0 : index
    %519 = vector.load %arg14[%518, %c0_155] : memref<16x128xf32, #tpu.memory_space<vmem>>, vector<2x128xf32>
    %520 = vector.extract_strided_slice %510 {offsets = [0, 128], sizes = [2, 128], strides = [1, 1]} : vector<2x256xf32> to vector<2x128xf32>
    %521 = arith.addf %519, %520 : vector<2x128xf32>
    %522 = vector.extract_strided_slice %509 {offsets = [0, 0], sizes = [2, 32], strides = [1, 1]} : vector<2x64xf32> to vector<2x32xf32>
    %523 = vector.extract_strided_slice %515 {offsets = [0, 0], sizes = [2, 32], strides = [1, 1]} : vector<2x128xf32> to vector<2x32xf32>
    %524 = arith.negf %523 : vector<2x32xf32>
    %525 = math.exp %524 : vector<2x32xf32>
    %cst_156 = arith.constant 1.000000e+00 : f32
    %526 = vector.broadcast %cst_156 : f32 to vector<2x32xf32>
    %527 = arith.addf %526, %525 : vector<2x32xf32>
    %528 = arith.divf %526, %527 : vector<2x32xf32>
    %529 = vector.extract_strided_slice %515 {offsets = [0, 32], sizes = [2, 32], strides = [1, 1]} : vector<2x128xf32> to vector<2x32xf32>
    %530 = arith.negf %529 : vector<2x32xf32>
    %531 = math.exp %530 : vector<2x32xf32>
    %cst_157 = arith.constant 1.000000e+00 : f32
    %532 = vector.broadcast %cst_157 : f32 to vector<2x32xf32>
    %533 = arith.addf %532, %531 : vector<2x32xf32>
    %534 = arith.divf %532, %533 : vector<2x32xf32>
    %535 = vector.extract_strided_slice %515 {offsets = [0, 64], sizes = [2, 32], strides = [1, 1]} : vector<2x128xf32> to vector<2x32xf32>
    %536 = math.tanh %535 : vector<2x32xf32>
    %537 = vector.extract_strided_slice %515 {offsets = [0, 96], sizes = [2, 32], strides = [1, 1]} : vector<2x128xf32> to vector<2x32xf32>
    %538 = arith.negf %537 : vector<2x32xf32>
    %539 = math.exp %538 : vector<2x32xf32>
    %cst_158 = arith.constant 1.000000e+00 : f32
    %540 = vector.broadcast %cst_158 : f32 to vector<2x32xf32>
    %541 = arith.addf %540, %539 : vector<2x32xf32>
    %542 = arith.divf %540, %541 : vector<2x32xf32>
    %543 = arith.mulf %534, %522 : vector<2x32xf32>
    %544 = arith.mulf %528, %536 : vector<2x32xf32>
    %545 = arith.addf %543, %544 : vector<2x32xf32>
    %546 = math.tanh %545 : vector<2x32xf32>
    %547 = arith.mulf %542, %546 : vector<2x32xf32>
    %548 = vector.extract_strided_slice %509 {offsets = [0, 32], sizes = [2, 32], strides = [1, 1]} : vector<2x64xf32> to vector<2x32xf32>
    %549 = vector.extract_strided_slice %521 {offsets = [0, 0], sizes = [2, 32], strides = [1, 1]} : vector<2x128xf32> to vector<2x32xf32>
    %550 = arith.negf %549 : vector<2x32xf32>
    %551 = math.exp %550 : vector<2x32xf32>
    %cst_159 = arith.constant 1.000000e+00 : f32
    %552 = vector.broadcast %cst_159 : f32 to vector<2x32xf32>
    %553 = arith.addf %552, %551 : vector<2x32xf32>
    %554 = arith.divf %552, %553 : vector<2x32xf32>
    %555 = vector.extract_strided_slice %521 {offsets = [0, 32], sizes = [2, 32], strides = [1, 1]} : vector<2x128xf32> to vector<2x32xf32>
    %556 = arith.negf %555 : vector<2x32xf32>
    %557 = math.exp %556 : vector<2x32xf32>
    %cst_160 = arith.constant 1.000000e+00 : f32
    %558 = vector.broadcast %cst_160 : f32 to vector<2x32xf32>
    %559 = arith.addf %558, %557 : vector<2x32xf32>
    %560 = arith.divf %558, %559 : vector<2x32xf32>
    %561 = vector.extract_strided_slice %521 {offsets = [0, 64], sizes = [2, 32], strides = [1, 1]} : vector<2x128xf32> to vector<2x32xf32>
    %562 = math.tanh %561 : vector<2x32xf32>
    %563 = vector.extract_strided_slice %521 {offsets = [0, 96], sizes = [2, 32], strides = [1, 1]} : vector<2x128xf32> to vector<2x32xf32>
    %564 = arith.negf %563 : vector<2x32xf32>
    %565 = math.exp %564 : vector<2x32xf32>
    %cst_161 = arith.constant 1.000000e+00 : f32
    %566 = vector.broadcast %cst_161 : f32 to vector<2x32xf32>
    %567 = arith.addf %566, %565 : vector<2x32xf32>
    %568 = arith.divf %566, %567 : vector<2x32xf32>
    %569 = arith.mulf %560, %548 : vector<2x32xf32>
    %570 = arith.mulf %554, %562 : vector<2x32xf32>
    %571 = arith.addf %569, %570 : vector<2x32xf32>
    %572 = math.tanh %571 : vector<2x32xf32>
    %573 = arith.mulf %568, %572 : vector<2x32xf32>
    %c2_i32_162 = arith.constant 2 : i32
    %574 = arith.muli %c4_i32, %c2_i32_162 : i32
    %575 = arith.index_cast %574 : i32 to index
    %c0_163 = arith.constant 0 : index
    %576 = vector.load %arg8[%575, %c0_163] : memref<16x32xf32, #tpu.memory_space<vmem>>, vector<2x32xf32>
    tpu.vector_store %arg8[%575, %c0_163], %547 {strides = array<i32>} : memref<16x32xf32, #tpu.memory_space<vmem>>, vector<2x32xf32>,
    %c7_i32_164 = arith.constant 7 : i32
    %577 = arith.subi %c7_i32_164, %c4_i32 : i32
    %c2_i32_165 = arith.constant 2 : i32
    %578 = arith.muli %577, %c2_i32_165 : i32
    %579 = arith.index_cast %578 : i32 to index
    %c0_166 = arith.constant 0 : index
    %580 = vector.load %arg9[%579, %c0_166] : memref<16x32xf32, #tpu.memory_space<vmem>>, vector<2x32xf32>
    tpu.vector_store %arg9[%579, %c0_166], %573 {strides = array<i32>} : memref<16x32xf32, #tpu.memory_space<vmem>>, vector<2x32xf32>,
    %c8_i32_167 = arith.constant 8 : i32
    %581 = arith.cmpi slt, %494, %c8_i32_167 : i32
    %582 = arith.extui %581 : i1 to i32
    %583 = arith.sitofp %582 : i32 to f32
    %c8_i32_168 = arith.constant 8 : i32
    %584 = arith.cmpi slt, %498, %c8_i32_168 : i32
    %585 = arith.extui %584 : i1 to i32
    %586 = arith.sitofp %585 : i32 to f32
    %cst_169 = arith.constant dense<0.000000e+00> : vector<32xf32>
    %587 = vector.multi_reduction <add>, %547, %cst_169 [0] : vector<2x32xf32> to vector<32xf32>
    %588 = vector.shape_cast %587 : vector<32xf32> to vector<1x32xf32>
    %589 = vector.broadcast %583 : f32 to vector<1x32xf32>
    %590 = arith.mulf %589, %588 : vector<1x32xf32>
    %cst_170 = arith.constant dense<0.000000e+00> : vector<32xf32>
    %591 = vector.multi_reduction <add>, %573, %cst_170 [0] : vector<2x32xf32> to vector<32xf32>
    %592 = vector.shape_cast %591 : vector<32xf32> to vector<1x32xf32>
    %593 = vector.broadcast %586 : f32 to vector<1x32xf32>
    %594 = arith.mulf %593, %592 : vector<1x32xf32>
    %595 = tpu.concatenate %590, %594 in 1 : vector<1x32xf32>, vector<1x32xf32> -> vector<1x64xf32>
    %596 = arith.mulf %547, %547 : vector<2x32xf32>
    %cst_171 = arith.constant dense<0.000000e+00> : vector<32xf32>
    %597 = vector.multi_reduction <add>, %596, %cst_171 [0] : vector<2x32xf32> to vector<32xf32>
    %598 = vector.shape_cast %597 : vector<32xf32> to vector<1x32xf32>
    %599 = vector.broadcast %583 : f32 to vector<1x32xf32>
    %600 = arith.mulf %599, %598 : vector<1x32xf32>
    %601 = arith.mulf %573, %573 : vector<2x32xf32>
    %cst_172 = arith.constant dense<0.000000e+00> : vector<32xf32>
    %602 = vector.multi_reduction <add>, %601, %cst_172 [0] : vector<2x32xf32> to vector<32xf32>
    %603 = vector.shape_cast %602 : vector<32xf32> to vector<1x32xf32>
    %604 = vector.broadcast %586 : f32 to vector<1x32xf32>
    %605 = arith.mulf %604, %603 : vector<1x32xf32>
    %606 = tpu.concatenate %600, %605 in 1 : vector<1x32xf32>, vector<1x32xf32> -> vector<1x64xf32>
    %607 = tpu.concatenate %547, %573 in 1 : vector<2x32xf32>, vector<2x32xf32> -> vector<2x64xf32>
    %608 = tpu.concatenate %545, %571 in 1 : vector<2x32xf32>, vector<2x32xf32> -> vector<2x64xf32>
    %609 = arith.addf %491, %595 : vector<1x64xf32>
    %610 = arith.addf %492, %606 : vector<1x64xf32>
    %c5_i32 = arith.constant 5 : i32
    %c8_i32_173 = arith.constant 8 : i32
    %611 = arith.muli %arg0, %c8_i32_173 : i32
    %612 = arith.addi %611, %c5_i32 : i32
    %c0_i32_174 = arith.constant 0 : i32
    %613 = arith.subi %c0_i32_174, %arg0 : i32
    %c8_i32_175 = arith.constant 8 : i32
    %614 = arith.muli %613, %c8_i32_175 : i32
    %c7_i32_176 = arith.constant 7 : i32
    %615 = arith.subi %c7_i32_176, %c5_i32 : i32
    %616 = arith.addi %614, %615 : i32
    %c7_i32_177 = arith.constant 7 : i32
    %617 = arith.cmpi eq, %616, %c7_i32_177 : i32
    %618 = vector.extract_strided_slice %607 {offsets = [0, 0], sizes = [2, 32], strides = [1, 1]} : vector<2x64xf32> to vector<2x32xf32>
    %619 = vector.extract_strided_slice %607 {offsets = [0, 32], sizes = [2, 32], strides = [1, 1]} : vector<2x64xf32> to vector<2x32xf32>
    %cst_178 = arith.constant 0.000000e+00 : f32
    %620 = vector.broadcast %cst_178 : f32 to vector<2x32xf32>
    %621 = arith.select %617, %620, %619 : vector<2x32xf32>
    %622 = tpu.concatenate %618, %621 in 1 : vector<2x32xf32>, vector<2x32xf32> -> vector<2x64xf32>
    %623 = vector.extract_strided_slice %608 {offsets = [0, 0], sizes = [2, 32], strides = [1, 1]} : vector<2x64xf32> to vector<2x32xf32>
    %624 = vector.extract_strided_slice %608 {offsets = [0, 32], sizes = [2, 32], strides = [1, 1]} : vector<2x64xf32> to vector<2x32xf32>
    %cst_179 = arith.constant 0.000000e+00 : f32
    %625 = vector.broadcast %cst_179 : f32 to vector<2x32xf32>
    %626 = arith.select %617, %625, %624 : vector<2x32xf32>
    %627 = tpu.concatenate %623, %626 in 1 : vector<2x32xf32>, vector<2x32xf32> -> vector<2x64xf32>
    %cst_180 = arith.constant dense<0.000000e+00> : vector<2x256xf32>
    %628 = tpu.matmul %622, %17, %cst_180 {dimension_numbers = #tpu.dot_dimension_numbers<[1], [0], [0], [1], [0, 0, 1, 1], [], []>} : vector<2x64xf32>, vector<64x256xf32>, vector<2x256xf32> -> vector<2x256xf32>
    %c2_i32_181 = arith.constant 2 : i32
    %629 = arith.muli %c5_i32, %c2_i32_181 : i32
    %630 = arith.index_cast %629 : i32 to index
    %c0_182 = arith.constant 0 : index
    %631 = vector.load %arg13[%630, %c0_182] : memref<16x128xf32, #tpu.memory_space<vmem>>, vector<2x128xf32>
    %632 = vector.extract_strided_slice %628 {offsets = [0, 0], sizes = [2, 128], strides = [1, 1]} : vector<2x256xf32> to vector<2x128xf32>
    %633 = arith.addf %631, %632 : vector<2x128xf32>
    %c7_i32_183 = arith.constant 7 : i32
    %634 = arith.subi %c7_i32_183, %c5_i32 : i32
    %c2_i32_184 = arith.constant 2 : i32
    %635 = arith.muli %634, %c2_i32_184 : i32
    %636 = arith.index_cast %635 : i32 to index
    %c0_185 = arith.constant 0 : index
    %637 = vector.load %arg14[%636, %c0_185] : memref<16x128xf32, #tpu.memory_space<vmem>>, vector<2x128xf32>
    %638 = vector.extract_strided_slice %628 {offsets = [0, 128], sizes = [2, 128], strides = [1, 1]} : vector<2x256xf32> to vector<2x128xf32>
    %639 = arith.addf %637, %638 : vector<2x128xf32>
    %640 = vector.extract_strided_slice %627 {offsets = [0, 0], sizes = [2, 32], strides = [1, 1]} : vector<2x64xf32> to vector<2x32xf32>
    %641 = vector.extract_strided_slice %633 {offsets = [0, 0], sizes = [2, 32], strides = [1, 1]} : vector<2x128xf32> to vector<2x32xf32>
    %642 = arith.negf %641 : vector<2x32xf32>
    %643 = math.exp %642 : vector<2x32xf32>
    %cst_186 = arith.constant 1.000000e+00 : f32
    %644 = vector.broadcast %cst_186 : f32 to vector<2x32xf32>
    %645 = arith.addf %644, %643 : vector<2x32xf32>
    %646 = arith.divf %644, %645 : vector<2x32xf32>
    %647 = vector.extract_strided_slice %633 {offsets = [0, 32], sizes = [2, 32], strides = [1, 1]} : vector<2x128xf32> to vector<2x32xf32>
    %648 = arith.negf %647 : vector<2x32xf32>
    %649 = math.exp %648 : vector<2x32xf32>
    %cst_187 = arith.constant 1.000000e+00 : f32
    %650 = vector.broadcast %cst_187 : f32 to vector<2x32xf32>
    %651 = arith.addf %650, %649 : vector<2x32xf32>
    %652 = arith.divf %650, %651 : vector<2x32xf32>
    %653 = vector.extract_strided_slice %633 {offsets = [0, 64], sizes = [2, 32], strides = [1, 1]} : vector<2x128xf32> to vector<2x32xf32>
    %654 = math.tanh %653 : vector<2x32xf32>
    %655 = vector.extract_strided_slice %633 {offsets = [0, 96], sizes = [2, 32], strides = [1, 1]} : vector<2x128xf32> to vector<2x32xf32>
    %656 = arith.negf %655 : vector<2x32xf32>
    %657 = math.exp %656 : vector<2x32xf32>
    %cst_188 = arith.constant 1.000000e+00 : f32
    %658 = vector.broadcast %cst_188 : f32 to vector<2x32xf32>
    %659 = arith.addf %658, %657 : vector<2x32xf32>
    %660 = arith.divf %658, %659 : vector<2x32xf32>
    %661 = arith.mulf %652, %640 : vector<2x32xf32>
    %662 = arith.mulf %646, %654 : vector<2x32xf32>
    %663 = arith.addf %661, %662 : vector<2x32xf32>
    %664 = math.tanh %663 : vector<2x32xf32>
    %665 = arith.mulf %660, %664 : vector<2x32xf32>
    %666 = vector.extract_strided_slice %627 {offsets = [0, 32], sizes = [2, 32], strides = [1, 1]} : vector<2x64xf32> to vector<2x32xf32>
    %667 = vector.extract_strided_slice %639 {offsets = [0, 0], sizes = [2, 32], strides = [1, 1]} : vector<2x128xf32> to vector<2x32xf32>
    %668 = arith.negf %667 : vector<2x32xf32>
    %669 = math.exp %668 : vector<2x32xf32>
    %cst_189 = arith.constant 1.000000e+00 : f32
    %670 = vector.broadcast %cst_189 : f32 to vector<2x32xf32>
    %671 = arith.addf %670, %669 : vector<2x32xf32>
    %672 = arith.divf %670, %671 : vector<2x32xf32>
    %673 = vector.extract_strided_slice %639 {offsets = [0, 32], sizes = [2, 32], strides = [1, 1]} : vector<2x128xf32> to vector<2x32xf32>
    %674 = arith.negf %673 : vector<2x32xf32>
    %675 = math.exp %674 : vector<2x32xf32>
    %cst_190 = arith.constant 1.000000e+00 : f32
    %676 = vector.broadcast %cst_190 : f32 to vector<2x32xf32>
    %677 = arith.addf %676, %675 : vector<2x32xf32>
    %678 = arith.divf %676, %677 : vector<2x32xf32>
    %679 = vector.extract_strided_slice %639 {offsets = [0, 64], sizes = [2, 32], strides = [1, 1]} : vector<2x128xf32> to vector<2x32xf32>
    %680 = math.tanh %679 : vector<2x32xf32>
    %681 = vector.extract_strided_slice %639 {offsets = [0, 96], sizes = [2, 32], strides = [1, 1]} : vector<2x128xf32> to vector<2x32xf32>
    %682 = arith.negf %681 : vector<2x32xf32>
    %683 = math.exp %682 : vector<2x32xf32>
    %cst_191 = arith.constant 1.000000e+00 : f32
    %684 = vector.broadcast %cst_191 : f32 to vector<2x32xf32>
    %685 = arith.addf %684, %683 : vector<2x32xf32>
    %686 = arith.divf %684, %685 : vector<2x32xf32>
    %687 = arith.mulf %678, %666 : vector<2x32xf32>
    %688 = arith.mulf %672, %680 : vector<2x32xf32>
    %689 = arith.addf %687, %688 : vector<2x32xf32>
    %690 = math.tanh %689 : vector<2x32xf32>
    %691 = arith.mulf %686, %690 : vector<2x32xf32>
    %c2_i32_192 = arith.constant 2 : i32
    %692 = arith.muli %c5_i32, %c2_i32_192 : i32
    %693 = arith.index_cast %692 : i32 to index
    %c0_193 = arith.constant 0 : index
    %694 = vector.load %arg8[%693, %c0_193] : memref<16x32xf32, #tpu.memory_space<vmem>>, vector<2x32xf32>
    tpu.vector_store %arg8[%693, %c0_193], %665 {strides = array<i32>} : memref<16x32xf32, #tpu.memory_space<vmem>>, vector<2x32xf32>,
    %c7_i32_194 = arith.constant 7 : i32
    %695 = arith.subi %c7_i32_194, %c5_i32 : i32
    %c2_i32_195 = arith.constant 2 : i32
    %696 = arith.muli %695, %c2_i32_195 : i32
    %697 = arith.index_cast %696 : i32 to index
    %c0_196 = arith.constant 0 : index
    %698 = vector.load %arg9[%697, %c0_196] : memref<16x32xf32, #tpu.memory_space<vmem>>, vector<2x32xf32>
    tpu.vector_store %arg9[%697, %c0_196], %691 {strides = array<i32>} : memref<16x32xf32, #tpu.memory_space<vmem>>, vector<2x32xf32>,
    %c8_i32_197 = arith.constant 8 : i32
    %699 = arith.cmpi slt, %612, %c8_i32_197 : i32
    %700 = arith.extui %699 : i1 to i32
    %701 = arith.sitofp %700 : i32 to f32
    %c8_i32_198 = arith.constant 8 : i32
    %702 = arith.cmpi slt, %616, %c8_i32_198 : i32
    %703 = arith.extui %702 : i1 to i32
    %704 = arith.sitofp %703 : i32 to f32
    %cst_199 = arith.constant dense<0.000000e+00> : vector<32xf32>
    %705 = vector.multi_reduction <add>, %665, %cst_199 [0] : vector<2x32xf32> to vector<32xf32>
    %706 = vector.shape_cast %705 : vector<32xf32> to vector<1x32xf32>
    %707 = vector.broadcast %701 : f32 to vector<1x32xf32>
    %708 = arith.mulf %707, %706 : vector<1x32xf32>
    %cst_200 = arith.constant dense<0.000000e+00> : vector<32xf32>
    %709 = vector.multi_reduction <add>, %691, %cst_200 [0] : vector<2x32xf32> to vector<32xf32>
    %710 = vector.shape_cast %709 : vector<32xf32> to vector<1x32xf32>
    %711 = vector.broadcast %704 : f32 to vector<1x32xf32>
    %712 = arith.mulf %711, %710 : vector<1x32xf32>
    %713 = tpu.concatenate %708, %712 in 1 : vector<1x32xf32>, vector<1x32xf32> -> vector<1x64xf32>
    %714 = arith.mulf %665, %665 : vector<2x32xf32>
    %cst_201 = arith.constant dense<0.000000e+00> : vector<32xf32>
    %715 = vector.multi_reduction <add>, %714, %cst_201 [0] : vector<2x32xf32> to vector<32xf32>
    %716 = vector.shape_cast %715 : vector<32xf32> to vector<1x32xf32>
    %717 = vector.broadcast %701 : f32 to vector<1x32xf32>
    %718 = arith.mulf %717, %716 : vector<1x32xf32>
    %719 = arith.mulf %691, %691 : vector<2x32xf32>
    %cst_202 = arith.constant dense<0.000000e+00> : vector<32xf32>
    %720 = vector.multi_reduction <add>, %719, %cst_202 [0] : vector<2x32xf32> to vector<32xf32>
    %721 = vector.shape_cast %720 : vector<32xf32> to vector<1x32xf32>
    %722 = vector.broadcast %704 : f32 to vector<1x32xf32>
    %723 = arith.mulf %722, %721 : vector<1x32xf32>
    %724 = tpu.concatenate %718, %723 in 1 : vector<1x32xf32>, vector<1x32xf32> -> vector<1x64xf32>
    %725 = tpu.concatenate %665, %691 in 1 : vector<2x32xf32>, vector<2x32xf32> -> vector<2x64xf32>
    %726 = tpu.concatenate %663, %689 in 1 : vector<2x32xf32>, vector<2x32xf32> -> vector<2x64xf32>
    %727 = arith.addf %609, %713 : vector<1x64xf32>
    %728 = arith.addf %610, %724 : vector<1x64xf32>
    %c6_i32 = arith.constant 6 : i32
    %c8_i32_203 = arith.constant 8 : i32
    %729 = arith.muli %arg0, %c8_i32_203 : i32
    %730 = arith.addi %729, %c6_i32 : i32
    %c0_i32_204 = arith.constant 0 : i32
    %731 = arith.subi %c0_i32_204, %arg0 : i32
    %c8_i32_205 = arith.constant 8 : i32
    %732 = arith.muli %731, %c8_i32_205 : i32
    %c7_i32_206 = arith.constant 7 : i32
    %733 = arith.subi %c7_i32_206, %c6_i32 : i32
    %734 = arith.addi %732, %733 : i32
    %c7_i32_207 = arith.constant 7 : i32
    %735 = arith.cmpi eq, %734, %c7_i32_207 : i32
    %736 = vector.extract_strided_slice %725 {offsets = [0, 0], sizes = [2, 32], strides = [1, 1]} : vector<2x64xf32> to vector<2x32xf32>
    %737 = vector.extract_strided_slice %725 {offsets = [0, 32], sizes = [2, 32], strides = [1, 1]} : vector<2x64xf32> to vector<2x32xf32>
    %cst_208 = arith.constant 0.000000e+00 : f32
    %738 = vector.broadcast %cst_208 : f32 to vector<2x32xf32>
    %739 = arith.select %735, %738, %737 : vector<2x32xf32>
    %740 = tpu.concatenate %736, %739 in 1 : vector<2x32xf32>, vector<2x32xf32> -> vector<2x64xf32>
    %741 = vector.extract_strided_slice %726 {offsets = [0, 0], sizes = [2, 32], strides = [1, 1]} : vector<2x64xf32> to vector<2x32xf32>
    %742 = vector.extract_strided_slice %726 {offsets = [0, 32], sizes = [2, 32], strides = [1, 1]} : vector<2x64xf32> to vector<2x32xf32>
    %cst_209 = arith.constant 0.000000e+00 : f32
    %743 = vector.broadcast %cst_209 : f32 to vector<2x32xf32>
    %744 = arith.select %735, %743, %742 : vector<2x32xf32>
    %745 = tpu.concatenate %741, %744 in 1 : vector<2x32xf32>, vector<2x32xf32> -> vector<2x64xf32>
    %cst_210 = arith.constant dense<0.000000e+00> : vector<2x256xf32>
    %746 = tpu.matmul %740, %17, %cst_210 {dimension_numbers = #tpu.dot_dimension_numbers<[1], [0], [0], [1], [0, 0, 1, 1], [], []>} : vector<2x64xf32>, vector<64x256xf32>, vector<2x256xf32> -> vector<2x256xf32>
    %c2_i32_211 = arith.constant 2 : i32
    %747 = arith.muli %c6_i32, %c2_i32_211 : i32
    %748 = arith.index_cast %747 : i32 to index
    %c0_212 = arith.constant 0 : index
    %749 = vector.load %arg13[%748, %c0_212] : memref<16x128xf32, #tpu.memory_space<vmem>>, vector<2x128xf32>
    %750 = vector.extract_strided_slice %746 {offsets = [0, 0], sizes = [2, 128], strides = [1, 1]} : vector<2x256xf32> to vector<2x128xf32>
    %751 = arith.addf %749, %750 : vector<2x128xf32>
    %c7_i32_213 = arith.constant 7 : i32
    %752 = arith.subi %c7_i32_213, %c6_i32 : i32
    %c2_i32_214 = arith.constant 2 : i32
    %753 = arith.muli %752, %c2_i32_214 : i32
    %754 = arith.index_cast %753 : i32 to index
    %c0_215 = arith.constant 0 : index
    %755 = vector.load %arg14[%754, %c0_215] : memref<16x128xf32, #tpu.memory_space<vmem>>, vector<2x128xf32>
    %756 = vector.extract_strided_slice %746 {offsets = [0, 128], sizes = [2, 128], strides = [1, 1]} : vector<2x256xf32> to vector<2x128xf32>
    %757 = arith.addf %755, %756 : vector<2x128xf32>
    %758 = vector.extract_strided_slice %745 {offsets = [0, 0], sizes = [2, 32], strides = [1, 1]} : vector<2x64xf32> to vector<2x32xf32>
    %759 = vector.extract_strided_slice %751 {offsets = [0, 0], sizes = [2, 32], strides = [1, 1]} : vector<2x128xf32> to vector<2x32xf32>
    %760 = arith.negf %759 : vector<2x32xf32>
    %761 = math.exp %760 : vector<2x32xf32>
    %cst_216 = arith.constant 1.000000e+00 : f32
    %762 = vector.broadcast %cst_216 : f32 to vector<2x32xf32>
    %763 = arith.addf %762, %761 : vector<2x32xf32>
    %764 = arith.divf %762, %763 : vector<2x32xf32>
    %765 = vector.extract_strided_slice %751 {offsets = [0, 32], sizes = [2, 32], strides = [1, 1]} : vector<2x128xf32> to vector<2x32xf32>
    %766 = arith.negf %765 : vector<2x32xf32>
    %767 = math.exp %766 : vector<2x32xf32>
    %cst_217 = arith.constant 1.000000e+00 : f32
    %768 = vector.broadcast %cst_217 : f32 to vector<2x32xf32>
    %769 = arith.addf %768, %767 : vector<2x32xf32>
    %770 = arith.divf %768, %769 : vector<2x32xf32>
    %771 = vector.extract_strided_slice %751 {offsets = [0, 64], sizes = [2, 32], strides = [1, 1]} : vector<2x128xf32> to vector<2x32xf32>
    %772 = math.tanh %771 : vector<2x32xf32>
    %773 = vector.extract_strided_slice %751 {offsets = [0, 96], sizes = [2, 32], strides = [1, 1]} : vector<2x128xf32> to vector<2x32xf32>
    %774 = arith.negf %773 : vector<2x32xf32>
    %775 = math.exp %774 : vector<2x32xf32>
    %cst_218 = arith.constant 1.000000e+00 : f32
    %776 = vector.broadcast %cst_218 : f32 to vector<2x32xf32>
    %777 = arith.addf %776, %775 : vector<2x32xf32>
    %778 = arith.divf %776, %777 : vector<2x32xf32>
    %779 = arith.mulf %770, %758 : vector<2x32xf32>
    %780 = arith.mulf %764, %772 : vector<2x32xf32>
    %781 = arith.addf %779, %780 : vector<2x32xf32>
    %782 = math.tanh %781 : vector<2x32xf32>
    %783 = arith.mulf %778, %782 : vector<2x32xf32>
    %784 = vector.extract_strided_slice %745 {offsets = [0, 32], sizes = [2, 32], strides = [1, 1]} : vector<2x64xf32> to vector<2x32xf32>
    %785 = vector.extract_strided_slice %757 {offsets = [0, 0], sizes = [2, 32], strides = [1, 1]} : vector<2x128xf32> to vector<2x32xf32>
    %786 = arith.negf %785 : vector<2x32xf32>
    %787 = math.exp %786 : vector<2x32xf32>
    %cst_219 = arith.constant 1.000000e+00 : f32
    %788 = vector.broadcast %cst_219 : f32 to vector<2x32xf32>
    %789 = arith.addf %788, %787 : vector<2x32xf32>
    %790 = arith.divf %788, %789 : vector<2x32xf32>
    %791 = vector.extract_strided_slice %757 {offsets = [0, 32], sizes = [2, 32], strides = [1, 1]} : vector<2x128xf32> to vector<2x32xf32>
    %792 = arith.negf %791 : vector<2x32xf32>
    %793 = math.exp %792 : vector<2x32xf32>
    %cst_220 = arith.constant 1.000000e+00 : f32
    %794 = vector.broadcast %cst_220 : f32 to vector<2x32xf32>
    %795 = arith.addf %794, %793 : vector<2x32xf32>
    %796 = arith.divf %794, %795 : vector<2x32xf32>
    %797 = vector.extract_strided_slice %757 {offsets = [0, 64], sizes = [2, 32], strides = [1, 1]} : vector<2x128xf32> to vector<2x32xf32>
    %798 = math.tanh %797 : vector<2x32xf32>
    %799 = vector.extract_strided_slice %757 {offsets = [0, 96], sizes = [2, 32], strides = [1, 1]} : vector<2x128xf32> to vector<2x32xf32>
    %800 = arith.negf %799 : vector<2x32xf32>
    %801 = math.exp %800 : vector<2x32xf32>
    %cst_221 = arith.constant 1.000000e+00 : f32
    %802 = vector.broadcast %cst_221 : f32 to vector<2x32xf32>
    %803 = arith.addf %802, %801 : vector<2x32xf32>
    %804 = arith.divf %802, %803 : vector<2x32xf32>
    %805 = arith.mulf %796, %784 : vector<2x32xf32>
    %806 = arith.mulf %790, %798 : vector<2x32xf32>
    %807 = arith.addf %805, %806 : vector<2x32xf32>
    %808 = math.tanh %807 : vector<2x32xf32>
    %809 = arith.mulf %804, %808 : vector<2x32xf32>
    %c2_i32_222 = arith.constant 2 : i32
    %810 = arith.muli %c6_i32, %c2_i32_222 : i32
    %811 = arith.index_cast %810 : i32 to index
    %c0_223 = arith.constant 0 : index
    %812 = vector.load %arg8[%811, %c0_223] : memref<16x32xf32, #tpu.memory_space<vmem>>, vector<2x32xf32>
    tpu.vector_store %arg8[%811, %c0_223], %783 {strides = array<i32>} : memref<16x32xf32, #tpu.memory_space<vmem>>, vector<2x32xf32>,
    %c7_i32_224 = arith.constant 7 : i32
    %813 = arith.subi %c7_i32_224, %c6_i32 : i32
    %c2_i32_225 = arith.constant 2 : i32
    %814 = arith.muli %813, %c2_i32_225 : i32
    %815 = arith.index_cast %814 : i32 to index
    %c0_226 = arith.constant 0 : index
    %816 = vector.load %arg9[%815, %c0_226] : memref<16x32xf32, #tpu.memory_space<vmem>>, vector<2x32xf32>
    tpu.vector_store %arg9[%815, %c0_226], %809 {strides = array<i32>} : memref<16x32xf32, #tpu.memory_space<vmem>>, vector<2x32xf32>,
    %c8_i32_227 = arith.constant 8 : i32
    %817 = arith.cmpi slt, %730, %c8_i32_227 : i32
    %818 = arith.extui %817 : i1 to i32
    %819 = arith.sitofp %818 : i32 to f32
    %c8_i32_228 = arith.constant 8 : i32
    %820 = arith.cmpi slt, %734, %c8_i32_228 : i32
    %821 = arith.extui %820 : i1 to i32
    %822 = arith.sitofp %821 : i32 to f32
    %cst_229 = arith.constant dense<0.000000e+00> : vector<32xf32>
    %823 = vector.multi_reduction <add>, %783, %cst_229 [0] : vector<2x32xf32> to vector<32xf32>
    %824 = vector.shape_cast %823 : vector<32xf32> to vector<1x32xf32>
    %825 = vector.broadcast %819 : f32 to vector<1x32xf32>
    %826 = arith.mulf %825, %824 : vector<1x32xf32>
    %cst_230 = arith.constant dense<0.000000e+00> : vector<32xf32>
    %827 = vector.multi_reduction <add>, %809, %cst_230 [0] : vector<2x32xf32> to vector<32xf32>
    %828 = vector.shape_cast %827 : vector<32xf32> to vector<1x32xf32>
    %829 = vector.broadcast %822 : f32 to vector<1x32xf32>
    %830 = arith.mulf %829, %828 : vector<1x32xf32>
    %831 = tpu.concatenate %826, %830 in 1 : vector<1x32xf32>, vector<1x32xf32> -> vector<1x64xf32>
    %832 = arith.mulf %783, %783 : vector<2x32xf32>
    %cst_231 = arith.constant dense<0.000000e+00> : vector<32xf32>
    %833 = vector.multi_reduction <add>, %832, %cst_231 [0] : vector<2x32xf32> to vector<32xf32>
    %834 = vector.shape_cast %833 : vector<32xf32> to vector<1x32xf32>
    %835 = vector.broadcast %819 : f32 to vector<1x32xf32>
    %836 = arith.mulf %835, %834 : vector<1x32xf32>
    %837 = arith.mulf %809, %809 : vector<2x32xf32>
    %cst_232 = arith.constant dense<0.000000e+00> : vector<32xf32>
    %838 = vector.multi_reduction <add>, %837, %cst_232 [0] : vector<2x32xf32> to vector<32xf32>
    %839 = vector.shape_cast %838 : vector<32xf32> to vector<1x32xf32>
    %840 = vector.broadcast %822 : f32 to vector<1x32xf32>
    %841 = arith.mulf %840, %839 : vector<1x32xf32>
    %842 = tpu.concatenate %836, %841 in 1 : vector<1x32xf32>, vector<1x32xf32> -> vector<1x64xf32>
    %843 = tpu.concatenate %783, %809 in 1 : vector<2x32xf32>, vector<2x32xf32> -> vector<2x64xf32>
    %844 = tpu.concatenate %781, %807 in 1 : vector<2x32xf32>, vector<2x32xf32> -> vector<2x64xf32>
    %845 = arith.addf %727, %831 : vector<1x64xf32>
    %846 = arith.addf %728, %842 : vector<1x64xf32>
    %c7_i32_233 = arith.constant 7 : i32
    %c8_i32_234 = arith.constant 8 : i32
    %847 = arith.muli %arg0, %c8_i32_234 : i32
    %848 = arith.addi %847, %c7_i32_233 : i32
    %c0_i32_235 = arith.constant 0 : i32
    %849 = arith.subi %c0_i32_235, %arg0 : i32
    %c8_i32_236 = arith.constant 8 : i32
    %850 = arith.muli %849, %c8_i32_236 : i32
    %c7_i32_237 = arith.constant 7 : i32
    %851 = arith.subi %c7_i32_237, %c7_i32_233 : i32
    %852 = arith.addi %850, %851 : i32
    %c7_i32_238 = arith.constant 7 : i32
    %853 = arith.cmpi eq, %852, %c7_i32_238 : i32
    %854 = vector.extract_strided_slice %843 {offsets = [0, 0], sizes = [2, 32], strides = [1, 1]} : vector<2x64xf32> to vector<2x32xf32>
    %855 = vector.extract_strided_slice %843 {offsets = [0, 32], sizes = [2, 32], strides = [1, 1]} : vector<2x64xf32> to vector<2x32xf32>
    %cst_239 = arith.constant 0.000000e+00 : f32
    %856 = vector.broadcast %cst_239 : f32 to vector<2x32xf32>
    %857 = arith.select %853, %856, %855 : vector<2x32xf32>
    %858 = tpu.concatenate %854, %857 in 1 : vector<2x32xf32>, vector<2x32xf32> -> vector<2x64xf32>
    %859 = vector.extract_strided_slice %844 {offsets = [0, 0], sizes = [2, 32], strides = [1, 1]} : vector<2x64xf32> to vector<2x32xf32>
    %860 = vector.extract_strided_slice %844 {offsets = [0, 32], sizes = [2, 32], strides = [1, 1]} : vector<2x64xf32> to vector<2x32xf32>
    %cst_240 = arith.constant 0.000000e+00 : f32
    %861 = vector.broadcast %cst_240 : f32 to vector<2x32xf32>
    %862 = arith.select %853, %861, %860 : vector<2x32xf32>
    %863 = tpu.concatenate %859, %862 in 1 : vector<2x32xf32>, vector<2x32xf32> -> vector<2x64xf32>
    %cst_241 = arith.constant dense<0.000000e+00> : vector<2x256xf32>
    %864 = tpu.matmul %858, %17, %cst_241 {dimension_numbers = #tpu.dot_dimension_numbers<[1], [0], [0], [1], [0, 0, 1, 1], [], []>} : vector<2x64xf32>, vector<64x256xf32>, vector<2x256xf32> -> vector<2x256xf32>
    %c2_i32_242 = arith.constant 2 : i32
    %865 = arith.muli %c7_i32_233, %c2_i32_242 : i32
    %866 = arith.index_cast %865 : i32 to index
    %c0_243 = arith.constant 0 : index
    %867 = vector.load %arg13[%866, %c0_243] : memref<16x128xf32, #tpu.memory_space<vmem>>, vector<2x128xf32>
    %868 = vector.extract_strided_slice %864 {offsets = [0, 0], sizes = [2, 128], strides = [1, 1]} : vector<2x256xf32> to vector<2x128xf32>
    %869 = arith.addf %867, %868 : vector<2x128xf32>
    %c7_i32_244 = arith.constant 7 : i32
    %870 = arith.subi %c7_i32_244, %c7_i32_233 : i32
    %c2_i32_245 = arith.constant 2 : i32
    %871 = arith.muli %870, %c2_i32_245 : i32
    %872 = arith.index_cast %871 : i32 to index
    %c0_246 = arith.constant 0 : index
    %873 = vector.load %arg14[%872, %c0_246] : memref<16x128xf32, #tpu.memory_space<vmem>>, vector<2x128xf32>
    %874 = vector.extract_strided_slice %864 {offsets = [0, 128], sizes = [2, 128], strides = [1, 1]} : vector<2x256xf32> to vector<2x128xf32>
    %875 = arith.addf %873, %874 : vector<2x128xf32>
    %876 = vector.extract_strided_slice %863 {offsets = [0, 0], sizes = [2, 32], strides = [1, 1]} : vector<2x64xf32> to vector<2x32xf32>
    %877 = vector.extract_strided_slice %869 {offsets = [0, 0], sizes = [2, 32], strides = [1, 1]} : vector<2x128xf32> to vector<2x32xf32>
    %878 = arith.negf %877 : vector<2x32xf32>
    %879 = math.exp %878 : vector<2x32xf32>
    %cst_247 = arith.constant 1.000000e+00 : f32
    %880 = vector.broadcast %cst_247 : f32 to vector<2x32xf32>
    %881 = arith.addf %880, %879 : vector<2x32xf32>
    %882 = arith.divf %880, %881 : vector<2x32xf32>
    %883 = vector.extract_strided_slice %869 {offsets = [0, 32], sizes = [2, 32], strides = [1, 1]} : vector<2x128xf32> to vector<2x32xf32>
    %884 = arith.negf %883 : vector<2x32xf32>
    %885 = math.exp %884 : vector<2x32xf32>
    %cst_248 = arith.constant 1.000000e+00 : f32
    %886 = vector.broadcast %cst_248 : f32 to vector<2x32xf32>
    %887 = arith.addf %886, %885 : vector<2x32xf32>
    %888 = arith.divf %886, %887 : vector<2x32xf32>
    %889 = vector.extract_strided_slice %869 {offsets = [0, 64], sizes = [2, 32], strides = [1, 1]} : vector<2x128xf32> to vector<2x32xf32>
    %890 = math.tanh %889 : vector<2x32xf32>
    %891 = vector.extract_strided_slice %869 {offsets = [0, 96], sizes = [2, 32], strides = [1, 1]} : vector<2x128xf32> to vector<2x32xf32>
    %892 = arith.negf %891 : vector<2x32xf32>
    %893 = math.exp %892 : vector<2x32xf32>
    %cst_249 = arith.constant 1.000000e+00 : f32
    %894 = vector.broadcast %cst_249 : f32 to vector<2x32xf32>
    %895 = arith.addf %894, %893 : vector<2x32xf32>
    %896 = arith.divf %894, %895 : vector<2x32xf32>
    %897 = arith.mulf %888, %876 : vector<2x32xf32>
    %898 = arith.mulf %882, %890 : vector<2x32xf32>
    %899 = arith.addf %897, %898 : vector<2x32xf32>
    %900 = math.tanh %899 : vector<2x32xf32>
    %901 = arith.mulf %896, %900 : vector<2x32xf32>
    %902 = vector.extract_strided_slice %863 {offsets = [0, 32], sizes = [2, 32], strides = [1, 1]} : vector<2x64xf32> to vector<2x32xf32>
    %903 = vector.extract_strided_slice %875 {offsets = [0, 0], sizes = [2, 32], strides = [1, 1]} : vector<2x128xf32> to vector<2x32xf32>
    %904 = arith.negf %903 : vector<2x32xf32>
    %905 = math.exp %904 : vector<2x32xf32>
    %cst_250 = arith.constant 1.000000e+00 : f32
    %906 = vector.broadcast %cst_250 : f32 to vector<2x32xf32>
    %907 = arith.addf %906, %905 : vector<2x32xf32>
    %908 = arith.divf %906, %907 : vector<2x32xf32>
    %909 = vector.extract_strided_slice %875 {offsets = [0, 32], sizes = [2, 32], strides = [1, 1]} : vector<2x128xf32> to vector<2x32xf32>
    %910 = arith.negf %909 : vector<2x32xf32>
    %911 = math.exp %910 : vector<2x32xf32>
    %cst_251 = arith.constant 1.000000e+00 : f32
    %912 = vector.broadcast %cst_251 : f32 to vector<2x32xf32>
    %913 = arith.addf %912, %911 : vector<2x32xf32>
    %914 = arith.divf %912, %913 : vector<2x32xf32>
    %915 = vector.extract_strided_slice %875 {offsets = [0, 64], sizes = [2, 32], strides = [1, 1]} : vector<2x128xf32> to vector<2x32xf32>
    %916 = math.tanh %915 : vector<2x32xf32>
    %917 = vector.extract_strided_slice %875 {offsets = [0, 96], sizes = [2, 32], strides = [1, 1]} : vector<2x128xf32> to vector<2x32xf32>
    %918 = arith.negf %917 : vector<2x32xf32>
    %919 = math.exp %918 : vector<2x32xf32>
    %cst_252 = arith.constant 1.000000e+00 : f32
    %920 = vector.broadcast %cst_252 : f32 to vector<2x32xf32>
    %921 = arith.addf %920, %919 : vector<2x32xf32>
    %922 = arith.divf %920, %921 : vector<2x32xf32>
    %923 = arith.mulf %914, %902 : vector<2x32xf32>
    %924 = arith.mulf %908, %916 : vector<2x32xf32>
    %925 = arith.addf %923, %924 : vector<2x32xf32>
    %926 = math.tanh %925 : vector<2x32xf32>
    %927 = arith.mulf %922, %926 : vector<2x32xf32>
    %c2_i32_253 = arith.constant 2 : i32
    %928 = arith.muli %c7_i32_233, %c2_i32_253 : i32
    %929 = arith.index_cast %928 : i32 to index
    %c0_254 = arith.constant 0 : index
    %930 = vector.load %arg8[%929, %c0_254] : memref<16x32xf32, #tpu.memory_space<vmem>>, vector<2x32xf32>
    tpu.vector_store %arg8[%929, %c0_254], %901 {strides = array<i32>} : memref<16x32xf32, #tpu.memory_space<vmem>>, vector<2x32xf32>,
    %c7_i32_255 = arith.constant 7 : i32
    %931 = arith.subi %c7_i32_255, %c7_i32_233 : i32
    %c2_i32_256 = arith.constant 2 : i32
    %932 = arith.muli %931, %c2_i32_256 : i32
    %933 = arith.index_cast %932 : i32 to index
    %c0_257 = arith.constant 0 : index
    %934 = vector.load %arg9[%933, %c0_257] : memref<16x32xf32, #tpu.memory_space<vmem>>, vector<2x32xf32>
    tpu.vector_store %arg9[%933, %c0_257], %927 {strides = array<i32>} : memref<16x32xf32, #tpu.memory_space<vmem>>, vector<2x32xf32>,
    %c8_i32_258 = arith.constant 8 : i32
    %935 = arith.cmpi slt, %848, %c8_i32_258 : i32
    %936 = arith.extui %935 : i1 to i32
    %937 = arith.sitofp %936 : i32 to f32
    %c8_i32_259 = arith.constant 8 : i32
    %938 = arith.cmpi slt, %852, %c8_i32_259 : i32
    %939 = arith.extui %938 : i1 to i32
    %940 = arith.sitofp %939 : i32 to f32
    %cst_260 = arith.constant dense<0.000000e+00> : vector<32xf32>
    %941 = vector.multi_reduction <add>, %901, %cst_260 [0] : vector<2x32xf32> to vector<32xf32>
    %942 = vector.shape_cast %941 : vector<32xf32> to vector<1x32xf32>
    %943 = vector.broadcast %937 : f32 to vector<1x32xf32>
    %944 = arith.mulf %943, %942 : vector<1x32xf32>
    %cst_261 = arith.constant dense<0.000000e+00> : vector<32xf32>
    %945 = vector.multi_reduction <add>, %927, %cst_261 [0] : vector<2x32xf32> to vector<32xf32>
    %946 = vector.shape_cast %945 : vector<32xf32> to vector<1x32xf32>
    %947 = vector.broadcast %940 : f32 to vector<1x32xf32>
    %948 = arith.mulf %947, %946 : vector<1x32xf32>
    %949 = tpu.concatenate %944, %948 in 1 : vector<1x32xf32>, vector<1x32xf32> -> vector<1x64xf32>
    %950 = arith.mulf %901, %901 : vector<2x32xf32>
    %cst_262 = arith.constant dense<0.000000e+00> : vector<32xf32>
    %951 = vector.multi_reduction <add>, %950, %cst_262 [0] : vector<2x32xf32> to vector<32xf32>
    %952 = vector.shape_cast %951 : vector<32xf32> to vector<1x32xf32>
    %953 = vector.broadcast %937 : f32 to vector<1x32xf32>
    %954 = arith.mulf %953, %952 : vector<1x32xf32>
    %955 = arith.mulf %927, %927 : vector<2x32xf32>
    %cst_263 = arith.constant dense<0.000000e+00> : vector<32xf32>
    %956 = vector.multi_reduction <add>, %955, %cst_263 [0] : vector<2x32xf32> to vector<32xf32>
    %957 = vector.shape_cast %956 : vector<32xf32> to vector<1x32xf32>
    %958 = vector.broadcast %940 : f32 to vector<1x32xf32>
    %959 = arith.mulf %958, %957 : vector<1x32xf32>
    %960 = tpu.concatenate %954, %959 in 1 : vector<1x32xf32>, vector<1x32xf32> -> vector<1x64xf32>
    %961 = tpu.concatenate %901, %927 in 1 : vector<2x32xf32>, vector<2x32xf32> -> vector<2x64xf32>
    %962 = tpu.concatenate %899, %925 in 1 : vector<2x32xf32>, vector<2x32xf32> -> vector<2x64xf32>
    %963 = arith.addf %845, %949 : vector<1x64xf32>
    %964 = arith.addf %846, %960 : vector<1x64xf32>
    %c8_i32_264 = arith.constant 8 : i32
    %c0_265 = arith.constant 0 : index
    %c0_266 = arith.constant 0 : index
    %965 = vector.load %arg11[%c0_265, %c0_266] : memref<2x64xf32, #tpu.memory_space<vmem>>, vector<2x64xf32>
    tpu.vector_store %arg11[%c0_265, %c0_266], %961 {strides = array<i32>} : memref<2x64xf32, #tpu.memory_space<vmem>>, vector<2x64xf32>,
    %c0_267 = arith.constant 0 : index
    %c0_268 = arith.constant 0 : index
    %966 = vector.load %arg12[%c0_267, %c0_268] : memref<2x64xf32, #tpu.memory_space<vmem>>, vector<2x64xf32>
    tpu.vector_store %arg12[%c0_267, %c0_268], %962 {strides = array<i32>} : memref<2x64xf32, #tpu.memory_space<vmem>>, vector<2x64xf32>,
    %c0_269 = arith.constant 0 : index
    %c0_270 = arith.constant 0 : index
    %967 = vector.load %arg10[%c0_269, %c0_270] : memref<2x64xf32, #tpu.memory_space<vmem>>, vector<1x64xf32>
    %968 = arith.addf %967, %963 : vector<1x64xf32>
    %c0_271 = arith.constant 0 : index
    %c0_272 = arith.constant 0 : index
    %969 = vector.load %arg10[%c0_271, %c0_272] : memref<2x64xf32, #tpu.memory_space<vmem>>, vector<1x64xf32>
    tpu.vector_store %arg10[%c0_271, %c0_272], %968 {strides = array<i32>} : memref<2x64xf32, #tpu.memory_space<vmem>>, vector<1x64xf32>,
    %c1 = arith.constant 1 : index
    %c0_273 = arith.constant 0 : index
    %970 = vector.load %arg10[%c1, %c0_273] : memref<2x64xf32, #tpu.memory_space<vmem>>, vector<1x64xf32>
    %971 = arith.addf %970, %964 : vector<1x64xf32>
    %c1_274 = arith.constant 1 : index
    %c0_275 = arith.constant 0 : index
    %972 = vector.load %arg10[%c1_274, %c0_275] : memref<2x64xf32, #tpu.memory_space<vmem>>, vector<1x64xf32>
    tpu.vector_store %arg10[%c1_274, %c0_275], %971 {strides = array<i32>} : memref<2x64xf32, #tpu.memory_space<vmem>>, vector<1x64xf32>,
    return
  }
  func.func @transform_0(%arg0: i32) -> (i32, i32) {
    %c0_i32 = arith.constant 0 : i32
    %c0_i32_0 = arith.constant 0 : i32
    return %arg0, %c0_i32 : i32, i32
  }
  func.func @transform_1(%arg0: i32) -> (i32, i32) {
    %c0_i32 = arith.constant 0 : i32
    %0 = arith.subi %c0_i32, %arg0 : i32
    %c0_i32_0 = arith.constant 0 : i32
    %c0_i32_1 = arith.constant 0 : i32
    return %0, %c0_i32_0 : i32, i32
  }
  func.func @transform_2(%arg0: i32) -> (i32, i32) {
    %c0_i32 = arith.constant 0 : i32
    %c0_i32_0 = arith.constant 0 : i32
    %c0_i32_1 = arith.constant 0 : i32
    return %c0_i32, %c0_i32_0 : i32, i32
  }
  func.func @transform_3(%arg0: i32) -> (i32, i32) {
    %c0_i32 = arith.constant 0 : i32
    %c0_i32_0 = arith.constant 0 : i32
    %c0_i32_1 = arith.constant 0 : i32
    return %c0_i32, %c0_i32_0 : i32, i32
  }
  func.func @transform_4(%arg0: i32) -> (i32, i32) {
    %c0_i32 = arith.constant 0 : i32
    %c0_i32_0 = arith.constant 0 : i32
    %c0_i32_1 = arith.constant 0 : i32
    return %c0_i32, %c0_i32_0 : i32, i32
  }
  func.func @transform_5(%arg0: i32) -> (i32, i32) {
    %c0_i32 = arith.constant 0 : i32
    %c0_i32_0 = arith.constant 0 : i32
    %c0_i32_1 = arith.constant 0 : i32
    return %c0_i32, %c0_i32_0 : i32, i32
  }
  func.func @transform_6(%arg0: i32) -> (i32, i32) {
    %c0_i32 = arith.constant 0 : i32
    %c0_i32_0 = arith.constant 0 : i32
    %c0_i32_1 = arith.constant 0 : i32
    return %c0_i32, %c0_i32_0 : i32, i32
  }
  func.func @transform_7(%arg0: i32) -> (i32, i32) {
    %c0_i32 = arith.constant 0 : i32
    %c0_i32_0 = arith.constant 0 : i32
    return %arg0, %c0_i32 : i32, i32
  }
  func.func @transform_8(%arg0: i32) -> (i32, i32) {
    %c0_i32 = arith.constant 0 : i32
    %0 = arith.subi %c0_i32, %arg0 : i32
    %c0_i32_0 = arith.constant 0 : i32
    %c0_i32_1 = arith.constant 0 : i32
    return %0, %c0_i32_0 : i32, i32
  }
  func.func @transform_9(%arg0: i32) -> (i32, i32) {
    %c0_i32 = arith.constant 0 : i32
    %c0_i32_0 = arith.constant 0 : i32
    %c0_i32_1 = arith.constant 0 : i32
    return %c0_i32, %c0_i32_0 : i32, i32
  }
}

</mosaic_0001>

<bundles_post_ra>
// kernel: tpu_custom_call.1
= control target key start
LH: loop header
LB: loop body
LE: loop exit
PB: predicated region body
PF: predicated region fallthrough
CT: control target
= control target key end

     0   :  { %15 = vsyncpa [#allocation7], 0  ;;  %s3318_s0 = inlined_call_operand.hbm [shape: f32[16,16], index: 0, kind: input, shape index: {}]   ;;  %s3319_s1 = inlined_call_operand.hbm [shape: f32[16,16], index: 1, kind: input, shape index: {}]   ;;  %s3320_s2 = inlined_call_operand.hbm [shape: f32[16,128], index: 2, kind: input, shape index: {}]   ;;  %s3321_s3 = inlined_call_operand.hbm [shape: f32[16,128], index: 3, kind: input, shape index: {}]   ;;  %s3322_s4 = inlined_call_operand.vmem [shape: f32[1,128], index: 4, kind: input, shape index: {}]   ;;  %s3323_s5 = inlined_call_operand.vmem [shape: f32[1,128], index: 5, kind: input, shape index: {}]   ;;  %s3324_s6 = inlined_call_operand.hbm [shape: f32[64,256], index: 6, kind: input, shape index: {}]   ;;  %s3325_s7 = inlined_call_operand.hbm [shape: f32[16,32], index: 7, kind: output, shape index: {0}]   ;;  %s3326_s8 = inlined_call_operand.hbm [shape: f32[16,32], index: 8, kind: output, shape index: {1}]   ;;  %s3327_s9 = inlined_call_operand.hbm [shape: f32[2,64], index: 9, kind: output, shape index: {2}]  }
   0x1   :  { %16 = vsyncpa [#allocation10], 0 }
   0x2   :  { %17 = vsyncpa [#allocation13], 0 }
   0x3   :  { %18 = vsyncpa [#allocation8], 0 }
   0x4   :  { %19 = vsyncpa [#allocation17], 0  ;;  %s2679_s30 = smov [#allocation9]   ;;  %s2680_s11 = smov [#allocation12]  }
   0x5   :  { %s41_s10 = sshll.u32 %s2679_s30, 4  ;;  %s65_s12 = sshll.u32 %s2680_s11, 4  ;;  %s42_s10 = int_to_ptr.vmem [resolvable:$true] %s41_s10  ;;  %s2745_s12 = int_to_ptr.vmem [resolvable:$true] %s65_s12 }
   0x6   :  { %s2493_s15 = scalar_lea.hbm %s3319_s1, 256 }
   0x7   :  { %p2494_p0 = scmp.ne.s32.totalorder %s3319_s1, %s2493_s15  ;;  %p2497_p1 = scmp.lt.u32.totalorder %s2493_s15, %s3319_s1 }
   0x9   :  { %p2499_p2 = pnand %p2497_p1, %p2494_p0 }
   0xb   :  { %2502 = shalt.err (!%p2499_p2)
}
   0xc   :  { %s2503_s20 = scalar_lea.vmem %s42_s10, 256  ;;  %p2508_p4 = scmp.lt.s32.totalorder %s42_s10, %s42_s10 }
   0xd   :  { %p2504_p3 = scmp.ne.s32.totalorder %s42_s10, %s2503_s20  ;;  %p2509_p5 = scmp.lt.s32.totalorder %s2503_s20, %s2503_s20 }
   0xf   :  { %p2510_p6 = por %p2509_p5, %p2508_p4 }
  0x11   :  { %p2511_p7 = pnand %p2510_p6, %p2504_p3 }
  0x13   :  { %2514 = shalt.err (!%p2511_p7)
}
  0x14   :  { %s2681_s21 = smov 128   ;;  %s2682_s22 = smov 8  }
  0x15   :  { %47 = dma.hbm_to_vmem [thread:$0]  %s3319_s1, 256, %s42_s10, [#allocation10], %s2681_s21, %s2681_s21, %s2682_s22  }
  0x16   :  { %s2515_s27 = scalar_lea.hbm %s3321_s3, 256 }
  0x17   :  { %p2516_p8 = scmp.ne.s32.totalorder %s3321_s3, %s2515_s27  ;;  %p2519_p9 = scmp.lt.u32.totalorder %s2515_s27, %s3321_s3 }
  0x19   :  { %p2521_p10 = pnand %p2519_p9, %p2516_p8 }
  0x1b   :  { %2524 = shalt.err (!%p2521_p10)
}
  0x1c   :  { %s2525_s13 = scalar_lea.vmem %s2745_s12, 256  ;;  %p2530_p12 = scmp.lt.s32.totalorder %s2745_s12, %s2745_s12 }
  0x1d   :  { %p2526_p11 = scmp.ne.s32.totalorder %s2745_s12, %s2525_s13  ;;  %p2531_p13 = scmp.lt.s32.totalorder %s2525_s13, %s2525_s13 }
  0x1f   :  { %p2532_p0 = por %p2531_p13, %p2530_p12 }
  0x21   :  { %p2533_p1 = pnand %p2532_p0, %p2526_p11 }
  0x23   :  { %2536 = shalt.err (!%p2533_p1)
}
  0x24   :  { %71 = dma.hbm_to_vmem [thread:$0]  %s3321_s3, 256, %s2745_s12, [#allocation13], %s2681_s21, %s2681_s21, %s2682_s22  }
  0x25   :  { %s2683_s14 = smov [#allocation6]   ;;  %s2684_s16 = smov [#allocation11]  }
  0x26   :  { %s25_s15 = sshll.u32 %s2683_s14, 4  ;;  %s53_s17 = sshll.u32 %s2684_s16, 4  ;;  %s26_s15 = int_to_ptr.vmem [resolvable:$true] %s25_s15  ;;  %s2782_s17 = int_to_ptr.vmem [resolvable:$true] %s53_s17 }
  0x27   :  { %s2537_s20 = scalar_lea.hbm %s3318_s0, 256 }
  0x28   :  { %p2538_p2 = scmp.ne.s32.totalorder %s3318_s0, %s2537_s20  ;;  %p2541_p3 = scmp.lt.u32.totalorder %s2537_s20, %s3318_s0 }
  0x2a   :  { %p2543_p4 = pnand %p2541_p3, %p2538_p2 }
  0x2c   :  { %2546 = shalt.err (!%p2543_p4)
}
  0x2d   :  { %s2547_s3 = scalar_lea.vmem %s26_s15, 256  ;;  %p2552_p6 = scmp.lt.s32.totalorder %s26_s15, %s26_s15 }
  0x2e   :  { %p2548_p5 = scmp.ne.s32.totalorder %s26_s15, %s2547_s3  ;;  %p2553_p7 = scmp.lt.s32.totalorder %s2547_s3, %s2547_s3 }
  0x30   :  { %p2554_p8 = por %p2553_p7, %p2552_p6 }
  0x32   :  { %p2555_p9 = pnand %p2554_p8, %p2548_p5 }
  0x34   :  { %2558 = shalt.err (!%p2555_p9)
}
  0x35   :  { %31 = dma.hbm_to_vmem [thread:$0]  %s3318_s0, 256, %s26_s15, [#allocation7], %s2681_s21, %s2681_s21, %s2682_s22  }
  0x36   :  { %s2559_s30 = scalar_lea.hbm %s3320_s2, 256 }
  0x37   :  { %p2560_p10 = scmp.ne.s32.totalorder %s3320_s2, %s2559_s30  ;;  %p2563_p11 = scmp.lt.u32.totalorder %s2559_s30, %s3320_s2 }
  0x39   :  { %p2565_p12 = pnand %p2563_p11, %p2560_p10 }
  0x3b   :  { %2568 = shalt.err (!%p2565_p12)
}
  0x3c   :  { %s2569_s14 = scalar_lea.vmem %s2782_s17, 256  ;;  %p2574_p0 = scmp.lt.s32.totalorder %s2782_s17, %s2782_s17 }
  0x3d   :  { %p2570_p13 = scmp.ne.s32.totalorder %s2782_s17, %s2569_s14  ;;  %p2575_p1 = scmp.lt.s32.totalorder %s2569_s14, %s2569_s14 }
  0x3f   :  { %p2576_p2 = por %p2575_p1, %p2574_p0 }
  0x41   :  { %p2577_p3 = pnand %p2576_p2, %p2570_p13 }
  0x43   :  { %2580 = shalt.err (!%p2577_p3)
}
  0x44   :  { %59 = dma.hbm_to_vmem [thread:$0]  %s3320_s2, 256, %s2782_s17, [#allocation10], %s2681_s21, %s2681_s21, %s2682_s22  }
  0x45   :  { %s2685_s16 = smov [#allocation14]   ;;  %s2581_s23 = scalar_lea.hbm %s3324_s6, 2048 }
  0x46   :  { %s81_s18 = sshll.u32 %s2685_s16, 4  ;;  %p2582_p4 = scmp.ne.s32.totalorder %s3324_s6, %s2581_s23  ;;  %s82_s18 = int_to_ptr.vmem [resolvable:$true] %s81_s18 }
  0x47   :  { %p2585_p5 = scmp.lt.u32.totalorder %s2581_s23, %s3324_s6 }
  0x49   :  { %p2587_p6 = pnand %p2585_p5, %p2582_p4 }
  0x4b   :  { %2590 = shalt.err (!%p2587_p6)
}
  0x4c   :  { %s2591_s12 = scalar_lea.vmem %s82_s18, 2048  ;;  %p2596_p8 = scmp.lt.s32.totalorder %s82_s18, %s82_s18 }
  0x4d   :  { %p2592_p7 = scmp.ne.s32.totalorder %s82_s18, %s2591_s12  ;;  %p2597_p9 = scmp.lt.s32.totalorder %s2591_s12, %s2591_s12 }
  0x4f   :  { %p2598_p10 = por %p2597_p9, %p2596_p8 }
  0x51   :  { %p2599_p11 = pnand %p2598_p10, %p2592_p7 }
  0x53   :  { %2602 = shalt.err (!%p2599_p11)
}
  0x54   :  { %s2686_s2 = smov 256   ;;  %s2687_s17 = smov 16  }
  0x55   :  { %87 = dma.hbm_to_vmem [thread:$0]  %s3324_s6, 2048, %s82_s18, [#allocation13], %s2686_s2, %s2686_s2, %s2687_s17  }
  0x56   :  { %2669 = dma.done.wait [#allocation7], 256  }
  0x57   :  { %2670 = vsyncadd [#allocation7], 4294967040 }
  0x58   :  { %2671 = dma.done.wait [#allocation10], 512  }
  0x59   :  { %2672 = vsyncadd [#allocation10], 4294966784 }
  0x5a   :  { %2673 = dma.done.wait [#allocation13], 2304  }
  0x5b   :  { %2674 = vsyncadd [#allocation13], 4294964992  ;;  %vm111_vm0 = vcmask 517120   ;;  %v2688_v0 = vmov 0.0   ;;  %vm126_vm1 = vcmask 130048   ;;  %v117_v1 = vld [vmem:[#allocation11] sm:$0xff] }
  0x5c   :  { %112 = vst.msk [vmem:[#allocation2] sm:$0x3] %vm111_vm0, %v2688_v0  ;;  %113 = vst.msk [vmem:[#allocation3] sm:$0x3] %vm111_vm0, %v2688_v0  ;;  %v118_v2 = vld [vmem:[#allocation11 + $0x8] sm:$0xff]  ;;  %v115_v3 = vld [vmem:[#allocation6] sm:$0xff] }
  0x5d   :  { %114 = vst.msk [vmem:[#allocation18] sm:$0x3] %vm111_vm0, %v2688_v0  ;;  %v2213_v4 = vpack.c.bf16 %v118_v2, %v117_v1  ;;  %2203 = vmatprep.mubr.msk.f32.mxu0 %vm126_vm1, %v115_v3  ;;  %v305_v5 = vld [vmem:[#allocation14 + $0x8] sm:$0xff]  ;;  %v307_v6 = vld [vmem:[#allocation14 + $0x18] sm:$0xff]  ;;  %v304_v8 = vld [vmem:[#allocation14] sm:$0xff]  ;;  %vm331_vm2 = vcmask 261120  }
  0x5e   :  { %v2838_v7 = vpack.c.bf16 %v307_v6, %v305_v5  ;;  %v306_v9 = vld [vmem:[#allocation14 + $0x10] sm:$0xff]  ;;  %v213_v11 = vld [vmem:[#allocation12 + $0x8] sm:$0xff]  ;;  %v309_v12 = vld [vmem:[#allocation14 + $0x28] sm:$0xff]  ;;  %s2689_s6 = smov 32   ;;  %vm335_vm3 = vcmask 523264   ;;  %vm470_vm4 = vcmask 254976  }
  0x5f   :  { %v212_v10 = vld [vmem:[#allocation12] sm:$0xff]  ;;  %2214 = vmatprep.subr.bf16.mxu0 %v2213_v4  ;;  %v311_v13 = vld [vmem:[#allocation14 + $0x38] sm:$0xff]  ;;  %v116_v14 = vld [vmem:[#allocation6 + $0x8] sm:$0xff]  ;;  %v2840_v15 = vpack.c.bf16 %v306_v9, %v304_v8  ;;  %vm483_vm5 = vcmask 1042176   ;;  %s2692_s1 = smov [#allocation16]   ;;  %vm2100_vm6 = vcmask 516096  }
  0x60   :  { %2216 = vmatpush3.bf16.msra.mxu0 %v2213_v4  ;;  %v2217_v16 = vpack.c.bf16 %v213_v11, %v212_v10  ;;  %v210_v17 = vld [vmem:[#allocation9] sm:$0xff]  ;;  %v2843_v18 = vpack.c.bf16 %v311_v13, %v309_v12  ;;  %v308_v19 = vld [vmem:[#allocation14 + $0x20] sm:$0xff]  ;;  %v313_v21 = vld [vmem:[#allocation14 + $0x48] sm:$0xff]  ;;  %s2126_s10 = sshll.u32 %s2692_s1, 4  ;;  %s2693_s14 = smov [#allocation15]   ;;  %s2127_s10 = int_to_ptr.vmem [resolvable:$true] %s2126_s10 }
  0x61   :  { %2222 = vmatprep.subr.bf16.mxu0 %v2838_v7  ;;  %v310_v20 = vld [vmem:[#allocation14 + $0x30] sm:$0xff]  ;;  %2210 = vmatprep.mubr.msk.f32.mxu1 %vm126_vm1, %v210_v17  ;;  %v315_v22 = vld [vmem:[#allocation14 + $0x58] sm:$0xff]  ;;  %v312_v27 = vld [vmem:[#allocation14 + $0x40] sm:$0xff]  ;;  %s2110_s0 = sshll.u32 %s2693_s14, 4  ;;  %s2694_s15 = smov [#allocation18]   ;;  %s3254_s0 = int_to_ptr.vmem [resolvable:$true] %s2110_s0 }
  0x62   :  { %2218 = vmatprep.subr.bf16.mxu1 %v2217_v16  ;;  %v211_v23 = vld [vmem:[#allocation9 + $0x8] sm:$0xff]  ;;  %v2848_v24 = vpack.c.bf16 %v310_v20, %v308_v19  ;;  %v2852_v26 = vpack.c.bf16 %v315_v22, %v313_v21  ;;  %v314_v28 = vld [vmem:[#allocation14 + $0x50] sm:$0xff]  ;;  %v317_v30 = vld [vmem:[#allocation14 + $0x68] sm:$0xff]  ;;  %s2139_s16 = sshll.u32 %s2694_s15, 4  ;;  %s2603_s18 = scalar_lea.vmem %s2127_s10, 256  ;;  %s3257_s16 = int_to_ptr.vmem [resolvable:$true] %s2139_s16 }
  0x63   :  { %2204 = vmatmul.mubr.msk.f32.vlgmr.msra.gmra.mrb[0].mxu0 %vm126_vm1, %v116_v14  ;;  %2220 = vmatpush3.bf16.msra.mxu1 %v2217_v16  ;;  %v321_v25 = vld [vmem:[#allocation3] sm:$0x3]  ;;  %v2864_v32 = vpack.c.bf16 %v314_v28, %v312_v27  ;;  %v316_v34 = vld [vmem:[#allocation14 + $0x60] sm:$0xff]  ;;  %v318_v35 = vld [vmem:[#allocation14 + $0x70] sm:$0xff]  ;;  %p2604_p12 = scmp.ne.s32.totalorder %s2127_s10, %s2603_s18  ;;  %p2608_p13 = scmp.lt.s32.totalorder %s2127_s10, %s2127_s10 }
  0x64   :  { %2224 = vmatpush1.bf16.msra.mxu0 %v2840_v15  ;;  %403 = vmatprep.mubr.f32.mxu0 %v2688_v0  ;;  %v2855_v29 = vsel %vm331_vm2, %v321_v25, 0.0  ;;  %v319_v31 = vld [vmem:[#allocation14 + $0x78] sm:$0xff]  ;;  %v2872_v36 = vpack.c.bf16 %v318_v35, %v316_v34  ;;  %p2609_p0 = scmp.lt.s32.totalorder %s2603_s18, %s2603_s18 }
  0x65   :  { %2226 = vmatprep.subr.bf16.mxu0 %v2843_v18  ;;  %2238 = vmatprep.subr.bf16.mxu1 %v2838_v7  ;;  %v2868_v33 = vpack.c.bf16 %v319_v31, %v317_v30  ;;  %v320_v37 = vld [vmem:[#allocation2] sm:$0x3] }
  0x66   :  { %2211 = vmatmul.mubr.msk.f32.vlgmr.msra.gmra.mrb[0].mxu1 %vm126_vm1, %v211_v23  ;;  %422 = vrot.lane.b32.xlu1 %v2855_v29, %s2689_s6  ;;  %v332_v38 = vsel %vm331_vm2, %v320_v37, 0.0  ;;  %v2161_v39 = vld [vmem:[%s3322_s4] ss:$0 sm:$0xff]  ;;  %s2690_s4 = smov 64   ;;  %p2610_p1 = por %p2609_p0, %p2608_p13 }
  0x67   :  { %2240 = vmatpush1.bf16.msra.mxu1 %v2840_v15  ;;  %626 = vmatprep.mubr.f32.mxu1 %v2688_v0  ;;  %v2164_v43 = vld [vmem:[%s3323_s5] ss:$0 sm:$0xff]  ;;  %s2691_s5 = smov 96  }
  0x68   :  { %2228 = vmatpush1.bf16.msra.mxu0 %v2848_v24  ;;  %2242 = vmatprep.subr.bf16.mxu1 %v2843_v18  ;;  %p2611_p2 = pnand %p2610_p1, %p2604_p12 }
  0x69   :  { %2230 = vmatprep.subr.bf16.mxu0 %v2852_v26 }
  0x6b   :  { %2244 = vmatpush1.bf16.msra.mxu1 %v2848_v24 }
  0x6c   :  { %2232 = vmatpush1.bf16.msra.mxu0 %v2864_v32  ;;  %2246 = vmatprep.subr.bf16.mxu1 %v2852_v26 }
  0x6d   :  { %2234 = vmatprep.subr.bf16.mxu0 %v2868_v33 }
  0x6f   :  { %2248 = vmatpush1.bf16.msra.mxu1 %v2864_v32 }
  0x70   :  { %2236 = vmatpush1.bf16.msra.mxu0 %v2872_v36  ;;  %2250 = vmatprep.subr.bf16.mxu1 %v2868_v33 }
  0x71   :  { %2254 = vmatprep.subr.bf16.mxu0 %v2838_v7 }
  0x73   :  { %2167 = vmatmul.mubr.msk.f32.vlgmr.msra.gmra.mrb[2].mxu0 %vm335_vm3, %v332_v38  ;;  %2252 = vmatpush1.bf16.msra.mxu1 %v2872_v36 }
  0x74   :  { %2256 = vmatpush1.bf16.msra.mxu0 %v2840_v15  ;;  %847 = vmatprep.mubr.f32.mxu0 %v2688_v0 }
  0x75   :  { %2258 = vmatprep.subr.bf16.mxu0 %v2843_v18  ;;  %2270 = vmatprep.subr.bf16.mxu1 %v2838_v7 }
  0x78   :  { %2260 = vmatpush1.bf16.msra.mxu0 %v2848_v24 }
  0x79   :  { %2262 = vmatprep.subr.bf16.mxu0 %v2852_v26 }
  0x7c   :  { %2264 = vmatpush1.bf16.msra.mxu0 %v2864_v32 }
  0x7d   :  { %2266 = vmatprep.subr.bf16.mxu0 %v2868_v33 }
  0x80   :  { %2268 = vmatpush1.bf16.msra.mxu0 %v2872_v36 }
  0x81   :  { %2286 = vmatprep.subr.bf16.mxu0 %v2838_v7 }
  0xd8   :  { %v423_v6 = vpop.permute.xlu1 %422 }
 0x136   :  { %v2205_v40 = vpop.f32.mrb[0].mxu0 }
 0x137   :  { %v205_v41 = vadd.f32 %v2205_v40, %v2161_v39  ;;  %v199_v42 = vpop.f32.mrb[1].mxu0 }
 0x138   :  { %v200_v44 = vadd.f32 %v2161_v39, %v199_v42 }
 0x139   :  { %209 = vst [vmem:[#allocation4 + $0x8] sm:$0xff] %v205_v41  ;;  %v2212_v45 = vpop.f32.mrb[0].mxu1 }
 0x13a   :  { %208 = vst [vmem:[#allocation4] sm:$0xff] %v200_v44  ;;  %v299_v46 = vadd.f32 %v2212_v45, %v2164_v43  ;;  %v293_v47 = vpop.f32.mrb[1].mxu1 }
 0x13b   :  { %v294_v48 = vadd.f32 %v2164_v43, %v293_v47 }
 0x13c   :  { %303 = vst [vmem:[#allocation5 + $0x8] sm:$0xff] %v299_v46 }
 0x13d   :  { %302 = vst [vmem:[#allocation5] sm:$0xff] %v294_v48 }
 0x141   :  { %v410_v50 = vld [vmem:[#allocation4] sm:$0x3]  ;;  %v633_v28 = vld [vmem:[#allocation4 + $0x2] sm:$0x3] }
 0x143   :  { %v412_v51 = vld [vmem:[#allocation5 + $0xe] sm:$0x3]  ;;  %v635_v31 = vld [vmem:[#allocation5 + $0xc] sm:$0x3] }
 0x146   :  { %v405_v49 = vpop.f32.mrb[2].mxu0 }
 0x147   :  { %v411_v52 = vadd.f32 %v410_v50, %v405_v49  ;;  %v407_v53 = vpop.f32.mrb[3].mxu0 }
 0x148   :  { %v413_v54 = vadd.f32 %v412_v51, %v407_v53 }
 0x149   :  { %2365 = vtanh.f32 %v411_v52  ;;  %v2168_v57 = vmul.f32 -1.442695, %v411_v52 }
 0x14a   :  { %2367 = vtanh.f32 %v413_v54  ;;  %v2169_v58 = vmul.f32 -1.442695, %v413_v54 }
 0x14b   :  { %2369 = vpow2.f32 %v2168_v57 }
 0x14c   :  { %2371 = vpow2.f32 %v2169_v58 }
 0x153   :  { %v2366_v55 = vpop.eup %2365 }
 0x154   :  { %427 = vrot.lane.b32.xlu0 %v2366_v55, %s2690_s4  ;;  %v2368_v56 = vpop.eup %2367 }
 0x155   :  { %v2370_v59 = vpop.eup %2369 }
 0x156   :  { %v417_v60 = vadd.f32 1.0, %v2370_v59  ;;  %v2372_v61 = vpop.eup %2371 }
 0x157   :  { %v445_v62 = vadd.f32 1.0, %v2372_v61 }
 0x158   :  { %451 = vrot.lane.b32.xlu0 %v2368_v56, %s2690_s4  ;;  %2373 = vrcp.f32 %v417_v60 }
 0x159   :  { %2375 = vrcp.f32 %v445_v62 }
 0x162   :  { %v2374_v63 = vpop.eup %2373 }
 0x163   :  { %v2376_v3 = vpop.eup %2375  ;;  %v425_v8 = vmul.f32 %v2374_v63, %v423_v6  ;;  %v854_v6 = vld [vmem:[#allocation4 + $0x4] sm:$0x3] }
 0x164   :  { %v449_v11 = vmul.f32 %v2376_v3, %v2855_v29 }
 0x1c6   :  { %v428_v1 = vpop.permute.xlu0 %427 }
 0x1c7   :  { %v430_v2 = vmul.f32 %v2374_v63, %v428_v1 }
 0x1c9   :  { %432 = vrot.lane.b32.xlu1 %v430_v2, %s2689_s6 }
 0x1ca   :  { %v452_v4 = vpop.permute.xlu0 %451 }
 0x1cb   :  { %v454_v5 = vmul.f32 %v2376_v3, %v452_v4 }
 0x1cd   :  { %456 = vrot.lane.b32.xlu0 %v454_v5, %s2689_s6 }
 0x23b   :  { %v433_v9 = vpop.permute.xlu1 %432 }
 0x23c   :  { %v435_v10 = vadd.f32 %v433_v9, %v425_v8 }
 0x23e   :  { %2377 = vtanh.f32 %v435_v10 }
 0x23f   :  { %v457_v12 = vpop.permute.xlu0 %456 }
 0x240   :  { %v459_v13 = vadd.f32 %v457_v12, %v449_v11 }
 0x242   :  { %2379 = vtanh.f32 %v459_v13 }
 0x248   :  { %v2378_v14 = vpop.eup %2377 }
 0x249   :  { %438 = vrot.lane.b32.xlu1 %v2378_v14, %s2690_s4 }
 0x24c   :  { %v2380_v16 = vpop.eup %2379 }
 0x24d   :  { %462 = vrot.lane.b32.xlu0 %v2380_v16, %s2690_s4 }
 0x2bb   :  { %v439_v17 = vpop.permute.xlu1 %438 }
 0x2bc   :  { %v2906_v19 = vmul.f32 %v2374_v63, %v439_v17 }
 0x2be   :  { %467 = vrot.lane.b32.xlu1 %v2906_v19, %s2689_s6 }
 0x2bf   :  { %v463_v20 = vpop.permute.xlu0 %462 }
 0x2c0   :  { %v2910_v21 = vmul.f32 %v2376_v3, %v463_v20 }
 0x2c2   :  { %543 = vrot.lane.b32.xlu1 %v435_v10, %s2691_s5  ;;  %538 = vrot.lane.b32.xlu0 %v2910_v21, %s2690_s4  ;;  %v856_v10 = vld [vmem:[#allocation5 + $0xa] sm:$0x3] }
 0x330   :  { %v468_v22 = vpop.permute.xlu1 %467 }
 0x331   :  { %471 = vst.msk [vmem:[#allocation15] sm:$0x3] %vm470_vm4, %v468_v22 }
 0x334   :  { %v539_v23 = vpop.permute.xlu0 %538  ;;  %v544_v38 = vpop.permute.xlu1 %543 }
 0x335   :  { %v541_v25 = vsel %vm331_vm2, %v468_v22, %v539_v23  ;;  %v546_v39 = vsel %vm331_vm2, %v544_v38, %v459_v13 }
 0x336   :  { %2170 = vmatmul.mubr.msk.f32.vlgmr.msra.gmra.mrb[2].mxu1 %vm335_vm3, %v541_v25 }
 0x337   :  { %2272 = vmatpush1.bf16.msra.mxu1 %v2840_v15  ;;  %1068 = vmatprep.mubr.f32.mxu1 %v2688_v0 }
 0x338   :  { %2274 = vmatprep.subr.bf16.mxu1 %v2843_v18 }
 0x33b   :  { %2276 = vmatpush1.bf16.msra.mxu1 %v2848_v24 }
 0x33c   :  { %2278 = vmatprep.subr.bf16.mxu1 %v2852_v26 }
 0x33f   :  { %2280 = vmatpush1.bf16.msra.mxu1 %v2864_v32 }
 0x340   :  { %2282 = vmatprep.subr.bf16.mxu1 %v2868_v33 }
 0x343   :  { %2284 = vmatpush1.bf16.msra.mxu1 %v2872_v36 }
 0x344   :  { %2302 = vmatprep.subr.bf16.mxu1 %v2838_v7 }
 0x409   :  { %v628_v27 = vpop.f32.mrb[2].mxu1 }
 0x40a   :  { %v634_v29 = vadd.f32 %v633_v28, %v628_v27  ;;  %v630_v30 = vpop.f32.mrb[3].mxu1 }
 0x40b   :  { %v636_v34 = vadd.f32 %v635_v31, %v630_v30 }
 0x40c   :  { %2381 = vtanh.f32 %v634_v29  ;;  %v2171_v40 = vmul.f32 -1.442695, %v634_v29 }
 0x40d   :  { %2383 = vtanh.f32 %v636_v34  ;;  %v2172_v41 = vmul.f32 -1.442695, %v636_v34 }
 0x40e   :  { %2385 = vpow2.f32 %v2171_v40 }
 0x40f   :  { %2387 = vpow2.f32 %v2172_v41 }
 0x416   :  { %v2382_v35 = vpop.eup %2381 }
 0x417   :  { %v2384_v37 = vpop.eup %2383  ;;  %650 = vrot.lane.b32.xlu0 %v2382_v35, %s2690_s4 }
 0x418   :  { %674 = vrot.lane.b32.xlu1 %v2384_v37, %s2690_s4  ;;  %v2386_v42 = vpop.eup %2385 }
 0x419   :  { %v2388_v43 = vpop.eup %2387  ;;  %v640_v44 = vadd.f32 1.0, %v2386_v42 }
 0x41a   :  { %v668_v45 = vadd.f32 1.0, %v2388_v43 }
 0x41b   :  { %645 = vrot.lane.b32.xlu0 %v546_v39, %s2689_s6  ;;  %2389 = vrcp.f32 %v640_v44 }
 0x41c   :  { %2391 = vrcp.f32 %v668_v45 }
 0x425   :  { %v2390_v46 = vpop.eup %2389 }
 0x426   :  { %v2392_v48 = vpop.eup %2391 }
 0x427   :  { %v672_v54 = vmul.f32 %v2392_v48, %v546_v39 }
 0x489   :  { %v651_v47 = vpop.permute.xlu0 %650 }
 0x48a   :  { %v653_v49 = vmul.f32 %v2390_v46, %v651_v47  ;;  %v675_v50 = vpop.permute.xlu1 %674 }
 0x48b   :  { %v677_v51 = vmul.f32 %v2392_v48, %v675_v50 }
 0x48c   :  { %655 = vrot.lane.b32.xlu1 %v653_v49, %s2689_s6 }
 0x48d   :  { %679 = vrot.lane.b32.xlu0 %v677_v51, %s2689_s6  ;;  %v646_v52 = vpop.permute.xlu0 %645 }
 0x48e   :  { %v648_v53 = vmul.f32 %v2390_v46, %v646_v52 }
 0x4fe   :  { %v656_v55 = vpop.permute.xlu1 %655 }
 0x4ff   :  { %v658_v56 = vadd.f32 %v656_v55, %v648_v53  ;;  %v680_v57 = vpop.permute.xlu0 %679 }
 0x500   :  { %v682_v58 = vadd.f32 %v680_v57, %v672_v54  ;;  %v1075_v54 = vld [vmem:[#allocation4 + $0x6] sm:$0x3]  ;;  %v1077_v57 = vld [vmem:[#allocation5 + $0x8] sm:$0x3] }
 0x501   :  { %2393 = vtanh.f32 %v658_v56 }
 0x502   :  { %2395 = vtanh.f32 %v682_v58 }
 0x50b   :  { %v2394_v59 = vpop.eup %2393 }
 0x50c   :  { %v2396_v60 = vpop.eup %2395  ;;  %661 = vrot.lane.b32.xlu1 %v2394_v59, %s2690_s4 }
 0x50d   :  { %685 = vrot.lane.b32.xlu0 %v2396_v60, %s2690_s4 }
 0x57e   :  { %v662_v61 = vpop.permute.xlu1 %661 }
 0x57f   :  { %v2935_v62 = vmul.f32 %v2390_v46, %v662_v61  ;;  %v686_v63 = vpop.permute.xlu0 %685 }
 0x580   :  { %v2937_v1 = vmul.f32 %v2392_v48, %v686_v63 }
 0x581   :  { %690 = vrot.lane.b32.xlu1 %v2935_v62, %s2689_s6 }
 0x582   :  { %759 = vrot.lane.b32.xlu0 %v2937_v1, %s2690_s4 }
 0x585   :  { %764 = vrot.lane.b32.xlu1 %v658_v56, %s2691_s5 }
 0x5f3   :  { %v691_v2 = vpop.permute.xlu1 %690 }
 0x5f4   :  { %693 = vst.msk [vmem:[#allocation15 + $0x2] sm:$0x3] %vm470_vm4, %v691_v2  ;;  %v760_v3 = vpop.permute.xlu0 %759 }
 0x5f5   :  { %v762_v4 = vsel %vm331_vm2, %v691_v2, %v760_v3 }
 0x5f6   :  { %2173 = vmatmul.mubr.msk.f32.vlgmr.msra.gmra.mrb[4].mxu0 %vm335_vm3, %v762_v4 }
 0x5f7   :  { %2288 = vmatpush1.bf16.msra.mxu0 %v2840_v15  ;;  %1289 = vmatprep.mubr.f32.mxu0 %v2688_v0  ;;  %v765_v14 = vpop.permute.xlu1 %764 }
 0x5f8   :  { %2290 = vmatprep.subr.bf16.mxu0 %v2843_v18  ;;  %v767_v16 = vsel %vm331_vm2, %v765_v14, %v682_v58 }
 0x5fb   :  { %2292 = vmatpush1.bf16.msra.mxu0 %v2848_v24 }
 0x5fc   :  { %2294 = vmatprep.subr.bf16.mxu0 %v2852_v26 }
 0x5ff   :  { %2296 = vmatpush1.bf16.msra.mxu0 %v2864_v32 }
 0x600   :  { %2298 = vmatprep.subr.bf16.mxu0 %v2868_v33 }
 0x603   :  { %2300 = vmatpush1.bf16.msra.mxu0 %v2872_v36 }
 0x604   :  { %2318 = vmatprep.subr.bf16.mxu0 %v2838_v7 }
 0x6c9   :  { %v849_v5 = vpop.f32.mrb[4].mxu0 }
 0x6ca   :  { %v855_v8 = vadd.f32 %v854_v6, %v849_v5  ;;  %v851_v9 = vpop.f32.mrb[5].mxu0 }
 0x6cb   :  { %v857_v11 = vadd.f32 %v856_v10, %v851_v9 }
 0x6cc   :  { %2397 = vtanh.f32 %v855_v8  ;;  %v2174_v17 = vmul.f32 -1.442695, %v855_v8 }
 0x6cd   :  { %2399 = vtanh.f32 %v857_v11  ;;  %v2175_v20 = vmul.f32 -1.442695, %v857_v11 }
 0x6ce   :  { %2401 = vpow2.f32 %v2174_v17 }
 0x6cf   :  { %2403 = vpow2.f32 %v2175_v20 }
 0x6d6   :  { %v2398_v12 = vpop.eup %2397 }
 0x6d7   :  { %v2400_v13 = vpop.eup %2399  ;;  %871 = vrot.lane.b32.xlu0 %v2398_v12, %s2690_s4 }
 0x6d8   :  { %895 = vrot.lane.b32.xlu1 %v2400_v13, %s2690_s4  ;;  %v2402_v22 = vpop.eup %2401 }
 0x6d9   :  { %v2404_v23 = vpop.eup %2403  ;;  %v861_v25 = vadd.f32 1.0, %v2402_v22 }
 0x6da   :  { %v889_v27 = vadd.f32 1.0, %v2404_v23 }
 0x6db   :  { %866 = vrot.lane.b32.xlu0 %v767_v16, %s2689_s6  ;;  %2405 = vrcp.f32 %v861_v25 }
 0x6dc   :  { %2407 = vrcp.f32 %v889_v27 }
 0x6e5   :  { %v2406_v28 = vpop.eup %2405 }
 0x6e6   :  { %v2408_v30 = vpop.eup %2407 }
 0x6e7   :  { %v893_v40 = vmul.f32 %v2408_v30, %v767_v16 }
 0x749   :  { %v872_v29 = vpop.permute.xlu0 %871 }
 0x74a   :  { %v874_v31 = vmul.f32 %v2406_v28, %v872_v29  ;;  %v896_v34 = vpop.permute.xlu1 %895 }
 0x74b   :  { %v898_v35 = vmul.f32 %v2408_v30, %v896_v34 }
 0x74c   :  { %876 = vrot.lane.b32.xlu1 %v874_v31, %s2689_s6 }
 0x74d   :  { %900 = vrot.lane.b32.xlu0 %v898_v35, %s2689_s6  ;;  %v867_v37 = vpop.permute.xlu0 %866 }
 0x74e   :  { %v869_v38 = vmul.f32 %v2406_v28, %v867_v37 }
 0x7be   :  { %v877_v39 = vpop.permute.xlu1 %876 }
 0x7bf   :  { %v879_v41 = vadd.f32 %v877_v39, %v869_v38  ;;  %v901_v42 = vpop.permute.xlu0 %900 }
 0x7c0   :  { %v903_v43 = vadd.f32 %v901_v42, %v893_v40  ;;  %v1296_v40 = vld [vmem:[#allocation4 + $0x8] sm:$0x3] }
 0x7c1   :  { %2409 = vtanh.f32 %v879_v41 }
 0x7c2   :  { %2411 = vtanh.f32 %v903_v43 }
 0x7cb   :  { %v2410_v44 = vpop.eup %2409 }
 0x7cc   :  { %v2412_v45 = vpop.eup %2411  ;;  %882 = vrot.lane.b32.xlu1 %v2410_v44, %s2690_s4 }
 0x7cd   :  { %906 = vrot.lane.b32.xlu0 %v2412_v45, %s2690_s4 }
 0x83e   :  { %v883_v46 = vpop.permute.xlu1 %882 }
 0x83f   :  { %v2964_v47 = vmul.f32 %v2406_v28, %v883_v46  ;;  %v907_v48 = vpop.permute.xlu0 %906 }
 0x840   :  { %v2966_v49 = vmul.f32 %v2408_v30, %v907_v48 }
 0x841   :  { %911 = vrot.lane.b32.xlu1 %v2964_v47, %s2689_s6 }
 0x842   :  { %980 = vrot.lane.b32.xlu0 %v2966_v49, %s2690_s4 }
 0x845   :  { %985 = vrot.lane.b32.xlu1 %v879_v41, %s2691_s5 }
 0x8b3   :  { %v912_v50 = vpop.permute.xlu1 %911 }
 0x8b4   :  { %914 = vst.msk [vmem:[#allocation15 + $0x4] sm:$0x3] %vm470_vm4, %v912_v50  ;;  %v981_v51 = vpop.permute.xlu0 %980 }
 0x8b5   :  { %v983_v52 = vsel %vm331_vm2, %v912_v50, %v981_v51 }
 0x8b6   :  { %2176 = vmatmul.mubr.msk.f32.vlgmr.msra.gmra.mrb[4].mxu1 %vm335_vm3, %v983_v52 }
 0x8b7   :  { %2304 = vmatpush1.bf16.msra.mxu1 %v2840_v15  ;;  %1510 = vmatprep.mubr.f32.mxu1 %v2688_v0  ;;  %v986_v61 = vpop.permute.xlu1 %985 }
 0x8b8   :  { %2306 = vmatprep.subr.bf16.mxu1 %v2843_v18  ;;  %v988_v63 = vsel %vm331_vm2, %v986_v61, %v903_v43  ;;  %v1298_v43 = vld [vmem:[#allocation5 + $0x6] sm:$0x3] }
 0x8bb   :  { %2308 = vmatpush1.bf16.msra.mxu1 %v2848_v24 }
 0x8bc   :  { %2310 = vmatprep.subr.bf16.mxu1 %v2852_v26 }
 0x8bf   :  { %2312 = vmatpush1.bf16.msra.mxu1 %v2864_v32 }
 0x8c0   :  { %2314 = vmatprep.subr.bf16.mxu1 %v2868_v33 }
 0x8c3   :  { %2316 = vmatpush1.bf16.msra.mxu1 %v2872_v36 }
 0x8c4   :  { %2334 = vmatprep.subr.bf16.mxu1 %v2838_v7 }
 0x989   :  { %v1070_v53 = vpop.f32.mrb[4].mxu1 }
 0x98a   :  { %v1076_v55 = vadd.f32 %v1075_v54, %v1070_v53  ;;  %v1072_v56 = vpop.f32.mrb[5].mxu1 }
 0x98b   :  { %v1078_v58 = vadd.f32 %v1077_v57, %v1072_v56 }
 0x98c   :  { %2413 = vtanh.f32 %v1076_v55  ;;  %v2177_v7 = vmul.f32 -1.442695, %v1076_v55 }
 0x98d   :  { %2415 = vtanh.f32 %v1078_v58  ;;  %v2178_v2 = vmul.f32 -1.442695, %v1078_v58 }
 0x98e   :  { %2417 = vpow2.f32 %v2177_v7 }
 0x98f   :  { %2419 = vpow2.f32 %v2178_v2 }
 0x996   :  { %v2414_v59 = vpop.eup %2413 }
 0x997   :  { %v2416_v60 = vpop.eup %2415  ;;  %1092 = vrot.lane.b32.xlu0 %v2414_v59, %s2690_s4 }
 0x998   :  { %1116 = vrot.lane.b32.xlu1 %v2416_v60, %s2690_s4  ;;  %v2418_v3 = vpop.eup %2417 }
 0x999   :  { %v2420_v4 = vpop.eup %2419  ;;  %v1082_v5 = vadd.f32 1.0, %v2418_v3 }
 0x99a   :  { %v1110_v6 = vadd.f32 1.0, %v2420_v4 }
 0x99b   :  { %1087 = vrot.lane.b32.xlu0 %v988_v63, %s2689_s6  ;;  %2421 = vrcp.f32 %v1082_v5 }
 0x99c   :  { %2423 = vrcp.f32 %v1110_v6 }
 0x9a5   :  { %v2422_v8 = vpop.eup %2421 }
 0x9a6   :  { %v2424_v10 = vpop.eup %2423 }
 0x9a7   :  { %v1114_v20 = vmul.f32 %v2424_v10, %v988_v63 }
 0xa09   :  { %v1093_v9 = vpop.permute.xlu0 %1092 }
 0xa0a   :  { %v1095_v11 = vmul.f32 %v2422_v8, %v1093_v9  ;;  %v1117_v12 = vpop.permute.xlu1 %1116 }
 0xa0b   :  { %v1119_v13 = vmul.f32 %v2424_v10, %v1117_v12 }
 0xa0c   :  { %1097 = vrot.lane.b32.xlu1 %v1095_v11, %s2689_s6 }
 0xa0d   :  { %1121 = vrot.lane.b32.xlu0 %v1119_v13, %s2689_s6  ;;  %v1088_v14 = vpop.permute.xlu0 %1087 }
 0xa0e   :  { %v1090_v16 = vmul.f32 %v2422_v8, %v1088_v14 }
 0xa7e   :  { %v1098_v17 = vpop.permute.xlu1 %1097 }
 0xa7f   :  { %v1100_v22 = vadd.f32 %v1098_v17, %v1090_v16  ;;  %v1122_v23 = vpop.permute.xlu0 %1121 }
 0xa80   :  { %v1124_v25 = vadd.f32 %v1122_v23, %v1114_v20  ;;  %v1517_v23 = vld [vmem:[#allocation4 + $0xa] sm:$0x3] }
 0xa81   :  { %2425 = vtanh.f32 %v1100_v22 }
 0xa82   :  { %2427 = vtanh.f32 %v1124_v25 }
 0xa8b   :  { %v2426_v27 = vpop.eup %2425 }
 0xa8c   :  { %v2428_v28 = vpop.eup %2427  ;;  %1103 = vrot.lane.b32.xlu1 %v2426_v27, %s2690_s4 }
 0xa8d   :  { %1127 = vrot.lane.b32.xlu0 %v2428_v28, %s2690_s4  ;;  %v1519_v28 = vld [vmem:[#allocation5 + $0x4] sm:$0x3] }
 0xafe   :  { %v1104_v29 = vpop.permute.xlu1 %1103 }
 0xaff   :  { %v2993_v30 = vmul.f32 %v2422_v8, %v1104_v29  ;;  %v1128_v31 = vpop.permute.xlu0 %1127 }
 0xb00   :  { %v2995_v34 = vmul.f32 %v2424_v10, %v1128_v31 }
 0xb01   :  { %1132 = vrot.lane.b32.xlu1 %v2993_v30, %s2689_s6 }
 0xb02   :  { %1201 = vrot.lane.b32.xlu0 %v2995_v34, %s2690_s4 }
 0xb05   :  { %1206 = vrot.lane.b32.xlu1 %v1100_v22, %s2691_s5 }
 0xb73   :  { %v1133_v35 = vpop.permute.xlu1 %1132 }
 0xb74   :  { %1135 = vst.msk [vmem:[#allocation15 + $0x6] sm:$0x3] %vm470_vm4, %v1133_v35  ;;  %v1202_v37 = vpop.permute.xlu0 %1201 }
 0xb75   :  { %v1204_v38 = vsel %vm331_vm2, %v1133_v35, %v1202_v37 }
 0xb76   :  { %2179 = vmatmul.mubr.msk.f32.vlgmr.msra.gmra.mrb[6].mxu0 %vm335_vm3, %v1204_v38 }
 0xb77   :  { %2320 = vmatpush1.bf16.msra.mxu0 %v2840_v15  ;;  %1731 = vmatprep.mubr.f32.mxu0 %v2688_v0  ;;  %v1207_v48 = vpop.permute.xlu1 %1206 }
 0xb78   :  { %2322 = vmatprep.subr.bf16.mxu0 %v2843_v18  ;;  %v1209_v50 = vsel %vm331_vm2, %v1207_v48, %v1124_v25 }
 0xb7b   :  { %2324 = vmatpush1.bf16.msra.mxu0 %v2848_v24 }
 0xb7c   :  { %2326 = vmatprep.subr.bf16.mxu0 %v2852_v26 }
 0xb7f   :  { %2328 = vmatpush1.bf16.msra.mxu0 %v2864_v32 }
 0xb80   :  { %2330 = vmatprep.subr.bf16.mxu0 %v2868_v33 }
 0xb83   :  { %2332 = vmatpush1.bf16.msra.mxu0 %v2872_v36 }
 0xc49   :  { %v1291_v39 = vpop.f32.mrb[6].mxu0 }
 0xc4a   :  { %v1297_v41 = vadd.f32 %v1296_v40, %v1291_v39  ;;  %v1293_v42 = vpop.f32.mrb[7].mxu0 }
 0xc4b   :  { %v1299_v44 = vadd.f32 %v1298_v43, %v1293_v42 }
 0xc4c   :  { %2429 = vtanh.f32 %v1297_v41  ;;  %v2180_v51 = vmul.f32 -1.442695, %v1297_v41 }
 0xc4d   :  { %2431 = vtanh.f32 %v1299_v44  ;;  %v2181_v52 = vmul.f32 -1.442695, %v1299_v44 }
 0xc4e   :  { %2433 = vpow2.f32 %v2180_v51 }
 0xc4f   :  { %2435 = vpow2.f32 %v2181_v52 }
 0xc56   :  { %v2430_v45 = vpop.eup %2429 }
 0xc57   :  { %v2432_v46 = vpop.eup %2431  ;;  %1313 = vrot.lane.b32.xlu0 %v2430_v45, %s2690_s4 }
 0xc58   :  { %1337 = vrot.lane.b32.xlu1 %v2432_v46, %s2690_s4  ;;  %v2434_v53 = vpop.eup %2433 }
 0xc59   :  { %v2436_v54 = vpop.eup %2435  ;;  %v1303_v55 = vadd.f32 1.0, %v2434_v53 }
 0xc5a   :  { %v1331_v56 = vadd.f32 1.0, %v2436_v54 }
 0xc5b   :  { %1308 = vrot.lane.b32.xlu0 %v1209_v50, %s2689_s6  ;;  %2437 = vrcp.f32 %v1303_v55 }
 0xc5c   :  { %2439 = vrcp.f32 %v1331_v56 }
 0xc65   :  { %v2438_v57 = vpop.eup %2437 }
 0xc66   :  { %v2440_v59 = vpop.eup %2439 }
 0xc67   :  { %v1335_v4 = vmul.f32 %v2440_v59, %v1209_v50 }
 0xcc9   :  { %v1314_v58 = vpop.permute.xlu0 %1313 }
 0xcca   :  { %v1316_v60 = vmul.f32 %v2438_v57, %v1314_v58  ;;  %v1338_v61 = vpop.permute.xlu1 %1337 }
 0xccb   :  { %v1340_v63 = vmul.f32 %v2440_v59, %v1338_v61 }
 0xccc   :  { %1318 = vrot.lane.b32.xlu1 %v1316_v60, %s2689_s6 }
 0xccd   :  { %1342 = vrot.lane.b32.xlu0 %v1340_v63, %s2689_s6  ;;  %v1309_v7 = vpop.permute.xlu0 %1308  ;;  %v1738_v63 = vld [vmem:[#allocation4 + $0xc] sm:$0x3] }
 0xcce   :  { %v1311_v2 = vmul.f32 %v2438_v57, %v1309_v7 }
 0xd3e   :  { %v1319_v3 = vpop.permute.xlu1 %1318 }
 0xd3f   :  { %v1321_v5 = vadd.f32 %v1319_v3, %v1311_v2  ;;  %v1343_v6 = vpop.permute.xlu0 %1342  ;;  %v1740_v3 = vld [vmem:[#allocation5 + $0x2] sm:$0x3] }
 0xd40   :  { %v1345_v8 = vadd.f32 %v1343_v6, %v1335_v4 }
 0xd41   :  { %2441 = vtanh.f32 %v1321_v5 }
 0xd42   :  { %2443 = vtanh.f32 %v1345_v8 }
 0xd4b   :  { %v2442_v9 = vpop.eup %2441 }
 0xd4c   :  { %v2444_v10 = vpop.eup %2443  ;;  %1324 = vrot.lane.b32.xlu1 %v2442_v9, %s2690_s4 }
 0xd4d   :  { %1348 = vrot.lane.b32.xlu0 %v2444_v10, %s2690_s4 }
 0xdbe   :  { %v1325_v11 = vpop.permute.xlu1 %1324 }
 0xdbf   :  { %v3021_v12 = vmul.f32 %v2438_v57, %v1325_v11  ;;  %v1349_v13 = vpop.permute.xlu0 %1348 }
 0xdc0   :  { %v3023_v14 = vmul.f32 %v2440_v59, %v1349_v13 }
 0xdc1   :  { %1353 = vrot.lane.b32.xlu1 %v3021_v12, %s2689_s6 }
 0xdc2   :  { %1422 = vrot.lane.b32.xlu0 %v3023_v14, %s2690_s4 }
 0xdc5   :  { %1427 = vrot.lane.b32.xlu1 %v1321_v5, %s2691_s5 }
 0xe33   :  { %v1354_v16 = vpop.permute.xlu1 %1353 }
 0xe34   :  { %1356 = vst.msk [vmem:[#allocation15 + $0x8] sm:$0x3] %vm470_vm4, %v1354_v16  ;;  %v1423_v17 = vpop.permute.xlu0 %1422 }
 0xe35   :  { %v1425_v20 = vsel %vm331_vm2, %v1354_v16, %v1423_v17 }
 0xe36   :  { %2182 = vmatmul.mubr.msk.f32.vlgmr.msra.gmra.mrb[6].mxu1 %vm335_vm3, %v1425_v20 }
 0xe37   :  { %2336 = vmatpush1.bf16.msra.mxu1 %v2840_v15  ;;  %1951 = vmatprep.mubr.f32.mxu1 %v2688_v0  ;;  %v1428_v29 = vpop.permute.xlu1 %1427 }
 0xe38   :  { %2338 = vmatprep.subr.bf16.mxu1 %v2843_v18 }
 0xe3b   :  { %2340 = vmatpush1.bf16.msra.mxu1 %v2848_v24  ;;  %v1430_v24 = vsel %vm331_vm2, %v1428_v29, %v1345_v8 }
 0xe3c   :  { %2342 = vmatprep.subr.bf16.mxu1 %v2852_v26 }
 0xe3f   :  { %2344 = vmatpush1.bf16.msra.mxu1 %v2864_v32 }
 0xe40   :  { %2346 = vmatprep.subr.bf16.mxu1 %v2868_v33 }
 0xe43   :  { %2348 = vmatpush1.bf16.msra.mxu1 %v2872_v36 }
 0xf09   :  { %v1512_v22 = vpop.f32.mrb[6].mxu1 }
 0xf0a   :  { %v1518_v25 = vadd.f32 %v1517_v23, %v1512_v22  ;;  %v1514_v27 = vpop.f32.mrb[7].mxu1 }
 0xf0b   :  { %v1520_v15 = vadd.f32 %v1519_v28, %v1514_v27 }
 0xf0c   :  { %2445 = vtanh.f32 %v1518_v25  ;;  %v2183_v26 = vmul.f32 -1.442695, %v1518_v25 }
 0xf0d   :  { %2447 = vtanh.f32 %v1520_v15  ;;  %v2184_v32 = vmul.f32 -1.442695, %v1520_v15 }
 0xf0e   :  { %2449 = vpow2.f32 %v2183_v26 }
 0xf0f   :  { %2451 = vpow2.f32 %v2184_v32 }
 0xf16   :  { %v2446_v0 = vpop.eup %2445 }
 0xf17   :  { %v2448_v18 = vpop.eup %2447  ;;  %1534 = vrot.lane.b32.xlu0 %v2446_v0, %s2690_s4 }
 0xf18   :  { %1558 = vrot.lane.b32.xlu1 %v2448_v18, %s2690_s4  ;;  %v2450_v33 = vpop.eup %2449 }
 0xf19   :  { %v2452_v36 = vpop.eup %2451  ;;  %v1524_v31 = vadd.f32 1.0, %v2450_v33 }
 0xf1a   :  { %v1552_v35 = vadd.f32 1.0, %v2452_v36 }
 0xf1b   :  { %1529 = vrot.lane.b32.xlu0 %v1430_v24, %s2689_s6  ;;  %2453 = vrcp.f32 %v1524_v31 }
 0xf1c   :  { %2455 = vrcp.f32 %v1552_v35 }
 0xf25   :  { %v2454_v37 = vpop.eup %2453 }
 0xf26   :  { %v2456_v39 = vpop.eup %2455 }
 0xf27   :  { %v1556_v46 = vmul.f32 %v2456_v39, %v1430_v24 }
 0xf89   :  { %v1535_v38 = vpop.permute.xlu0 %1534 }
 0xf8a   :  { %v1537_v40 = vmul.f32 %v2454_v37, %v1535_v38  ;;  %v1559_v41 = vpop.permute.xlu1 %1558 }
 0xf8b   :  { %v1561_v42 = vmul.f32 %v2456_v39, %v1559_v41 }
 0xf8c   :  { %1539 = vrot.lane.b32.xlu1 %v1537_v40, %s2689_s6 }
 0xf8d   :  { %1563 = vrot.lane.b32.xlu0 %v1561_v42, %s2689_s6  ;;  %v1530_v43 = vpop.permute.xlu0 %1529 }
 0xf8e   :  { %v1532_v44 = vmul.f32 %v2454_v37, %v1530_v43 }
 0xffe   :  { %v1540_v45 = vpop.permute.xlu1 %1539 }
 0xfff   :  { %v1542_v48 = vadd.f32 %v1540_v45, %v1532_v44  ;;  %v1564_v50 = vpop.permute.xlu0 %1563  ;;  %v1958_v44 = vld [vmem:[#allocation4 + $0xe] sm:$0x3] }
0x1000   :  { %v1566_v51 = vadd.f32 %v1564_v50, %v1556_v46 }
0x1001   :  { %2457 = vtanh.f32 %v1542_v48 }
0x1002   :  { %2459 = vtanh.f32 %v1566_v51 }
0x100b   :  { %v2458_v52 = vpop.eup %2457 }
0x100c   :  { %v2460_v53 = vpop.eup %2459  ;;  %1545 = vrot.lane.b32.xlu1 %v2458_v52, %s2690_s4 }
0x100d   :  { %1569 = vrot.lane.b32.xlu0 %v2460_v53, %s2690_s4 }
0x107e   :  { %v1546_v54 = vpop.permute.xlu1 %1545 }
0x107f   :  { %v3049_v55 = vmul.f32 %v2454_v37, %v1546_v54  ;;  %v1570_v56 = vpop.permute.xlu0 %1569 }
0x1080   :  { %v3051_v57 = vmul.f32 %v2456_v39, %v1570_v56 }
0x1081   :  { %1574 = vrot.lane.b32.xlu1 %v3049_v55, %s2689_s6 }
0x1082   :  { %1643 = vrot.lane.b32.xlu0 %v3051_v57, %s2690_s4 }
0x1085   :  { %1648 = vrot.lane.b32.xlu1 %v1542_v48, %s2691_s5  ;;  %v1960_v48 = vld [vmem:[#allocation5] sm:$0x3] }
0x10f3   :  { %v1575_v58 = vpop.permute.xlu1 %1574 }
0x10f4   :  { %1577 = vst.msk [vmem:[#allocation15 + $0xa] sm:$0x3] %vm470_vm4, %v1575_v58  ;;  %v1644_v59 = vpop.permute.xlu0 %1643 }
0x10f5   :  { %v1646_v60 = vsel %vm331_vm2, %v1575_v58, %v1644_v59 }
0x10f6   :  { %2185 = vmatmul.mubr.msk.f32.vlgmr.msra.gmra.mrb[8].mxu0 %vm335_vm3, %v1646_v60  ;;  %v484_v60 = vsel %vm483_vm5, %v2906_v19, 0.0 }
0x10f7   :  { %v1649_v8 = vpop.permute.xlu1 %1648 }
0x10f8   :  { %v1651_v9 = vsel %vm331_vm2, %v1649_v8, %v1566_v51 }
0x11c9   :  { %v1733_v61 = vpop.f32.mrb[8].mxu0 }
0x11ca   :  { %v1739_v7 = vadd.f32 %v1738_v63, %v1733_v61  ;;  %v1735_v2 = vpop.f32.mrb[9].mxu0  ;;  %v485_v63 = vrot.slane %v484_v60, 4 }
0x11cb   :  { %v1741_v4 = vadd.f32 %v1740_v3, %v1735_v2  ;;  %v493_v2 = vsel %vm483_vm5, %v2910_v21, 0.0 }
0x11cc   :  { %2461 = vtanh.f32 %v1739_v7  ;;  %v2186_v10 = vmul.f32 -1.442695, %v1739_v7 }
0x11cd   :  { %2463 = vtanh.f32 %v1741_v4  ;;  %v2187_v11 = vmul.f32 -1.442695, %v1741_v4  ;;  %v494_v4 = vrot.slane %v493_v2, 4 }
0x11ce   :  { %2465 = vpow2.f32 %v2186_v10 }
0x11cf   :  { %2467 = vpow2.f32 %v2187_v11 }
0x11d6   :  { %v2462_v5 = vpop.eup %2461 }
0x11d7   :  { %v2464_v6 = vpop.eup %2463  ;;  %1755 = vrot.lane.b32.xlu0 %v2462_v5, %s2690_s4  ;;  %v486_v5 = vadd.f32 %v485_v63, %v484_v60  ;;  %v926_v63 = vsel %vm483_vm5, %v2964_v47, 0.0 }
0x11d8   :  { %1779 = vrot.lane.b32.xlu1 %v2464_v6, %s2690_s4  ;;  %v2466_v13 = vpop.eup %2465  ;;  %v495_v6 = vadd.f32 %v494_v4, %v493_v2 }
0x11d9   :  { %v2468_v16 = vpop.eup %2467  ;;  %v1745_v17 = vadd.f32 1.0, %v2466_v13  ;;  %v487_v8 = vrot.slane %v486_v5, 2 }
0x11da   :  { %v1773_v20 = vadd.f32 1.0, %v2468_v16 }
0x11db   :  { %1750 = vrot.lane.b32.xlu0 %v1651_v9, %s2689_s6  ;;  %2469 = vrcp.f32 %v1745_v17  ;;  %v488_v10 = vadd.f32 %v487_v8, %v486_v5 }
0x11dc   :  { %2471 = vrcp.f32 %v1773_v20 }
0x11e5   :  { %v2470_v22 = vpop.eup %2469 }
0x11e6   :  { %v2472_v25 = vpop.eup %2471 }
0x11e7   :  { %v1777_v24 = vmul.f32 %v2472_v25, %v1651_v9  ;;  %v496_v9 = vrot.slane %v495_v6, 2 }
0x1249   :  { %v1756_v23 = vpop.permute.xlu0 %1755 }
0x124a   :  { %v1758_v27 = vmul.f32 %v2470_v22, %v1756_v23  ;;  %v1780_v28 = vpop.permute.xlu1 %1779 }
0x124b   :  { %v1782_v15 = vmul.f32 %v2472_v25, %v1780_v28 }
0x124c   :  { %1760 = vrot.lane.b32.xlu1 %v1758_v27, %s2689_s6 }
0x124d   :  { %1784 = vrot.lane.b32.xlu0 %v1782_v15, %s2689_s6  ;;  %v1751_v0 = vpop.permute.xlu0 %1750 }
0x124e   :  { %v1753_v18 = vmul.f32 %v2470_v22, %v1751_v0  ;;  %v511_v0 = vmul.f32 %v2906_v19, %v2906_v19  ;;  %v732_v19 = vmul.f32 %v2935_v62, %v2935_v62 }
0x12be   :  { %v1761_v29 = vpop.permute.xlu1 %1760 }
0x12bf   :  { %v1763_v26 = vadd.f32 %v1761_v29, %v1753_v18  ;;  %v1785_v32 = vpop.permute.xlu0 %1784  ;;  %v520_v18 = vmul.f32 %v2910_v21, %v2910_v21  ;;  %v512_v29 = vsel %vm483_vm5, %v511_v0, 0.0 }
0x12c0   :  { %v1787_v33 = vadd.f32 %v1785_v32, %v1777_v24  ;;  %v741_v32 = vmul.f32 %v2937_v1, %v2937_v1 }
0x12c1   :  { %2473 = vtanh.f32 %v1763_v26  ;;  %v521_v24 = vsel %vm483_vm5, %v520_v18, 0.0 }
0x12c2   :  { %2475 = vtanh.f32 %v1787_v33 }
0x12cb   :  { %v2474_v36 = vpop.eup %2473 }
0x12cc   :  { %v2476_v31 = vpop.eup %2475  ;;  %1766 = vrot.lane.b32.xlu1 %v2474_v36, %s2690_s4 }
0x12cd   :  { %1790 = vrot.lane.b32.xlu0 %v2476_v31, %s2690_s4  ;;  %v522_v31 = vrot.slane %v521_v24, 4 }
0x133e   :  { %v1767_v35 = vpop.permute.xlu1 %1766 }
0x133f   :  { %v3069_v37 = vmul.f32 %v2470_v22, %v1767_v35  ;;  %v1791_v38 = vpop.permute.xlu0 %1790  ;;  %v497_v22 = vadd.f32 %v496_v9, %v495_v6  ;;  %v705_v35 = vsel %vm483_vm5, %v2935_v62, 0.0  ;;  %v927_v9 = vrot.slane %v926_v63, 4 }
0x1340   :  { %v3071_v39 = vmul.f32 %v2472_v25, %v1791_v38  ;;  %v489_v25 = vrot.slane %v488_v10, 1 }
0x1341   :  { %1795 = vrot.lane.b32.xlu1 %v3069_v37, %s2689_s6  ;;  %v498_v27 = vrot.slane %v497_v22, 1 }
0x1342   :  { %1864 = vrot.lane.b32.xlu0 %v3071_v39, %s2690_s4  ;;  %v490_v28 = vadd.f32 %v489_v25, %v488_v10 }
0x1343   :  { %v499_v15 = vadd.f32 %v498_v27, %v497_v22 }
0x1345   :  { %1869 = vrot.lane.b32.xlu1 %v1763_v26, %s2691_s5  ;;  %v513_v26 = vrot.slane %v512_v29, 4 }
0x13b3   :  { %v1796_v40 = vpop.permute.xlu1 %1795 }
0x13b4   :  { %1798 = vst.msk [vmem:[#allocation15 + $0xc] sm:$0x3] %vm470_vm4, %v1796_v40  ;;  %v1865_v41 = vpop.permute.xlu0 %1864 }
0x13b5   :  { %v1867_v42 = vsel %vm331_vm2, %v1796_v40, %v1865_v41  ;;  %v514_v40 = vadd.f32 %v513_v26, %v512_v29  ;;  %v742_v41 = vsel %vm483_vm5, %v741_v32, 0.0 }
0x13b6   :  { %2188 = vmatmul.mubr.msk.f32.vlgmr.msra.gmra.mrb[8].mxu1 %vm335_vm3, %v1867_v42  ;;  %v743_v62 = vrot.slane %v742_v41, 4 }
0x13b7   :  { %v1870_v53 = vpop.permute.xlu1 %1869 }
0x13b8   :  { %v1872_v54 = vsel %vm331_vm2, %v1870_v53, %v1787_v33  ;;  %v714_v33 = vsel %vm483_vm5, %v2937_v1, 0.0  ;;  %v515_v53 = vrot.slane %v514_v40, 2 }
0x13ba   :  { %v516_v6 = vadd.f32 %v515_v53, %v514_v40 }
0x13bc   :  { %v517_v18 = vrot.slane %v516_v6, 1 }
0x1489   :  { %v1953_v43 = vpop.f32.mrb[8].mxu1 }
0x148a   :  { %v1959_v45 = vadd.f32 %v1958_v44, %v1953_v43  ;;  %v1955_v46 = vpop.f32.mrb[9].mxu1  ;;  %v523_v44 = vadd.f32 %v522_v31, %v521_v24  ;;  %v928_v24 = vadd.f32 %v927_v9, %v926_v63  ;;  %v1395_v63 = vmul.f32 %v3021_v12, %v3021_v12 }
0x148b   :  { %v1961_v50 = vadd.f32 %v1960_v48, %v1955_v46 }
0x148c   :  { %2477 = vtanh.f32 %v1959_v45  ;;  %v2189_v56 = vmul.f32 -1.442695, %v1959_v45  ;;  %v706_v45 = vrot.slane %v705_v35, 4 }
0x148d   :  { %2479 = vtanh.f32 %v1961_v50  ;;  %v2190_v58 = vmul.f32 -1.442695, %v1961_v50  ;;  %v733_v50 = vsel %vm483_vm5, %v732_v19, 0.0 }
0x148e   :  { %2481 = vpow2.f32 %v2189_v56  ;;  %v935_v56 = vsel %vm483_vm5, %v2966_v49, 0.0  ;;  %v707_v60 = vadd.f32 %v706_v45, %v705_v35 }
0x148f   :  { %2483 = vpow2.f32 %v2190_v58  ;;  %v936_v4 = vrot.slane %v935_v56, 4 }
0x1490   :  { %v708_v10 = vrot.slane %v707_v60, 2 }
0x1491   :  { %v937_v25 = vadd.f32 %v936_v4, %v935_v56 }
0x1492   :  { %v709_v32 = vadd.f32 %v708_v10, %v707_v60 }
0x1496   :  { %v2478_v51 = vpop.eup %2477 }
0x1497   :  { %v2480_v52 = vpop.eup %2479  ;;  %1975 = vrot.lane.b32.xlu0 %v2478_v51, %s2690_s4 }
0x1498   :  { %1999 = vrot.lane.b32.xlu1 %v2480_v52, %s2690_s4  ;;  %v2482_v59 = vpop.eup %2481 }
0x1499   :  { %v2484_v61 = vpop.eup %2483  ;;  %v1965_v7 = vadd.f32 1.0, %v2482_v59  ;;  %v524_v59 = vrot.slane %v523_v44, 2 }
0x149a   :  { %v1993_v3 = vadd.f32 1.0, %v2484_v61  ;;  %v734_v61 = vrot.slane %v733_v50, 4 }
0x149b   :  { %1970 = vrot.lane.b32.xlu0 %v1872_v54, %s2689_s6  ;;  %2485 = vrcp.f32 %v1965_v7  ;;  %v953_v7 = vmul.f32 %v2964_v47, %v2964_v47  ;;  %v525_v5 = vadd.f32 %v524_v59, %v523_v44  ;;  %v1174_v47 = vmul.f32 %v2993_v30, %v2993_v30 }
0x149c   :  { %2487 = vrcp.f32 %v1993_v3  ;;  %v744_v3 = vadd.f32 %v743_v62, %v742_v41  ;;  %v710_v44 = vrot.slane %v709_v32, 1 }
0x149d   :  { %v526_v0 = vrot.slane %v525_v5, 1  ;;  %v1175_v19 = vsel %vm483_vm5, %v1174_v47, 0.0 }
0x149e   :  { %v745_v22 = vrot.slane %v744_v3, 2  ;;  %v1176_v62 = vrot.slane %v1175_v19, 4 }
0x149f   :  { %v527_v41 = vadd.f32 %v526_v0, %v525_v5 }
0x14a0   :  { %v746_v35 = vadd.f32 %v745_v22, %v744_v3  ;;  %v711_v3 = vadd.f32 %v710_v44, %v709_v32  ;;  %v1177_v10 = vadd.f32 %v1176_v62, %v1175_v19  ;;  %v1396_v22 = vsel %vm483_vm5, %v1395_v63, 0.0 }
0x14a1   :  { %v1625_v19 = vmul.f32 %v3051_v57, %v3051_v57 }
0x14a2   :  { %v747_v56 = vrot.slane %v746_v35, 1 }
0x14a5   :  { %v3089_v11 = vpop.eup %2485 }
0x14a6   :  { %v3091_v16 = vpop.eup %2487 }
0x14a7   :  { %v1997_v43 = vmul.f32 %v3091_v16, %v1872_v54  ;;  %v962_v54 = vmul.f32 %v2966_v49, %v2966_v49 }
0x14a9   :  { %v963_v8 = vsel %vm483_vm5, %v962_v54, 0.0 }
0x14aa   :  { %v964_v27 = vrot.slane %v963_v8, 4 }
0x14ac   :  { %v965_v40 = vadd.f32 %v964_v27, %v963_v8  ;;  %v748_v8 = vadd.f32 %v747_v56, %v746_v35  ;;  %v1598_v35 = vsel %vm483_vm5, %v3051_v57, 0.0 }
0x1509   :  { %v1976_v13 = vpop.permute.xlu0 %1975 }
0x150a   :  { %v1978_v17 = vmul.f32 %v3089_v11, %v1976_v13  ;;  %v2000_v20 = vpop.permute.xlu1 %1999  ;;  %v735_v13 = vadd.f32 %v734_v61, %v733_v50  ;;  %v1368_v61 = vsel %vm483_vm5, %v3021_v12, 0.0 }
0x150b   :  { %v2002_v23 = vmul.f32 %v3091_v16, %v2000_v20 }
0x150c   :  { %1980 = vrot.lane.b32.xlu1 %v1978_v17, %s2689_s6  ;;  %v954_v17 = vsel %vm483_vm5, %v953_v7, 0.0  ;;  %v1377_v7 = vsel %vm483_vm5, %v3023_v14, 0.0 }
0x150d   :  { %2004 = vrot.lane.b32.xlu0 %v2002_v23, %s2689_s6  ;;  %v1971_v36 = vpop.permute.xlu0 %1970  ;;  %v1147_v23 = vsel %vm483_vm5, %v2993_v30, 0.0  ;;  %v955_v26 = vrot.slane %v954_v17, 4 }
0x150e   :  { %v1973_v38 = vmul.f32 %v3089_v11, %v1971_v36  ;;  %v1148_v31 = vrot.slane %v1147_v23, 4 }
0x150f   :  { %v956_v50 = vadd.f32 %v955_v26, %v954_v17  ;;  %v1378_v17 = vrot.slane %v1377_v7, 4 }
0x1510   :  { %473 = vrot.lane.b32.xlu1 %v2910_v21, %s2689_s6  ;;  %v715_v21 = vrot.slane %v714_v33, 4 }
0x1511   :  { %503 = vrot.lane.b32.xlu0 %v490_v28, %s2689_s6  ;;  %v1156_v28 = vsel %vm483_vm5, %v2995_v34, 0.0  ;;  %v1379_v26 = vadd.f32 %v1378_v17, %v1377_v7  ;;  %v1846_v17 = vmul.f32 %v3071_v39, %v3071_v39 }
0x1512   :  { %v716_v52 = vadd.f32 %v715_v21, %v714_v33  ;;  %v736_v33 = vrot.slane %v735_v13, 2  ;;  %v1157_v21 = vrot.slane %v1156_v28, 4 }
0x1513   :  { %v1380_v44 = vrot.slane %v1379_v26, 2 }
0x1514   :  { %507 = vrot.lane.b32.xlu1 %v499_v15, %s2690_s4  ;;  %v717_v2 = vrot.slane %v716_v52, 2  ;;  %v1183_v15 = vmul.f32 %v2995_v34, %v2995_v34  ;;  %v737_v45 = vadd.f32 %v736_v33, %v735_v13  ;;  %v1158_v59 = vadd.f32 %v1157_v21, %v1156_v28 }
0x1515   :  { %v1369_v13 = vrot.slane %v1368_v61, 4  ;;  %v1381_v63 = vadd.f32 %v1380_v44, %v1379_v26 }
0x1516   :  { %v718_v20 = vadd.f32 %v717_v2, %v716_v52  ;;  %v1149_v52 = vadd.f32 %v1148_v31, %v1147_v23  ;;  %v1404_v2 = vmul.f32 %v3023_v14, %v3023_v14  ;;  %v738_v4 = vrot.slane %v737_v45, 1 }
0x1517   :  { %v1159_v23 = vrot.slane %v1158_v59, 2 }
0x1518   :  { %v719_v30 = vrot.slane %v718_v20, 1  ;;  %v1150_v9 = vrot.slane %v1149_v52, 2  ;;  %v739_v27 = vadd.f32 %v738_v4, %v737_v45 }
0x1519   :  { %v1160_v31 = vadd.f32 %v1159_v23, %v1158_v59  ;;  %v1382_v23 = vrot.slane %v1381_v63, 1 }
0x151a   :  { %v720_v53 = vadd.f32 %v719_v30, %v718_v20  ;;  %v1151_v0 = vadd.f32 %v1150_v9, %v1149_v52  ;;  %v1599_v52 = vrot.slane %v1598_v35, 4 }
0x151c   :  { %v1600_v4 = vadd.f32 %v1599_v52, %v1598_v35 }
0x157e   :  { %v1981_v42 = vpop.permute.xlu1 %1980 }
0x157f   :  { %v3118_v46 = vadd.f32 %v1981_v42, %v1973_v38  ;;  %v2005_v48 = vpop.permute.xlu0 %2004  ;;  %v938_v38 = vrot.slane %v937_v25, 2  ;;  %v518_v42 = vadd.f32 %v517_v18, %v516_v6  ;;  %v957_v6 = vrot.slane %v956_v50, 2 }
0x1580   :  { %v3121_v51 = vadd.f32 %v2005_v48, %v1997_v43  ;;  %v1184_v43 = vsel %vm483_vm5, %v1183_v15, 0.0  ;;  %v929_v48 = vrot.slane %v928_v24, 2  ;;  %v1178_v18 = vrot.slane %v1177_v10, 2 }
0x1581   :  { %2489 = vtanh.f32 %v3118_v46  ;;  %v939_v54 = vadd.f32 %v938_v38, %v937_v25  ;;  %v1185_v60 = vrot.slane %v1184_v43, 4  ;;  %v1405_v25 = vsel %vm483_vm5, %v1404_v2, 0.0 }
0x1582   :  { %2491 = vtanh.f32 %v3121_v51  ;;  %v474_v58 = vpop.permute.xlu1 %473  ;;  %v930_v5 = vadd.f32 %v929_v48, %v928_v24  ;;  %v958_v15 = vadd.f32 %v957_v6, %v956_v50  ;;  %v1397_v24 = vrot.slane %v1396_v22, 4 }
0x1583   :  { %476 = vst.msk [vmem:[#allocation16 + $0xe] sm:$0x3] %vm470_vm4, %v474_v58  ;;  %v966_v58 = vrot.slane %v965_v40, 2  ;;  %v940_v12 = vrot.slane %v939_v54, 1  ;;  %v1186_v47 = vadd.f32 %v1185_v60, %v1184_v43  ;;  %v1406_v32 = vrot.slane %v1405_v25, 4 }
0x1584   :  { %v931_v28 = vrot.slane %v930_v5, 1  ;;  %v959_v38 = vrot.slane %v958_v15, 1  ;;  %v1179_v43 = vadd.f32 %v1178_v18, %v1177_v10  ;;  %v1398_v50 = vadd.f32 %v1397_v24, %v1396_v22 }
0x1585   :  { %v967_v20 = vadd.f32 %v966_v58, %v965_v40  ;;  %v941_v33 = vadd.f32 %v940_v12, %v939_v54  ;;  %v1187_v30 = vrot.slane %v1186_v47, 2  ;;  %v1589_v40 = vsel %vm483_vm5, %v3049_v55, 0.0 }
0x1586   :  { %v932_v21 = vadd.f32 %v931_v28, %v930_v5  ;;  %v1407_v48 = vadd.f32 %v1406_v32, %v1405_v25  ;;  %v1590_v54 = vrot.slane %v1589_v40, 4  ;;  %v1626_v58 = vsel %vm483_vm5, %v1625_v19, 0.0 }
0x1587   :  { %v1188_v56 = vadd.f32 %v1187_v30, %v1186_v47  ;;  %v960_v59 = vadd.f32 %v959_v38, %v958_v15  ;;  %v1627_v5 = vrot.slane %v1626_v58, 4  ;;  %v1810_v12 = vsel %vm483_vm5, %v3069_v37, 0.0 }
0x1588   :  { %v1408_v2 = vrot.slane %v1407_v48, 2  ;;  %v1591_v9 = vadd.f32 %v1590_v54, %v1589_v40  ;;  %v1811_v26 = vrot.slane %v1810_v12, 4  ;;  %v1847_v32 = vsel %vm483_vm5, %v1846_v17, 0.0 }
0x1589   :  { %v1628_v18 = vadd.f32 %v1627_v5, %v1626_v58  ;;  %v1848_v19 = vrot.slane %v1847_v32, 4 }
0x158a   :  { %v1409_v25 = vadd.f32 %v1408_v2, %v1407_v48 }
0x158b   :  { %v2490_v29 = vpop.eup %2489  ;;  %v1629_v38 = vrot.slane %v1628_v18, 2 }
0x158c   :  { %v2492_v36 = vpop.eup %2491  ;;  %1986 = vrot.lane.b32.xlu1 %v2490_v29, %s2690_s4  ;;  %v1370_v29 = vadd.f32 %v1369_v13, %v1368_v61  ;;  %v1180_v61 = vrot.slane %v1179_v43, 1  ;;  %v1819_v13 = vsel %vm483_vm5, %v3071_v39, 0.0 }
0x158d   :  { %2010 = vrot.lane.b32.xlu0 %v2492_v36, %s2690_s4  ;;  %v968_v36 = vrot.slane %v967_v20, 1  ;;  %v1820_v28 = vrot.slane %v1819_v13, 4 }
0x158e   :  { %v1371_v45 = vrot.slane %v1370_v29, 2  ;;  %v1181_v22 = vadd.f32 %v1180_v61, %v1179_v43 }
0x158f   :  { %v969_v62 = vadd.f32 %v968_v36, %v967_v20  ;;  %v1837_v20 = vmul.f32 %v3069_v37, %v3069_v37  ;;  %v1821_v35 = vadd.f32 %v1820_v28, %v1819_v13 }
0x1590   :  { %534 = vrot.lane.b32.xlu1 %v527_v41, %s2690_s4  ;;  %v1616_v41 = vmul.f32 %v3049_v55, %v3049_v55  ;;  %v1372_v7 = vadd.f32 %v1371_v45, %v1370_v29  ;;  %v1592_v29 = vrot.slane %v1591_v9, 2 }
0x1591   :  { %530 = vrot.lane.b32.xlu0 %v518_v42, %s2689_s6  ;;  %v1152_v42 = vrot.slane %v1151_v0, 1  ;;  %v1838_v37 = vsel %vm483_vm5, %v1837_v20, 0.0  ;;  %v1822_v52 = vrot.slane %v1821_v35, 2 }
0x1592   :  { %v1617_v55 = vsel %vm483_vm5, %v1616_v41, 0.0  ;;  %v1373_v47 = vrot.slane %v1372_v7, 1  ;;  %v1593_v40 = vadd.f32 %v1592_v29, %v1591_v9  ;;  %v1839_v43 = vrot.slane %v1838_v37, 4 }
0x1593   :  { %v1153_v60 = vadd.f32 %v1152_v42, %v1151_v0  ;;  %v1618_v10 = vrot.slane %v1617_v55, 4  ;;  %v1601_v0 = vrot.slane %v1600_v4, 2  ;;  %v1812_v42 = vadd.f32 %v1811_v26, %v1810_v12 }
0x1594   :  { %728 = vrot.lane.b32.xlu1 %v720_v53, %s2690_s4  ;;  %v1161_v53 = vrot.slane %v1160_v31, 1  ;;  %v1374_v36 = vadd.f32 %v1373_v47, %v1372_v7  ;;  %v1594_v54 = vrot.slane %v1593_v40, 1  ;;  %v508_v47 = vpop.permute.xlu1 %507 }
0x1595   :  { %724 = vrot.lane.b32.xlu0 %v711_v3, %s2689_s6  ;;  %v1399_v3 = vrot.slane %v1398_v50, 2  ;;  %v1619_v24 = vadd.f32 %v1618_v10, %v1617_v55 }
0x1596   :  { %v1162_v6 = vadd.f32 %v1161_v53, %v1160_v31  ;;  %v1410_v31 = vrot.slane %v1409_v25, 1  ;;  %v1813_v53 = vrot.slane %v1812_v42, 2  ;;  %v1595_v2 = vadd.f32 %v1594_v54, %v1593_v40 }
0x1597   :  { %v1620_v41 = vrot.slane %v1619_v24, 2 }
0x1598   :  { %755 = vrot.lane.b32.xlu1 %v748_v8, %s2690_s4  ;;  %v1189_v8 = vrot.slane %v1188_v56, 1  ;;  %v1411_v44 = vadd.f32 %v1410_v31, %v1409_v25  ;;  %v504_v25 = vpop.permute.xlu0 %503 }
0x1599   :  { %751 = vrot.lane.b32.xlu0 %v739_v27, %s2689_s6  ;;  %v1400_v27 = vadd.f32 %v1399_v3, %v1398_v50  ;;  %v1630_v50 = vadd.f32 %v1629_v38, %v1628_v18  ;;  %v1621_v58 = vadd.f32 %v1620_v41, %v1619_v24 }
0x159a   :  { %v1190_v15 = vadd.f32 %v1189_v8, %v1188_v56  ;;  %v1840_v56 = vadd.f32 %v1839_v43, %v1838_v37 }
0x159b   :  { %v1401_v30 = vrot.slane %v1400_v27, 1  ;;  %v1631_v55 = vrot.slane %v1630_v50, 1  ;;  %v1622_v3 = vrot.slane %v1621_v58, 1 }
0x159c   :  { %949 = vrot.lane.b32.xlu1 %v941_v33, %s2690_s4  ;;  %v1383_v33 = vadd.f32 %v1382_v23, %v1381_v63  ;;  %v1814_v63 = vadd.f32 %v1813_v53, %v1812_v42  ;;  %v1841_v7 = vrot.slane %v1840_v56, 2 }
0x159d   :  { %945 = vrot.lane.b32.xlu0 %v932_v21, %s2689_s6  ;;  %v1602_v21 = vadd.f32 %v1601_v0, %v1600_v4  ;;  %v1402_v45 = vadd.f32 %v1401_v30, %v1400_v27  ;;  %v1632_v4 = vadd.f32 %v1631_v55, %v1630_v50  ;;  %v1623_v8 = vadd.f32 %v1622_v3, %v1621_v58 }
0x159e   :  { %v1815_v9 = vrot.slane %v1814_v63, 1  ;;  %v1842_v10 = vadd.f32 %v1841_v7, %v1840_v56 }
0x159f   :  { %v1603_v48 = vrot.slane %v1602_v21, 1 }
0x15a0   :  { %976 = vrot.lane.b32.xlu1 %v969_v62, %s2690_s4  ;;  %v1849_v62 = vadd.f32 %v1848_v19, %v1847_v32  ;;  %v1816_v12 = vadd.f32 %v1815_v9, %v1814_v63  ;;  %v1843_v20 = vrot.slane %v1842_v10, 1 }
0x15a1   :  { %972 = vrot.lane.b32.xlu0 %v960_v59, %s2689_s6  ;;  %v1604_v59 = vadd.f32 %v1603_v48, %v1602_v21 }
0x15a2   :  { %v1850_v61 = vrot.slane %v1849_v62, 2  ;;  %v1844_v23 = vadd.f32 %v1843_v20, %v1842_v10 }
0x15a4   :  { %1170 = vrot.lane.b32.xlu1 %v1162_v6, %s2690_s4  ;;  %v1851_v6 = vadd.f32 %v1850_v61, %v1849_v62 }
0x15a5   :  { %1166 = vrot.lane.b32.xlu0 %v1153_v60, %s2689_s6  ;;  %v1823_v60 = vadd.f32 %v1822_v52, %v1821_v35 }
0x15a6   :  { %v1852_v17 = vrot.slane %v1851_v6, 1 }
0x15a7   :  { %v1824_v5 = vrot.slane %v1823_v60, 1 }
0x15a8   :  { %1197 = vrot.lane.b32.xlu1 %v1190_v15, %s2690_s4 }
0x15a9   :  { %1193 = vrot.lane.b32.xlu0 %v1181_v22, %s2689_s6  ;;  %v1825_v13 = vadd.f32 %v1824_v5, %v1823_v60  ;;  %v1853_v22 = vadd.f32 %v1852_v17, %v1851_v6  ;;  %v510_v60 = vsel %vm331_vm2, %v504_v25, %v508_v47 }
0x15ac   :  { %1391 = vrot.lane.b32.xlu1 %v1383_v33, %s2690_s4 }
0x15ad   :  { %1387 = vrot.lane.b32.xlu0 %v1374_v36, %s2689_s6 }
0x15b0   :  { %1418 = vrot.lane.b32.xlu1 %v1411_v44, %s2690_s4 }
0x15b1   :  { %1414 = vrot.lane.b32.xlu0 %v1402_v45, %s2689_s6 }
0x15b4   :  { %1612 = vrot.lane.b32.xlu1 %v1604_v59, %s2690_s4 }
0x15b5   :  { %1608 = vrot.lane.b32.xlu0 %v1595_v2, %s2689_s6 }
0x15b8   :  { %1639 = vrot.lane.b32.xlu1 %v1632_v4, %s2690_s4 }
0x15b9   :  { %1635 = vrot.lane.b32.xlu0 %v1623_v8, %s2689_s6 }
0x15bc   :  { %1833 = vrot.lane.b32.xlu1 %v1825_v13, %s2690_s4 }
0x15bd   :  { %1829 = vrot.lane.b32.xlu0 %v1816_v12, %s2689_s6 }
0x15c0   :  { %1860 = vrot.lane.b32.xlu1 %v1853_v22, %s2690_s4 }
0x15c1   :  { %1856 = vrot.lane.b32.xlu0 %v1844_v23, %s2689_s6 }
0x15c4   :  { %916 = vrot.lane.b32.xlu1 %v2966_v49, %s2689_s6 }
0x15c5   :  { %695 = vrot.lane.b32.xlu0 %v2937_v1, %s2689_s6 }
0x15c8   :  { %1358 = vrot.lane.b32.xlu1 %v3023_v14, %s2689_s6 }
0x15c9   :  { %1137 = vrot.lane.b32.xlu0 %v2995_v34, %s2689_s6 }
0x15cc   :  { %1800 = vrot.lane.b32.xlu1 %v3071_v39, %s2689_s6 }
0x15cd   :  { %1579 = vrot.lane.b32.xlu0 %v3051_v57, %s2689_s6 }
0x15fe   :  { %v1987_v27 = vpop.permute.xlu1 %1986 }
0x15ff   :  { %v1989_v49 = vmul.f32 %v3089_v11, %v1987_v27  ;;  %v2011_v28 = vpop.permute.xlu0 %2010 }
0x1600   :  { %v2013_v1 = vmul.f32 %v3091_v16, %v2011_v28 }
0x1601   :  { %v2030_v15 = vsel %vm483_vm5, %v1989_v49, 0.0  ;;  %v2057_v14 = vmul.f32 %v1989_v49, %v1989_v49 }
0x1602   :  { %v2031_v0 = vrot.slane %v2030_v15, 4  ;;  %v2039_v34 = vsel %vm483_vm5, %v2013_v1, 0.0  ;;  %v2066_v18 = vmul.f32 %v2013_v1, %v2013_v1  ;;  %v535_v29 = vpop.permute.xlu1 %534 }
0x1603   :  { %v2058_v39 = vsel %vm483_vm5, %v2057_v14, 0.0  ;;  %v2040_v24 = vrot.slane %v2039_v34, 4  ;;  %v531_v57 = vpop.permute.xlu0 %530 }
0x1604   :  { %v2032_v26 = vadd.f32 %v2031_v0, %v2030_v15  ;;  %v2059_v32 = vrot.slane %v2058_v39, 4  ;;  %v2067_v37 = vsel %vm483_vm5, %v2066_v18, 0.0  ;;  %v537_v11 = vsel %vm331_vm2, %v531_v57, %v535_v29 }
0x1605   :  { %v2041_v33 = vadd.f32 %v2040_v24, %v2039_v34  ;;  %v2068_v16 = vrot.slane %v2067_v37, 4 }
0x1606   :  { %v2033_v36 = vrot.slane %v2032_v26, 2  ;;  %v2060_v31 = vadd.f32 %v2059_v32, %v2058_v39  ;;  %v729_v30 = vpop.permute.xlu1 %728 }
0x1607   :  { %v725_v35 = vpop.permute.xlu0 %724  ;;  %v2042_v19 = vrot.slane %v2041_v33, 2  ;;  %v2069_v21 = vadd.f32 %v2068_v16, %v2067_v37 }
0x1608   :  { %v2034_v38 = vadd.f32 %v2033_v36, %v2032_v26  ;;  %v2061_v40 = vrot.slane %v2060_v31, 2  ;;  %v731_v41 = vsel %vm331_vm2, %v725_v35, %v729_v30 }
0x1609   :  { %v2043_v42 = vadd.f32 %v2042_v19, %v2041_v33  ;;  %v2070_v43 = vrot.slane %v2069_v21, 2  ;;  %v768_v63 = vadd.f32 %v731_v41, %v510_v60 }
0x160a   :  { %v756_v44 = vpop.permute.xlu1 %755  ;;  %v2035_v45 = vrot.slane %v2034_v38, 1  ;;  %v2062_v48 = vadd.f32 %v2061_v40, %v2060_v31 }
0x160b   :  { %v752_v50 = vpop.permute.xlu0 %751  ;;  %v2044_v52 = vrot.slane %v2043_v42, 1  ;;  %v2071_v62 = vadd.f32 %v2070_v43, %v2069_v21 }
0x160c   :  { %v758_v53 = vsel %vm331_vm2, %v752_v50, %v756_v44  ;;  %v2036_v56 = vadd.f32 %v2035_v45, %v2034_v38  ;;  %v2063_v54 = vrot.slane %v2062_v48, 1  ;;  %v2098_v45 = vld [vmem:[#allocation18] sm:$0x1] }
0x160d   :  { %v769_v58 = vadd.f32 %v758_v53, %v537_v11  ;;  %v2045_v59 = vadd.f32 %v2044_v52, %v2043_v42  ;;  %v2072_v55 = vrot.slane %v2071_v62, 1 }
0x160e   :  { %2049 = vrot.lane.b32.xlu0 %v2036_v56, %s2689_s6  ;;  %v950_v61 = vpop.permute.xlu1 %949  ;;  %v2064_v3 = vadd.f32 %v2063_v54, %v2062_v48  ;;  %v2102_v56 = vld [vmem:[#allocation18 + $0x1] sm:$0x1] }
0x160f   :  { %v946_v7 = vpop.permute.xlu0 %945  ;;  %2053 = vrot.lane.b32.xlu1 %v2045_v59, %s2690_s4  ;;  %v2073_v5 = vadd.f32 %v2072_v55, %v2071_v62 }
0x1610   :  { %v952_v2 = vsel %vm331_vm2, %v946_v7, %v950_v61 }
0x1611   :  { %v989_v4 = vadd.f32 %v952_v2, %v768_v63 }
0x1612   :  { %2076 = vrot.lane.b32.xlu0 %v2064_v3, %s2689_s6  ;;  %v977_v6 = vpop.permute.xlu1 %976 }
0x1613   :  { %v973_v8 = vpop.permute.xlu0 %972  ;;  %2080 = vrot.lane.b32.xlu1 %v2073_v5, %s2690_s4 }
0x1614   :  { %v979_v9 = vsel %vm331_vm2, %v973_v8, %v977_v6 }
0x1615   :  { %v990_v10 = vadd.f32 %v979_v9, %v769_v58 }
0x1616   :  { %2020 = vrot.lane.b32.xlu0 %v2013_v1, %s2689_s6  ;;  %v1171_v13 = vpop.permute.xlu1 %1170 }
0x1617   :  { %v1167_v17 = vpop.permute.xlu0 %1166  ;;  %2015 = vrot.lane.b32.xlu1 %v1989_v49, %s2689_s6 }
0x1618   :  { %v1173_v12 = vsel %vm331_vm2, %v1167_v17, %v1171_v13 }
0x1619   :  { %v1210_v20 = vadd.f32 %v1173_v12, %v989_v4 }
0x161a   :  { %2084 = vrot.lane.b32.xlu0 %v2013_v1, %s2690_s4  ;;  %v1198_v22 = vpop.permute.xlu1 %1197 }
0x161b   :  { %v1194_v23 = vpop.permute.xlu0 %1193  ;;  %2089 = vrot.lane.b32.xlu1 %v3118_v46, %s2691_s5 }
0x161c   :  { %v1200_v47 = vsel %vm331_vm2, %v1194_v23, %v1198_v22 }
0x161d   :  { %v1211_v25 = vadd.f32 %v1200_v47, %v990_v10 }
0x161e   :  { %v1392_v27 = vpop.permute.xlu1 %1391 }
0x161f   :  { %v1388_v28 = vpop.permute.xlu0 %1387 }
0x1620   :  { %v1394_v15 = vsel %vm331_vm2, %v1388_v28, %v1392_v27 }
0x1621   :  { %v1431_v14 = vadd.f32 %v1394_v15, %v1210_v20 }
0x1622   :  { %v1419_v0 = vpop.permute.xlu1 %1418 }
0x1623   :  { %v1415_v49 = vpop.permute.xlu0 %1414 }
0x1624   :  { %v1421_v34 = vsel %vm331_vm2, %v1415_v49, %v1419_v0 }
0x1625   :  { %v1432_v18 = vadd.f32 %v1421_v34, %v1211_v25 }
0x1626   :  { %v1613_v29 = vpop.permute.xlu1 %1612 }
0x1627   :  { %v1609_v1 = vpop.permute.xlu0 %1608 }
0x1628   :  { %v1615_v39 = vsel %vm331_vm2, %v1609_v1, %v1613_v29 }
0x1629   :  { %v1652_v24 = vadd.f32 %v1615_v39, %v1431_v14 }
0x162a   :  { %v1640_v57 = vpop.permute.xlu1 %1639 }
0x162b   :  { %v1636_v46 = vpop.permute.xlu0 %1635 }
0x162c   :  { %v1642_v26 = vsel %vm331_vm2, %v1636_v46, %v1640_v57 }
0x162d   :  { %v1653_v32 = vadd.f32 %v1642_v26, %v1432_v18 }
0x162e   :  { %v1834_v37 = vpop.permute.xlu1 %1833 }
0x162f   :  { %v1830_v11 = vpop.permute.xlu0 %1829 }
0x1630   :  { %v1836_v33 = vsel %vm331_vm2, %v1830_v11, %v1834_v37 }
0x1631   :  { %v1873_v16 = vadd.f32 %v1836_v33, %v1652_v24 }
0x1632   :  { %v1861_v36 = vpop.permute.xlu1 %1860 }
0x1633   :  { %v1857_v31 = vpop.permute.xlu0 %1856 }
0x1634   :  { %v1863_v30 = vsel %vm331_vm2, %v1857_v31, %v1861_v36 }
0x1635   :  { %v1874_v35 = vadd.f32 %v1863_v30, %v1653_v32 }
0x1636   :  { %v917_v19 = vpop.permute.xlu1 %916 }
0x1637   :  { %919 = vst.msk [vmem:[#allocation16 + $0xa] sm:$0x3] %vm470_vm4, %v917_v19  ;;  %v696_v21 = vpop.permute.xlu0 %695 }
0x1638   :  { %698 = vst.msk [vmem:[#allocation16 + $0xc] sm:$0x3] %vm470_vm4, %v696_v21 }
0x163a   :  { %v1359_v38 = vpop.permute.xlu1 %1358 }
0x163b   :  { %1361 = vst.msk [vmem:[#allocation16 + $0x6] sm:$0x3] %vm470_vm4, %v1359_v38  ;;  %v1138_v40 = vpop.permute.xlu0 %1137 }
0x163c   :  { %1140 = vst.msk [vmem:[#allocation16 + $0x8] sm:$0x3] %vm470_vm4, %v1138_v40 }
0x163e   :  { %v1801_v41 = vpop.permute.xlu1 %1800 }
0x163f   :  { %1803 = vst.msk [vmem:[#allocation16 + $0x2] sm:$0x3] %vm470_vm4, %v1801_v41  ;;  %v1580_v42 = vpop.permute.xlu0 %1579 }
0x1640   :  { %1582 = vst.msk [vmem:[#allocation16 + $0x4] sm:$0x3] %vm470_vm4, %v1580_v42 }
0x1680   :  { %v2050_v43 = vpop.permute.xlu0 %2049 }
0x1681   :  { %v2054_v44 = vpop.permute.xlu1 %2053 }
0x1682   :  { %v2056_v48 = vsel %vm331_vm2, %v2050_v43, %v2054_v44 }
0x1683   :  { %v2093_v50 = vadd.f32 %v2056_v48, %v1873_v16 }
0x1684   :  { %v2077_v52 = vpop.permute.xlu0 %2076 }
0x1685   :  { %v2099_v62 = vadd.f32 %v2098_v45, %v2093_v50  ;;  %v2081_v53 = vpop.permute.xlu1 %2080 }
0x1686   :  { %v2083_v54 = vsel %vm331_vm2, %v2077_v52, %v2081_v53 }
0x1687   :  { %v2094_v58 = vadd.f32 %v2083_v54, %v1874_v35  ;;  %2101 = vst.msk [vmem:[#allocation18] sm:$0x1] %vm2100_vm6, %v2099_v62 }
0x1688   :  { %v2021_v59 = vpop.permute.xlu0 %2020 }
0x1689   :  { %v2103_v55 = vadd.f32 %v2102_v56, %v2094_v58  ;;  %2023 = vst.msk [vmem:[#allocation16] sm:$0x3] %vm470_vm4, %v2021_v59  ;;  %v2016_v60 = vpop.permute.xlu1 %2015 }
0x168a   :  { %2018 = vst.msk [vmem:[#allocation15 + $0xe] sm:$0x3] %vm470_vm4, %v2016_v60 }
0x168b   :  { %2614 = shalt.err (!%p2611_p2)
}
0x168c   :  { %s2615_s23 = scalar_lea.hbm %s3326_s8, 256 }
0x168d   :  { %p2616_p3 = scmp.ne.s32.totalorder %s3326_s8, %s2615_s23  ;;  %p2619_p4 = scmp.lt.u32.totalorder %s2615_s23, %s3326_s8 }
0x168f   :  { %p2621_p5 = pnand %p2619_p4, %p2616_p3 }
0x1691   :  { %2624 = shalt.err (!%p2621_p5)
}
0x1692   :  { %2132 = dma.vmem_to_hbm [thread:$0]  %s2127_s10, 256, %s3326_s8, [#allocation17], %s2681_s21, %s2681_s21, %s2682_s22  }
0x1693   :  { %s2625_s17 = scalar_lea.vmem %s3254_s0, 256  ;;  %p2630_p7 = scmp.lt.s32.totalorder %s3254_s0, %s3254_s0 }
0x1694   :  { %p2626_p6 = scmp.ne.s32.totalorder %s3254_s0, %s2625_s17  ;;  %p2631_p8 = scmp.lt.s32.totalorder %s2625_s17, %s2625_s17 }
0x1696   :  { %p2632_p9 = por %p2631_p8, %p2630_p7 }
0x1698   :  { %p2633_p10 = pnand %p2632_p9, %p2626_p6 }
0x169a   :  { %2636 = shalt.err (!%p2633_p10)
}
0x169b   :  { %s2637_s6 = scalar_lea.hbm %s3325_s7, 256 }
0x169c   :  { %p2638_p11 = scmp.ne.s32.totalorder %s3325_s7, %s2637_s6  ;;  %p2641_p12 = scmp.lt.u32.totalorder %s2637_s6, %s3325_s7 }
0x169e   :  { %p2643_p13 = pnand %p2641_p12, %p2638_p11 }
0x16a0   :  { %2646 = shalt.err (!%p2643_p13)
}
0x16a1   :  { %2116 = dma.vmem_to_hbm [thread:$0]  %s3254_s0, 256, %s3325_s7, [#allocation8], %s2681_s21, %s2681_s21, %s2682_s22   ;;  %2104 = vst.msk [vmem:[#allocation18 + $0x1] sm:$0x1] %vm2100_vm6, %v2103_v55  ;;  %v2085_v61 = vpop.permute.xlu0 %2084 }
0x16a2   :  { %s2647_s5 = scalar_lea.vmem %s3257_s16, 32  ;;  %p2652_p1 = scmp.lt.s32.totalorder %s3257_s16, %s3257_s16 }
0x16a3   :  { %p2648_p0 = scmp.ne.s32.totalorder %s3257_s16, %s2647_s5  ;;  %p2653_p2 = scmp.lt.s32.totalorder %s2647_s5, %s2647_s5 }
0x16a5   :  { %p2654_p3 = por %p2653_p2, %p2652_p1 }
0x16a7   :  { %p2655_p4 = pnand %p2654_p3, %p2648_p0 }
0x16a9   :  { %2658 = shalt.err (!%p2655_p4)
}
0x16aa   :  { %s2659_s14 = scalar_lea.hbm %s3327_s9, 32 }
0x16ab   :  { %p2660_p5 = scmp.ne.s32.totalorder %s3327_s9, %s2659_s14  ;;  %p2663_p6 = scmp.lt.u32.totalorder %s2659_s14, %s3327_s9 }
0x16ad   :  { %p2665_p7 = pnand %p2663_p6, %p2660_p5 }
0x16af   :  { %2668 = shalt.err (!%p2665_p7)
}
0x16b0   :  { %2142 = dma.vmem_to_hbm [thread:$0]  %s3257_s16, 32, %s3327_s9, [#allocation17]   ;;  %v2087_v63 = vsel %vm331_vm2, %v2016_v60, %v2085_v61  ;;  %v2090_v7 = vpop.permute.xlu1 %2089 }
0x16b1   :  { %2096 = vst.msk [vmem:[#allocation2] sm:$0x3] %vm111_vm0, %v2087_v63  ;;  %v2092_v2 = vsel %vm331_vm2, %v2090_v7, %v3121_v51 }
0x16b2   :  { %2097 = vst.msk [vmem:[#allocation3] sm:$0x3] %vm111_vm0, %v2092_v2 }
0x16b3   :  { %2675 = dma.done.wait [#allocation8], 256  }
0x16b4   :  { %2676 = vsyncadd [#allocation8], 4294967040 }
0x16b5   :  { %2677 = dma.done.wait [#allocation17], 288  }
0x16b6   :  { %2678 = vsyncadd [#allocation17], 4294967008 }
0x16b7   :  { %2152 = vsyncpa [#allocation7], 1 }
0x16b8   :  { %2153 = vsyncpa [#allocation10], 1 }
0x16b9   :  { %2154 = vsyncpa [#allocation13], 1 }
0x16ba   :  { %2155 = vsyncpa [#allocation8], 1 }
0x16bb   :  { %2156 = vsyncpa [#allocation17], 1 }

</bundles_post_ra>
